<compile_context>
chip_gen: v5e
topology: v5e:2x2
jax: 0.10.0
libtpu: 0.0.40
codegen_flags: <defaults>
</compile_context>

<pallas_src>
import jax
import jax.numpy as jnp
from jax.experimental import pallas as pl
from jax.experimental.pallas import tpu as pltpu

EPS = 1e-5


def _round_up(x, m):
    return ((x + m - 1) // m) * m


# --------------------------------------------------------------------------
# Kernels
# --------------------------------------------------------------------------
def _conv1_kernel(x_ref, w1_ref, y1_ref, s1_ref):
    # x_ref: [TM, Cin] f32, w1_ref: [Cin, P] bf16 -> y1 bf16 + f32 stats
    y = jnp.dot(x_ref[...].astype(jnp.bfloat16), w1_ref[...],
                preferred_element_type=jnp.float32)          # [TM, P] f32
    yb = y.astype(jnp.bfloat16)
    y1_ref[...] = yb
    yf = yb.astype(jnp.float32)                              # stats on what flows on
    stats = jnp.concatenate([jnp.sum(yf, axis=0, keepdims=True),
                             jnp.sum(yf * yf, axis=0, keepdims=True)], axis=0)
    s1_ref[...] = stats[None]                                # one store, (1,2,P)


def _conv2_kernel(y1_ref, w2_ref, ab1_ref, y2_ref, s2_ref, a3_ref):
    # y1_ref: [1, H, W, P] bf16 (raw conv1 out for one image)
    # w2_ref: [3, 3P, P] bf16   (taps grouped by dy; dx-major, cin-minor rows)
    # ab1_ref: [2, P] f32 (scale, shift) folding bn1
    # a3_ref: VMEM scratch [(H+2), W, 3P] bf16 (H-padded, dx-stacked patches)
    _, H, W, P = y1_ref.shape
    scale = ab1_ref[0:1, :].reshape(1, 1, P)
    shift = ab1_ref[1:2, :].reshape(1, 1, P)

    # bn1 + relu (f32 VPU math), then bf16 for the MXU / shuffles
    a = jnp.maximum(y1_ref[0].astype(jnp.float32) * scale + shift, 0.0)
    ab = a.astype(jnp.bfloat16)

    # dx shifts built once as a channel-stacked slab: [H, W, 3P]
    zcol = jnp.zeros((H, 1, P), jnp.bfloat16)
    left = jnp.concatenate([zcol, ab[:, :W - 1, :]], axis=1)     # a[:, w-1]
    right = jnp.concatenate([ab[:, 1:, :], zcol], axis=1)        # a[:, w+1]
    a3 = jnp.concatenate([left, ab, right], axis=-1)             # [H, W, 3P]

    # H-padded scratch: zero only the two halo row-slabs, one interior store
    a3_ref[0:1] = jnp.zeros((1, W, 3 * P), jnp.bfloat16)
    a3_ref[H + 1:H + 2] = jnp.zeros((1, W, 3 * P), jnp.bfloat16)
    a3_ref[1:H + 1] = a3

    # 3x3 conv = 3 accumulated K=3P matmuls; dy shift = leading-axis slice
    acc = jnp.dot(a3_ref[0:H].reshape(H * W, 3 * P), w2_ref[0],
                  preferred_element_type=jnp.float32)
    for dy in (1, 2):
        acc = acc + jnp.dot(a3_ref[dy:dy + H].reshape(H * W, 3 * P),
                            w2_ref[dy], preferred_element_type=jnp.float32)

    y2b = acc.astype(jnp.bfloat16)
    y2_ref[...] = y2b.reshape(1, H, W, P)
    yf = y2b.astype(jnp.float32)
    stats = jnp.concatenate([jnp.sum(yf, axis=0, keepdims=True),
                             jnp.sum(yf * yf, axis=0, keepdims=True)], axis=0)
    s2_ref[...] = stats[None]


def _conv3_residual_kernel(y2_ref, x_ref, w3_ref, ab2_ref, ab3_ref, o_ref):
    # Fused: bn2 + relu -> conv3 (1x1) -> bn3 -> residual add -> relu.
    # conv3 is recomputed here so y3 never round-trips HBM.
    a = jnp.maximum(y2_ref[...].astype(jnp.float32) * ab2_ref[0:1, :]
                    + ab2_ref[1:2, :], 0.0)
    y = jnp.dot(a.astype(jnp.bfloat16), w3_ref[...],
                preferred_element_type=jnp.float32)          # [TM, 4P] f32
    out = y * ab3_ref[0:1, :] + ab3_ref[1:2, :] + x_ref[...].astype(jnp.float32)
    o_ref[...] = jnp.maximum(out, 0.0).astype(o_ref.dtype)


# --------------------------------------------------------------------------
# Host-side glue
# --------------------------------------------------------------------------
def _bn_scale_shift(partial_stats, count, gamma, beta):
    """Fold batch-stat BN into per-channel (scale, shift). partial: [G, 2, C].
    NOTE: var = E[x^2] - E[x]^2 in f32; fine at these sizes (see EPS guard)."""
    s = jnp.sum(partial_stats, axis=0)                       # [2, C]
    mean = s[0] / count
    var = jnp.maximum(s[1] / count - mean * mean, 0.0)       # biased variance
    scale = gamma * jax.lax.rsqrt(var + EPS)
    shift = beta - mean * scale
    return jnp.stack([scale, shift]).astype(jnp.float32)     # [2, C]


def bottleneck_forward_nhwc(x_nhwc, params, *, tile_m=512):
    """Bottleneck forward, NHWC layout (native / no transposes)."""
    N, H, W, Cin = x_nhwc.shape
    P = params["w1"].shape[1]
    if Cin != 4 * P:
        raise ValueError("downsample is None: requires inplanes == 4*planes")

    NHW = N * H * W
    TM = max(16, min(_round_up(tile_m, 16), _round_up(NHW, 16)))
    G = pl.cdiv(NHW, TM)
    NHW_pad = G * TM
    pad = NHW_pad - NHW

    x2d = x_nhwc.reshape(NHW, Cin).astype(jnp.float32)
    x2d_p = jnp.pad(x2d, ((0, pad), (0, 0))) if pad else x2d

    w1 = params["w1"].astype(jnp.bfloat16)                        # [Cin, P]
    w2g = params["w2"].reshape(3, 3 * P, P).astype(jnp.bfloat16)  # [3, 3P, P]
    w3 = params["w3"].astype(jnp.bfloat16)                        # [P, 4P]

    cp = pltpu.CompilerParams(dimension_semantics=("parallel",),
                              vmem_limit_bytes=48 * 1024 * 1024)

    # ---- stage 1: conv1 (1x1) -> y1 (bf16) + partial BN1 stats -----------
    y1, s1 = pl.pallas_call(
        _conv1_kernel,
        grid=(G,),
        in_specs=[pl.BlockSpec((TM, Cin), lambda i: (i, 0)),
                  pl.BlockSpec((Cin, P), lambda i: (0, 0))],
        out_specs=(pl.BlockSpec((TM, P), lambda i: (i, 0)),
                   pl.BlockSpec((1, 2, P), lambda i: (i, 0, 0))),
        out_shape=(jax.ShapeDtypeStruct((NHW_pad, P), jnp.bfloat16),
                   jax.ShapeDtypeStruct((G, 2, P), jnp.float32)),
        compiler_params=cp,
        cost_estimate=pl.CostEstimate(
            flops=2 * NHW_pad * Cin * P, transcendentals=0,
            bytes_accessed=4 * NHW_pad * Cin + 2 * NHW_pad * P + 2 * Cin * P),
    )(x2d_p, w1)
    ab1 = _bn_scale_shift(s1, NHW, params["g1"], params["b1"])

    # ---- stage 2: bn1+relu fused into 3x3 conv -> y2 (bf16) + BN2 stats --
    y1_img = y1[:NHW].reshape(N, H, W, P)
    y2, s2 = pl.pallas_call(
        _conv2_kernel,
        grid=(N,),
        in_specs=[pl.BlockSpec((1, H, W, P), lambda n: (n, 0, 0, 0)),
                  pl.BlockSpec((3, 3 * P, P), lambda n: (0, 0, 0)),
                  pl.BlockSpec((2, P), lambda n: (0, 0))],
        out_specs=(pl.BlockSpec((1, H, W, P), lambda n: (n, 0, 0, 0)),
                   pl.BlockSpec((1, 2, P), lambda n: (n, 0, 0))),
        out_shape=(jax.ShapeDtypeStruct((N, H, W, P), jnp.bfloat16),
                   jax.ShapeDtypeStruct((N, 2, P), jnp.float32)),
        scratch_shapes=[pltpu.VMEM((H + 2, W, 3 * P), jnp.bfloat16)],
        compiler_params=cp,
        cost_estimate=pl.CostEstimate(
            flops=2 * NHW * 9 * P * P, transcendentals=0,
            bytes_accessed=4 * NHW * P + 2 * 9 * P * P),
    )(y1_img, w2g, ab1)
    ab2 = _bn_scale_shift(s2, NHW, params["g2"], params["b2"])

    # ---- stage 3: stats-only pass for BN3 (conv3 stays in VMEM) ----------
    y2f = y2.reshape(NHW, P)
    y2f_p = jnp.pad(y2f, ((0, pad), (0, 0))) if pad else y2f

    def _conv3_stats_kernel(y2_ref, w3_ref, ab2_ref, s3_ref):
        a = jnp.maximum(y2_ref[...].astype(jnp.float32) * ab2_ref[0:1, :]
                        + ab2_ref[1:2, :], 0.0)
        y = jnp.dot(a.astype(jnp.bfloat16), w3_ref[...],
                    preferred_element_type=jnp.float32)       # [TM, 4P]
        if NHW_pad != NHW:
            rows = (jax.lax.broadcasted_iota(jnp.int32, (TM, 1), 0)
                    + pl.program_id(0) * TM)
            y = jnp.where(rows < NHW, y, 0.0)                 # mask pad rows
        stats = jnp.concatenate([jnp.sum(y, axis=0, keepdims=True),
                                 jnp.sum(y * y, axis=0, keepdims=True)],
                                axis=0)
        s3_ref[...] = stats[None]

    s3 = pl.pallas_call(
        _conv3_stats_kernel,
        grid=(G,),
        in_specs=[pl.BlockSpec((TM, P), lambda i: (i, 0)),
                  pl.BlockSpec((P, 4 * P), lambda i: (0, 0)),
                  pl.BlockSpec((2, P), lambda i: (0, 0))],
        out_specs=pl.BlockSpec((1, 2, 4 * P), lambda i: (i, 0, 0)),
        out_shape=jax.ShapeDtypeStruct((G, 2, 4 * P), jnp.float32),
        compiler_params=cp,
        cost_estimate=pl.CostEstimate(
            flops=2 * NHW_pad * P * 4 * P, transcendentals=0,
            bytes_accessed=2 * NHW_pad * P + 2 * P * 4 * P),
    )(y2f_p, w3, ab2)
    ab3 = _bn_scale_shift(s3, NHW, params["g3"], params["b3"])

    # ---- stage 4: conv3 recompute + bn3 + residual add + relu ------------
    out2d = pl.pallas_call(
        _conv3_residual_kernel,
        grid=(G,),
        in_specs=[pl.BlockSpec((TM, P), lambda i: (i, 0)),
                  pl.BlockSpec((TM, Cin), lambda i: (i, 0)),
                  pl.BlockSpec((P, 4 * P), lambda i: (0, 0)),
                  pl.BlockSpec((2, P), lambda i: (0, 0)),
                  pl.BlockSpec((2, 4 * P), lambda i: (0, 0))],
        out_specs=pl.BlockSpec((TM, Cin), lambda i: (i, 0)),
        out_shape=jax.ShapeDtypeStruct((NHW_pad, Cin), x_nhwc.dtype),
        compiler_params=cp,
        cost_estimate=pl.CostEstimate(
            flops=2 * NHW_pad * P * 4 * P, transcendentals=0,
            bytes_accessed=2 * NHW_pad * P + 8 * NHW_pad * Cin),
    )(y2f_p, x2d_p, w3, ab2, ab3)

    return out2d[:NHW].reshape(N, H, W, Cin)


def bottleneck_forward(x_nchw, params):
    """PyTorch-layout (NCHW) entry point.  Prefer bottleneck_forward_nhwc in a
    real pipeline: the two transposes below cost an extra HBM round-trip."""
    x_nhwc = jnp.transpose(x_nchw, (0, 2, 3, 1))
    out = bottleneck_forward_nhwc(x_nhwc, params)
    return jnp.transpose(out, (0, 3, 1, 2))


# --------------------------------------------------------------------------
# Params + pure-JAX reference (PyTorch training-mode semantics)
# --------------------------------------------------------------------------
def init_params(key, inplanes, planes):
    k1, k2, k3 = jax.random.split(key, 3)
    return {
        # conv weights as [C_in, C_out] (conv2 as [tap=ky*3+kx, C_in, C_out])
        "w1": jax.random.normal(k1, (inplanes, planes), jnp.float32) * 0.1,
        "w2": jax.random.normal(k2, (9, planes, planes), jnp.float32) * 0.1,
        "w3": jax.random.normal(k3, (planes, planes * 4), jnp.float32) * 0.1,
        # BatchNorm2d defaults: weight=1, bias=0
        "g1": jnp.ones((planes,), jnp.float32),
        "b1": jnp.zeros((planes,), jnp.float32),
        "g2": jnp.ones((planes,), jnp.float32),
        "b2": jnp.zeros((planes,), jnp.float32),
        "g3": jnp.ones((planes * 4,), jnp.float32),
        "b3": jnp.zeros((planes * 4,), jnp.float32),
    }


def reference_forward(x, p, planes):
    def conv(x, w_oihw, pad):
        return jax.lax.conv_general_dilated(
            x, w_oihw, (1, 1), pad, dimension_numbers=("NCHW", "OIHW", "NCHW"))

    def bn(y, g, b):
        mean = y.mean(axis=(0, 2, 3), keepdims=True)
        var = ((y - mean) ** 2).mean(axis=(0, 2, 3), keepdims=True)
        return ((y - mean) / jnp.sqrt(var + EPS)
                * g.reshape(1, -1, 1, 1) + b.reshape(1, -1, 1, 1))

    w1 = jnp.transpose(p["w1"], (1, 0))[:, :, None, None]
    w2 = jnp.transpose(p["w2"].reshape(3, 3, planes, planes), (3, 2, 0, 1))
    w3 = jnp.transpose(p["w3"], (1, 0))[:, :, None, None]

    out = jax.nn.relu(bn(conv(x, w1, ((0, 0), (0, 0))), p["g1"], p["b1"]))
    out = jax.nn.relu(bn(conv(out, w2, ((1, 1), (1, 1))), p["g2"], p["b2"]))
    out = bn(conv(out, w3, ((0, 0), (0, 0))), p["g3"], p["b3"])
    return jax.nn.relu(out + x)


if __name__ == "__main__":
    planes = 4
    inplanes = planes * 4          # residual add requires Cin == 4*planes
    N, H, W = 2, 16, 16

    key = jax.random.PRNGKey(0)
    kx, kp = jax.random.split(key)
    x = jax.random.normal(kx, (N, inplanes, H, W), jnp.float32)
    params = init_params(kp, inplanes, planes)

    fwd = jax.jit(bottleneck_forward)
    out = jax.block_until_ready(fwd(x, params))
    assert out.shape == (N, inplanes, H, W)

    ref = reference_forward(x, params, planes)
    max_err = float(jnp.max(jnp.abs(out - ref)))
    # bf16 MXU operands + bf16 inter-stage activations with f32 accumulation
    # over 3 stages => a few 1e-2 of accuracy is expected.
    assert jnp.allclose(out, ref, atol=5e-2, rtol=5e-2), max_err

    print("KERNEL_OK")
</pallas_src>

<mosaic_0001>
module attributes {stable_mosaic.version = 11 : i64} {
  func.func @_conv1_kernel(%arg0: i32, %arg1: memref<512x16xf32, #tpu.memory_space<vmem>>, %arg2: memref<16x4xbf16, #tpu.memory_space<vmem>>, %arg3: memref<512x4xbf16, #tpu.memory_space<vmem>>, %arg4: memref<1x2x4xf32, #tpu.memory_space<vmem>>) attributes {dimension_semantics = [#tpu.dimension_semantics<parallel>], iteration_bounds = array<i64: 1>, scalar_prefetch = 0 : i64, scratch_operands = 0 : i64, tpu.core_type = #tpu.core_type<tc>, window_params = [{transform_indices = @transform_0, window_bounds = array<i64: 512, 16>}, {pipeline_mode = #tpu.pipeline_mode<synchronous>, transform_indices = @transform_1, window_bounds = array<i64: 16, 4>}, {transform_indices = @transform_2, window_bounds = array<i64: 512, 4>}, {transform_indices = @transform_3, window_bounds = array<i64: 1, 2, 4>}]} {
    %c0 = arith.constant 0 : index
    %c0_0 = arith.constant 0 : index
    %0 = vector.load %arg1[%c0, %c0_0] : memref<512x16xf32, #tpu.memory_space<vmem>>, vector<512x16xf32>
    %1 = arith.truncf %0 : vector<512x16xf32> to vector<512x16xbf16>
    %c0_1 = arith.constant 0 : index
    %c0_2 = arith.constant 0 : index
    %2 = vector.load %arg2[%c0_1, %c0_2] : memref<16x4xbf16, #tpu.memory_space<vmem>>, vector<16x4xbf16>
    %cst = arith.constant dense<0.000000e+00> : vector<512x4xf32>
    %3 = tpu.matmul %1, %2, %cst {dimension_numbers = #tpu.dot_dimension_numbers<[1], [0], [0], [1], [0, 0, 1, 1], [], []>} : vector<512x16xbf16>, vector<16x4xbf16>, vector<512x4xf32> -> vector<512x4xf32>
    %4 = arith.truncf %3 : vector<512x4xf32> to vector<512x4xbf16>
    %c0_3 = arith.constant 0 : index
    %c0_4 = arith.constant 0 : index
    %5 = vector.load %arg3[%c0_3, %c0_4] : memref<512x4xbf16, #tpu.memory_space<vmem>>, vector<512x4xbf16>
    tpu.vector_store %arg3[%c0_3, %c0_4], %4 {strides = array<i32>} : memref<512x4xbf16, #tpu.memory_space<vmem>>, vector<512x4xbf16>,
    %6 = arith.extf %4 : vector<512x4xbf16> to vector<512x4xf32>
    %cst_5 = arith.constant dense<0.000000e+00> : vector<4xf32>
    %7 = vector.multi_reduction <add>, %6, %cst_5 [0] : vector<512x4xf32> to vector<4xf32>
    %8 = vector.shape_cast %7 : vector<4xf32> to vector<1x4xf32>
    %9 = arith.mulf %6, %6 : vector<512x4xf32>
    %cst_6 = arith.constant dense<0.000000e+00> : vector<4xf32>
    %10 = vector.multi_reduction <add>, %9, %cst_6 [0] : vector<512x4xf32> to vector<4xf32>
    %11 = vector.shape_cast %10 : vector<4xf32> to vector<1x4xf32>
    %12 = tpu.concatenate %8, %11 in 0 : vector<1x4xf32>, vector<1x4xf32> -> vector<2x4xf32>
    %13 = vector.shape_cast %12 : vector<2x4xf32> to vector<1x2x4xf32>
    %c0_7 = arith.constant 0 : index
    %c0_8 = arith.constant 0 : index
    %c0_9 = arith.constant 0 : index
    %14 = vector.load %arg4[%c0_7, %c0_8, %c0_9] : memref<1x2x4xf32, #tpu.memory_space<vmem>>, vector<1x2x4xf32>
    tpu.vector_store %arg4[%c0_7, %c0_8, %c0_9], %13 {strides = array<i32>} : memref<1x2x4xf32, #tpu.memory_space<vmem>>, vector<1x2x4xf32>,
    return
  }
  func.func @transform_0(%arg0: i32) -> (i32, i32) {
    %c0_i32 = arith.constant 0 : i32
    %c0_i32_0 = arith.constant 0 : i32
    return %arg0, %c0_i32 : i32, i32
  }
  func.func @transform_1(%arg0: i32) -> (i32, i32) {
    %c0_i32 = arith.constant 0 : i32
    %c0_i32_0 = arith.constant 0 : i32
    %c0_i32_1 = arith.constant 0 : i32
    return %c0_i32, %c0_i32_0 : i32, i32
  }
  func.func @transform_2(%arg0: i32) -> (i32, i32) {
    %c0_i32 = arith.constant 0 : i32
    %c0_i32_0 = arith.constant 0 : i32
    return %arg0, %c0_i32 : i32, i32
  }
  func.func @transform_3(%arg0: i32) -> (i32, i32, i32) {
    %c0_i32 = arith.constant 0 : i32
    %c0_i32_0 = arith.constant 0 : i32
    %c0_i32_1 = arith.constant 0 : i32
    return %arg0, %c0_i32, %c0_i32_0 : i32, i32, i32
  }
}

module attributes {stable_mosaic.version = 11 : i64} {
  func.func @_conv2_kernel(%arg0: i32, %arg1: memref<1x16x16x4xbf16, #tpu.memory_space<vmem>>, %arg2: memref<3x12x4xbf16, #tpu.memory_space<vmem>>, %arg3: memref<2x4xf32, #tpu.memory_space<vmem>>, %arg4: memref<1x16x16x4xbf16, #tpu.memory_space<vmem>>, %arg5: memref<1x2x4xf32, #tpu.memory_space<vmem>>, %arg6: memref<18x16x12xbf16, #tpu.memory_space<vmem>>) attributes {dimension_semantics = [#tpu.dimension_semantics<parallel>], iteration_bounds = array<i64: 2>, scalar_prefetch = 0 : i64, scratch_operands = 1 : i64, tpu.core_type = #tpu.core_type<tc>, window_params = [{transform_indices = @transform_0, window_bounds = array<i64: 1, 16, 16, 4>}, {pipeline_mode = #tpu.pipeline_mode<synchronous>, transform_indices = @transform_1, window_bounds = array<i64: 3, 12, 4>}, {pipeline_mode = #tpu.pipeline_mode<synchronous>, transform_indices = @transform_2, window_bounds = array<i64: 2, 4>}, {transform_indices = @transform_3, window_bounds = array<i64: 1, 16, 16, 4>}, {transform_indices = @transform_4, window_bounds = array<i64: 1, 2, 4>}]} {
    %c0 = arith.constant 0 : index
    %c0_0 = arith.constant 0 : index
    %0 = vector.load %arg3[%c0, %c0_0] : memref<2x4xf32, #tpu.memory_space<vmem>>, vector<1x4xf32>
    %1 = vector.shape_cast %0 : vector<1x4xf32> to vector<1x1x4xf32>
    %c1 = arith.constant 1 : index
    %c0_1 = arith.constant 0 : index
    %2 = vector.load %arg3[%c1, %c0_1] : memref<2x4xf32, #tpu.memory_space<vmem>>, vector<1x4xf32>
    %3 = vector.shape_cast %2 : vector<1x4xf32> to vector<1x1x4xf32>
    %c0_2 = arith.constant 0 : index
    %c0_3 = arith.constant 0 : index
    %c0_4 = arith.constant 0 : index
    %c0_5 = arith.constant 0 : index
    %4 = vector.load %arg1[%c0_2, %c0_3, %c0_4, %c0_5] : memref<1x16x16x4xbf16, #tpu.memory_space<vmem>>, vector<1x16x16x4xbf16>
    %5 = vector.shape_cast %4 : vector<1x16x16x4xbf16> to vector<16x16x4xbf16>
    %6 = arith.extf %5 : vector<16x16x4xbf16> to vector<16x16x4xf32>
    %7 = vector.broadcast %1 : vector<1x1x4xf32> to vector<16x16x4xf32>
    %8 = arith.mulf %6, %7 : vector<16x16x4xf32>
    %9 = vector.broadcast %3 : vector<1x1x4xf32> to vector<16x16x4xf32>
    %10 = arith.addf %8, %9 : vector<16x16x4xf32>
    %cst = arith.constant 0.000000e+00 : f32
    %11 = vector.broadcast %cst : f32 to vector<16x16x4xf32>
    %12 = arith.maximumf %10, %11 : vector<16x16x4xf32>
    %13 = arith.truncf %12 : vector<16x16x4xf32> to vector<16x16x4xbf16>
    %cst_6 = arith.constant 0.000000e+00 : bf16
    %14 = vector.broadcast %cst_6 : bf16 to vector<16x1x4xbf16>
    %15 = vector.extract_strided_slice %13 {offsets = [0, 0, 0], sizes = [16, 15, 4], strides = [1, 1, 1]} : vector<16x16x4xbf16> to vector<16x15x4xbf16>
    %16 = tpu.concatenate %14, %15 in 1 : vector<16x1x4xbf16>, vector<16x15x4xbf16> -> vector<16x16x4xbf16>
    %17 = vector.extract_strided_slice %13 {offsets = [0, 1, 0], sizes = [16, 15, 4], strides = [1, 1, 1]} : vector<16x16x4xbf16> to vector<16x15x4xbf16>
    %18 = tpu.concatenate %17, %14 in 1 : vector<16x15x4xbf16>, vector<16x1x4xbf16> -> vector<16x16x4xbf16>
    %19 = tpu.concatenate %16, %13, %18 in 2 : vector<16x16x4xbf16>, vector<16x16x4xbf16>, vector<16x16x4xbf16> -> vector<16x16x12xbf16>
    %cst_7 = arith.constant 0.000000e+00 : bf16
    %20 = vector.broadcast %cst_7 : bf16 to vector<1x16x12xbf16>
    %c0_8 = arith.constant 0 : index
    %c0_9 = arith.constant 0 : index
    %c0_10 = arith.constant 0 : index
    %21 = vector.load %arg6[%c0_8, %c0_9, %c0_10] : memref<18x16x12xbf16, #tpu.memory_space<vmem>>, vector<1x16x12xbf16>
    tpu.vector_store %arg6[%c0_8, %c0_9, %c0_10], %20 {strides = array<i32>} : memref<18x16x12xbf16, #tpu.memory_space<vmem>>, vector<1x16x12xbf16>,
    %cst_11 = arith.constant 0.000000e+00 : bf16
    %22 = vector.broadcast %cst_11 : bf16 to vector<1x16x12xbf16>
    %c17 = arith.constant 17 : index
    %c0_12 = arith.constant 0 : index
    %c0_13 = arith.constant 0 : index
    %23 = vector.load %arg6[%c17, %c0_12, %c0_13] : memref<18x16x12xbf16, #tpu.memory_space<vmem>>, vector<1x16x12xbf16>
    tpu.vector_store %arg6[%c17, %c0_12, %c0_13], %22 {strides = array<i32>} : memref<18x16x12xbf16, #tpu.memory_space<vmem>>, vector<1x16x12xbf16>,
    %c1_14 = arith.constant 1 : index
    %c0_15 = arith.constant 0 : index
    %c0_16 = arith.constant 0 : index
    %24 = vector.load %arg6[%c1_14, %c0_15, %c0_16] : memref<18x16x12xbf16, #tpu.memory_space<vmem>>, vector<16x16x12xbf16>
    tpu.vector_store %arg6[%c1_14, %c0_15, %c0_16], %19 {strides = array<i32>} : memref<18x16x12xbf16, #tpu.memory_space<vmem>>, vector<16x16x12xbf16>,
    %c0_17 = arith.constant 0 : index
    %c0_18 = arith.constant 0 : index
    %c0_19 = arith.constant 0 : index
    %25 = vector.load %arg6[%c0_17, %c0_18, %c0_19] : memref<18x16x12xbf16, #tpu.memory_space<vmem>>, vector<16x16x12xbf16>
    %26 = vector.shape_cast %25 : vector<16x16x12xbf16> to vector<256x12xbf16>
    %c0_20 = arith.constant 0 : index
    %c0_21 = arith.constant 0 : index
    %c0_22 = arith.constant 0 : index
    %27 = vector.load %arg2[%c0_20, %c0_21, %c0_22] : memref<3x12x4xbf16, #tpu.memory_space<vmem>>, vector<1x12x4xbf16>
    %28 = vector.shape_cast %27 : vector<1x12x4xbf16> to vector<12x4xbf16>
    %cst_23 = arith.constant dense<0.000000e+00> : vector<256x4xf32>
    %29 = tpu.matmul %26, %28, %cst_23 {dimension_numbers = #tpu.dot_dimension_numbers<[1], [0], [0], [1], [0, 0, 1, 1], [], []>} : vector<256x12xbf16>, vector<12x4xbf16>, vector<256x4xf32> -> vector<256x4xf32>
    %c1_24 = arith.constant 1 : index
    %c0_25 = arith.constant 0 : index
    %c0_26 = arith.constant 0 : index
    %30 = vector.load %arg6[%c1_24, %c0_25, %c0_26] : memref<18x16x12xbf16, #tpu.memory_space<vmem>>, vector<16x16x12xbf16>
    %31 = vector.shape_cast %30 : vector<16x16x12xbf16> to vector<256x12xbf16>
    %c1_27 = arith.constant 1 : index
    %c0_28 = arith.constant 0 : index
    %c0_29 = arith.constant 0 : index
    %32 = vector.load %arg2[%c1_27, %c0_28, %c0_29] : memref<3x12x4xbf16, #tpu.memory_space<vmem>>, vector<1x12x4xbf16>
    %33 = vector.shape_cast %32 : vector<1x12x4xbf16> to vector<12x4xbf16>
    %cst_30 = arith.constant dense<0.000000e+00> : vector<256x4xf32>
    %34 = tpu.matmul %31, %33, %cst_30 {dimension_numbers = #tpu.dot_dimension_numbers<[1], [0], [0], [1], [0, 0, 1, 1], [], []>} : vector<256x12xbf16>, vector<12x4xbf16>, vector<256x4xf32> -> vector<256x4xf32>
    %35 = arith.addf %29, %34 : vector<256x4xf32>
    %c2 = arith.constant 2 : index
    %c0_31 = arith.constant 0 : index
    %c0_32 = arith.constant 0 : index
    %36 = vector.load %arg6[%c2, %c0_31, %c0_32] : memref<18x16x12xbf16, #tpu.memory_space<vmem>>, vector<16x16x12xbf16>
    %37 = vector.shape_cast %36 : vector<16x16x12xbf16> to vector<256x12xbf16>
    %c2_33 = arith.constant 2 : index
    %c0_34 = arith.constant 0 : index
    %c0_35 = arith.constant 0 : index
    %38 = vector.load %arg2[%c2_33, %c0_34, %c0_35] : memref<3x12x4xbf16, #tpu.memory_space<vmem>>, vector<1x12x4xbf16>
    %39 = vector.shape_cast %38 : vector<1x12x4xbf16> to vector<12x4xbf16>
    %cst_36 = arith.constant dense<0.000000e+00> : vector<256x4xf32>
    %40 = tpu.matmul %37, %39, %cst_36 {dimension_numbers = #tpu.dot_dimension_numbers<[1], [0], [0], [1], [0, 0, 1, 1], [], []>} : vector<256x12xbf16>, vector<12x4xbf16>, vector<256x4xf32> -> vector<256x4xf32>
    %41 = arith.addf %35, %40 : vector<256x4xf32>
    %42 = arith.truncf %41 : vector<256x4xf32> to vector<256x4xbf16>
    %43 = vector.shape_cast %42 : vector<256x4xbf16> to vector<1x16x16x4xbf16>
    %c0_37 = arith.constant 0 : index
    %c0_38 = arith.constant 0 : index
    %c0_39 = arith.constant 0 : index
    %c0_40 = arith.constant 0 : index
    %44 = vector.load %arg4[%c0_37, %c0_38, %c0_39, %c0_40] : memref<1x16x16x4xbf16, #tpu.memory_space<vmem>>, vector<1x16x16x4xbf16>
    tpu.vector_store %arg4[%c0_37, %c0_38, %c0_39, %c0_40], %43 {strides = array<i32>} : memref<1x16x16x4xbf16, #tpu.memory_space<vmem>>, vector<1x16x16x4xbf16>,
    %45 = arith.extf %42 : vector<256x4xbf16> to vector<256x4xf32>
    %cst_41 = arith.constant dense<0.000000e+00> : vector<4xf32>
    %46 = vector.multi_reduction <add>, %45, %cst_41 [0] : vector<256x4xf32> to vector<4xf32>
    %47 = vector.shape_cast %46 : vector<4xf32> to vector<1x4xf32>
    %48 = arith.mulf %45, %45 : vector<256x4xf32>
    %cst_42 = arith.constant dense<0.000000e+00> : vector<4xf32>
    %49 = vector.multi_reduction <add>, %48, %cst_42 [0] : vector<256x4xf32> to vector<4xf32>
    %50 = vector.shape_cast %49 : vector<4xf32> to vector<1x4xf32>
    %51 = tpu.concatenate %47, %50 in 0 : vector<1x4xf32>, vector<1x4xf32> -> vector<2x4xf32>
    %52 = vector.shape_cast %51 : vector<2x4xf32> to vector<1x2x4xf32>
    %c0_43 = arith.constant 0 : index
    %c0_44 = arith.constant 0 : index
    %c0_45 = arith.constant 0 : index
    %53 = vector.load %arg5[%c0_43, %c0_44, %c0_45] : memref<1x2x4xf32, #tpu.memory_space<vmem>>, vector<1x2x4xf32>
    tpu.vector_store %arg5[%c0_43, %c0_44, %c0_45], %52 {strides = array<i32>} : memref<1x2x4xf32, #tpu.memory_space<vmem>>, vector<1x2x4xf32>,
    return
  }
  func.func @transform_0(%arg0: i32) -> (i32, i32, i32, i32) {
    %c0_i32 = arith.constant 0 : i32
    %c0_i32_0 = arith.constant 0 : i32
    %c0_i32_1 = arith.constant 0 : i32
    %c0_i32_2 = arith.constant 0 : i32
    return %arg0, %c0_i32, %c0_i32_0, %c0_i32_1 : i32, i32, i32, i32
  }
  func.func @transform_1(%arg0: i32) -> (i32, i32, i32) {
    %c0_i32 = arith.constant 0 : i32
    %c0_i32_0 = arith.constant 0 : i32
    %c0_i32_1 = arith.constant 0 : i32
    %c0_i32_2 = arith.constant 0 : i32
    return %c0_i32, %c0_i32_0, %c0_i32_1 : i32, i32, i32
  }
  func.func @transform_2(%arg0: i32) -> (i32, i32) {
    %c0_i32 = arith.constant 0 : i32
    %c0_i32_0 = arith.constant 0 : i32
    %c0_i32_1 = arith.constant 0 : i32
    return %c0_i32, %c0_i32_0 : i32, i32
  }
  func.func @transform_3(%arg0: i32) -> (i32, i32, i32, i32) {
    %c0_i32 = arith.constant 0 : i32
    %c0_i32_0 = arith.constant 0 : i32
    %c0_i32_1 = arith.constant 0 : i32
    %c0_i32_2 = arith.constant 0 : i32
    return %arg0, %c0_i32, %c0_i32_0, %c0_i32_1 : i32, i32, i32, i32
  }
  func.func @transform_4(%arg0: i32) -> (i32, i32, i32) {
    %c0_i32 = arith.constant 0 : i32
    %c0_i32_0 = arith.constant 0 : i32
    %c0_i32_1 = arith.constant 0 : i32
    return %arg0, %c0_i32, %c0_i32_0 : i32, i32, i32
  }
}

module attributes {stable_mosaic.version = 11 : i64} {
  func.func @_conv3_stats_kernel(%arg0: i32, %arg1: memref<512x4xbf16, #tpu.memory_space<vmem>>, %arg2: memref<4x16xbf16, #tpu.memory_space<vmem>>, %arg3: memref<2x4xf32, #tpu.memory_space<vmem>>, %arg4: memref<1x2x16xf32, #tpu.memory_space<vmem>>) attributes {dimension_semantics = [#tpu.dimension_semantics<parallel>], iteration_bounds = array<i64: 1>, scalar_prefetch = 0 : i64, scratch_operands = 0 : i64, tpu.core_type = #tpu.core_type<tc>, window_params = [{transform_indices = @transform_0, window_bounds = array<i64: 512, 4>}, {pipeline_mode = #tpu.pipeline_mode<synchronous>, transform_indices = @transform_1, window_bounds = array<i64: 4, 16>}, {pipeline_mode = #tpu.pipeline_mode<synchronous>, transform_indices = @transform_2, window_bounds = array<i64: 2, 4>}, {transform_indices = @transform_3, window_bounds = array<i64: 1, 2, 16>}]} {
    %c0 = arith.constant 0 : index
    %c0_0 = arith.constant 0 : index
    %0 = vector.load %arg1[%c0, %c0_0] : memref<512x4xbf16, #tpu.memory_space<vmem>>, vector<512x4xbf16>
    %1 = arith.extf %0 : vector<512x4xbf16> to vector<512x4xf32>
    %c0_1 = arith.constant 0 : index
    %c0_2 = arith.constant 0 : index
    %2 = vector.load %arg3[%c0_1, %c0_2] : memref<2x4xf32, #tpu.memory_space<vmem>>, vector<1x4xf32>
    %3 = vector.broadcast %2 : vector<1x4xf32> to vector<512x4xf32>
    %4 = arith.mulf %1, %3 : vector<512x4xf32>
    %c1 = arith.constant 1 : index
    %c0_3 = arith.constant 0 : index
    %5 = vector.load %arg3[%c1, %c0_3] : memref<2x4xf32, #tpu.memory_space<vmem>>, vector<1x4xf32>
    %6 = vector.broadcast %5 : vector<1x4xf32> to vector<512x4xf32>
    %7 = arith.addf %4, %6 : vector<512x4xf32>
    %cst = arith.constant 0.000000e+00 : f32
    %8 = vector.broadcast %cst : f32 to vector<512x4xf32>
    %9 = arith.maximumf %7, %8 : vector<512x4xf32>
    %10 = arith.truncf %9 : vector<512x4xf32> to vector<512x4xbf16>
    %c0_4 = arith.constant 0 : index
    %c0_5 = arith.constant 0 : index
    %11 = vector.load %arg2[%c0_4, %c0_5] : memref<4x16xbf16, #tpu.memory_space<vmem>>, vector<4x16xbf16>
    %cst_6 = arith.constant dense<0.000000e+00> : vector<512x16xf32>
    %12 = tpu.matmul %10, %11, %cst_6 {dimension_numbers = #tpu.dot_dimension_numbers<[1], [0], [0], [1], [0, 0, 1, 1], [], []>} : vector<512x4xbf16>, vector<4x16xbf16>, vector<512x16xf32> -> vector<512x16xf32>
    %cst_7 = arith.constant dense<0.000000e+00> : vector<16xf32>
    %13 = vector.multi_reduction <add>, %12, %cst_7 [0] : vector<512x16xf32> to vector<16xf32>
    %14 = vector.shape_cast %13 : vector<16xf32> to vector<1x16xf32>
    %15 = arith.mulf %12, %12 : vector<512x16xf32>
    %cst_8 = arith.constant dense<0.000000e+00> : vector<16xf32>
    %16 = vector.multi_reduction <add>, %15, %cst_8 [0] : vector<512x16xf32> to vector<16xf32>
    %17 = vector.shape_cast %16 : vector<16xf32> to vector<1x16xf32>
    %18 = tpu.concatenate %14, %17 in 0 : vector<1x16xf32>, vector<1x16xf32> -> vector<2x16xf32>
    %19 = vector.shape_cast %18 : vector<2x16xf32> to vector<1x2x16xf32>
    %c0_9 = arith.constant 0 : index
    %c0_10 = arith.constant 0 : index
    %c0_11 = arith.constant 0 : index
    %20 = vector.load %arg4[%c0_9, %c0_10, %c0_11] : memref<1x2x16xf32, #tpu.memory_space<vmem>>, vector<1x2x16xf32>
    tpu.vector_store %arg4[%c0_9, %c0_10, %c0_11], %19 {strides = array<i32>} : memref<1x2x16xf32, #tpu.memory_space<vmem>>, vector<1x2x16xf32>,
    return
  }
  func.func @transform_0(%arg0: i32) -> (i32, i32) {
    %c0_i32 = arith.constant 0 : i32
    %c0_i32_0 = arith.constant 0 : i32
    return %arg0, %c0_i32 : i32, i32
  }
  func.func @transform_1(%arg0: i32) -> (i32, i32) {
    %c0_i32 = arith.constant 0 : i32
    %c0_i32_0 = arith.constant 0 : i32
    %c0_i32_1 = arith.constant 0 : i32
    return %c0_i32, %c0_i32_0 : i32, i32
  }
  func.func @transform_2(%arg0: i32) -> (i32, i32) {
    %c0_i32 = arith.constant 0 : i32
    %c0_i32_0 = arith.constant 0 : i32
    %c0_i32_1 = arith.constant 0 : i32
    return %c0_i32, %c0_i32_0 : i32, i32
  }
  func.func @transform_3(%arg0: i32) -> (i32, i32, i32) {
    %c0_i32 = arith.constant 0 : i32
    %c0_i32_0 = arith.constant 0 : i32
    %c0_i32_1 = arith.constant 0 : i32
    return %arg0, %c0_i32, %c0_i32_0 : i32, i32, i32
  }
}

module attributes {stable_mosaic.version = 11 : i64} {
  func.func @_conv3_residual_kernel(%arg0: i32, %arg1: memref<512x4xbf16, #tpu.memory_space<vmem>>, %arg2: memref<512x16xf32, #tpu.memory_space<vmem>>, %arg3: memref<4x16xbf16, #tpu.memory_space<vmem>>, %arg4: memref<2x4xf32, #tpu.memory_space<vmem>>, %arg5: memref<2x16xf32, #tpu.memory_space<vmem>>, %arg6: memref<512x16xf32, #tpu.memory_space<vmem>>) attributes {dimension_semantics = [#tpu.dimension_semantics<parallel>], iteration_bounds = array<i64: 1>, scalar_prefetch = 0 : i64, scratch_operands = 0 : i64, tpu.core_type = #tpu.core_type<tc>, window_params = [{transform_indices = @transform_0, window_bounds = array<i64: 512, 4>}, {transform_indices = @transform_1, window_bounds = array<i64: 512, 16>}, {pipeline_mode = #tpu.pipeline_mode<synchronous>, transform_indices = @transform_2, window_bounds = array<i64: 4, 16>}, {pipeline_mode = #tpu.pipeline_mode<synchronous>, transform_indices = @transform_3, window_bounds = array<i64: 2, 4>}, {pipeline_mode = #tpu.pipeline_mode<synchronous>, transform_indices = @transform_4, window_bounds = array<i64: 2, 16>}, {transform_indices = @transform_5, window_bounds = array<i64: 512, 16>}]} {
    %c0 = arith.constant 0 : index
    %c0_0 = arith.constant 0 : index
    %0 = vector.load %arg1[%c0, %c0_0] : memref<512x4xbf16, #tpu.memory_space<vmem>>, vector<512x4xbf16>
    %1 = arith.extf %0 : vector<512x4xbf16> to vector<512x4xf32>
    %c0_1 = arith.constant 0 : index
    %c0_2 = arith.constant 0 : index
    %2 = vector.load %arg4[%c0_1, %c0_2] : memref<2x4xf32, #tpu.memory_space<vmem>>, vector<1x4xf32>
    %3 = vector.broadcast %2 : vector<1x4xf32> to vector<512x4xf32>
    %4 = arith.mulf %1, %3 : vector<512x4xf32>
    %c1 = arith.constant 1 : index
    %c0_3 = arith.constant 0 : index
    %5 = vector.load %arg4[%c1, %c0_3] : memref<2x4xf32, #tpu.memory_space<vmem>>, vector<1x4xf32>
    %6 = vector.broadcast %5 : vector<1x4xf32> to vector<512x4xf32>
    %7 = arith.addf %4, %6 : vector<512x4xf32>
    %cst = arith.constant 0.000000e+00 : f32
    %8 = vector.broadcast %cst : f32 to vector<512x4xf32>
    %9 = arith.maximumf %7, %8 : vector<512x4xf32>
    %10 = arith.truncf %9 : vector<512x4xf32> to vector<512x4xbf16>
    %c0_4 = arith.constant 0 : index
    %c0_5 = arith.constant 0 : index
    %11 = vector.load %arg3[%c0_4, %c0_5] : memref<4x16xbf16, #tpu.memory_space<vmem>>, vector<4x16xbf16>
    %cst_6 = arith.constant dense<0.000000e+00> : vector<512x16xf32>
    %12 = tpu.matmul %10, %11, %cst_6 {dimension_numbers = #tpu.dot_dimension_numbers<[1], [0], [0], [1], [0, 0, 1, 1], [], []>} : vector<512x4xbf16>, vector<4x16xbf16>, vector<512x16xf32> -> vector<512x16xf32>
    %c0_7 = arith.constant 0 : index
    %c0_8 = arith.constant 0 : index
    %13 = vector.load %arg5[%c0_7, %c0_8] : memref<2x16xf32, #tpu.memory_space<vmem>>, vector<1x16xf32>
    %14 = vector.broadcast %13 : vector<1x16xf32> to vector<512x16xf32>
    %15 = arith.mulf %12, %14 : vector<512x16xf32>
    %c1_9 = arith.constant 1 : index
    %c0_10 = arith.constant 0 : index
    %16 = vector.load %arg5[%c1_9, %c0_10] : memref<2x16xf32, #tpu.memory_space<vmem>>, vector<1x16xf32>
    %17 = vector.broadcast %16 : vector<1x16xf32> to vector<512x16xf32>
    %18 = arith.addf %15, %17 : vector<512x16xf32>
    %c0_11 = arith.constant 0 : index
    %c0_12 = arith.constant 0 : index
    %19 = vector.load %arg2[%c0_11, %c0_12] : memref<512x16xf32, #tpu.memory_space<vmem>>, vector<512x16xf32>
    %20 = arith.addf %18, %19 : vector<512x16xf32>
    %cst_13 = arith.constant 0.000000e+00 : f32
    %21 = vector.broadcast %cst_13 : f32 to vector<512x16xf32>
    %22 = arith.maximumf %20, %21 : vector<512x16xf32>
    %c0_14 = arith.constant 0 : index
    %c0_15 = arith.constant 0 : index
    %23 = vector.load %arg6[%c0_14, %c0_15] : memref<512x16xf32, #tpu.memory_space<vmem>>, vector<512x16xf32>
    tpu.vector_store %arg6[%c0_14, %c0_15], %22 {strides = array<i32>} : memref<512x16xf32, #tpu.memory_space<vmem>>, vector<512x16xf32>,
    return
  }
  func.func @transform_0(%arg0: i32) -> (i32, i32) {
    %c0_i32 = arith.constant 0 : i32
    %c0_i32_0 = arith.constant 0 : i32
    return %arg0, %c0_i32 : i32, i32
  }
  func.func @transform_1(%arg0: i32) -> (i32, i32) {
    %c0_i32 = arith.constant 0 : i32
    %c0_i32_0 = arith.constant 0 : i32
    return %arg0, %c0_i32 : i32, i32
  }
  func.func @transform_2(%arg0: i32) -> (i32, i32) {
    %c0_i32 = arith.constant 0 : i32
    %c0_i32_0 = arith.constant 0 : i32
    %c0_i32_1 = arith.constant 0 : i32
    return %c0_i32, %c0_i32_0 : i32, i32
  }
  func.func @transform_3(%arg0: i32) -> (i32, i32) {
    %c0_i32 = arith.constant 0 : i32
    %c0_i32_0 = arith.constant 0 : i32
    %c0_i32_1 = arith.constant 0 : i32
    return %c0_i32, %c0_i32_0 : i32, i32
  }
  func.func @transform_4(%arg0: i32) -> (i32, i32) {
    %c0_i32 = arith.constant 0 : i32
    %c0_i32_0 = arith.constant 0 : i32
    %c0_i32_1 = arith.constant 0 : i32
    return %c0_i32, %c0_i32_0 : i32, i32
  }
  func.func @transform_5(%arg0: i32) -> (i32, i32) {
    %c0_i32 = arith.constant 0 : i32
    %c0_i32_0 = arith.constant 0 : i32
    return %arg0, %c0_i32 : i32, i32
  }
}

</mosaic_0001>

<bundles_post_ra>
// kernel: bottleneck_forward.4
= control target key start
LH: loop header
LB: loop body
LE: loop exit
PB: predicated region body
PF: predicated region fallthrough
CT: control target
= control target key end

     0   :  { %vm118_vm0 = vcmask 130048   ;;  %vm448_vm1 = vcmask 27648   ;;  %vm577_vm2 = vcmask 31744   ;;  %vm908_vm3 = vcmask 1040384   ;;  %s1808_s1 = inlined_call_operand.vmem [shape: bf16[16,4], index: 1, kind: input, shape index: {}]   ;;  %s1809_s0 = inlined_call_operand.vmem [shape: f32[512,16], index: 0, kind: input, shape index: {}]   ;;  %s1810_s2 = inlined_call_operand.vmem [shape: bf16[512,4], index: 2, kind: output, shape index: {0}]   ;;  %s1811_s3 = inlined_call_operand.vmem [shape: f32[1,2,4], index: 3, kind: output, shape index: {1}]  }
   0x1   :  { %v956_v0 = vld [vmem:[%s1808_s1] sm:$0xff]  ;;  %v15_v2 = vld [vmem:[%s1809_s0 + $0x8] sm:$0xff]  ;;  %v16_v7 = vld [vmem:[%s1809_s0 + $0x10] sm:$0xff]  ;;  %vm910_vm4 = vcmask 25600  }
   0x2   :  { %v14_v1 = vld [vmem:[%s1809_s0] sm:$0xff]  ;;  %222 = vmatpush.bf16.msra.mxu0 %v956_v0  ;;  %957 = vmatpush.bf16.msra.mxu1 %v956_v0  ;;  %v31_v5 = vld [vmem:[%s1809_s0 + $0x88] sm:$0xff]  ;;  %v17_v8 = vld [vmem:[%s1809_s0 + $0x18] sm:$0xff] }
   0x3   :  { %v78_v3 = vpack.c.bf16 %v15_v2, %v14_v1  ;;  %v30_v4 = vld [vmem:[%s1809_s0 + $0x80] sm:$0xff]  ;;  %958 = vmatpush.bf16.msra.mxu2 %v956_v0  ;;  %959 = vmatpush.bf16.msra.mxu3 %v956_v0  ;;  %v32_v9 = vld [vmem:[%s1809_s0 + $0x90] sm:$0xff]  ;;  %v33_v10 = vld [vmem:[%s1809_s0 + $0x98] sm:$0xff]  ;;  %v79_v11 = vpack.c.bf16 %v17_v8, %v16_v7 }
   0x4   :  { %v86_v6 = vpack.c.bf16 %v31_v5, %v30_v4  ;;  %v87_v12 = vpack.c.bf16 %v33_v10, %v32_v9  ;;  %v46_v13 = vld [vmem:[%s1809_s0 + $0x100] sm:$0xff]  ;;  %v47_v14 = vld [vmem:[%s1809_s0 + $0x108] sm:$0xff]  ;;  %v48_v22 = vld [vmem:[%s1809_s0 + $0x110] sm:$0xff] }
   0x5   :  { %924 = vmatmul.msk.bf16.vlgmr.msra.gmra.mxu0 %vm118_vm0, %v78_v3  ;;  %v94_v15 = vpack.c.bf16 %v47_v14, %v46_v13  ;;  %v18_v16 = vld [vmem:[%s1809_s0 + $0x20] sm:$0xff]  ;;  %v19_v17 = vld [vmem:[%s1809_s0 + $0x28] sm:$0xff]  ;;  %v49_v23 = vld [vmem:[%s1809_s0 + $0x118] sm:$0xff] }
   0x6   :  { %932 = vmatmul.msk.bf16.vlgmr.msra.gmra.mxu1 %vm118_vm0, %v86_v6  ;;  %v34_v18 = vld [vmem:[%s1809_s0 + $0xa0] sm:$0xff]  ;;  %v35_v19 = vld [vmem:[%s1809_s0 + $0xa8] sm:$0xff]  ;;  %v80_v20 = vpack.c.bf16 %v19_v17, %v18_v16  ;;  %v95_v24 = vpack.c.bf16 %v49_v23, %v48_v22  ;;  %v20_v25 = vld [vmem:[%s1809_s0 + $0x30] sm:$0xff] }
   0x7   :  { %940 = vmatmul.msk.bf16.vlgmr.msra.gmra.mxu2 %vm118_vm0, %v94_v15  ;;  %v88_v21 = vpack.c.bf16 %v35_v19, %v34_v18  ;;  %v21_v26 = vld [vmem:[%s1809_s0 + $0x38] sm:$0xff]  ;;  %v36_v27 = vld [vmem:[%s1809_s0 + $0xb0] sm:$0xff]  ;;  %v50_v31 = vld [vmem:[%s1809_s0 + $0x120] sm:$0xff] }
   0x8   :  { %v37_v28 = vld [vmem:[%s1809_s0 + $0xb8] sm:$0xff]  ;;  %v81_v29 = vpack.c.bf16 %v21_v26, %v20_v25  ;;  %v51_v32 = vld [vmem:[%s1809_s0 + $0x128] sm:$0xff]  ;;  %v62_v33 = vld [vmem:[%s1809_s0 + $0x180] sm:$0xff] }
   0x9   :  { %v89_v30 = vpack.c.bf16 %v37_v28, %v36_v27  ;;  %v96_v34 = vpack.c.bf16 %v51_v32, %v50_v31  ;;  %v63_v35 = vld [vmem:[%s1809_s0 + $0x188] sm:$0xff]  ;;  %v22_v37 = vld [vmem:[%s1809_s0 + $0x40] sm:$0xff]  ;;  %v52_v43 = vld [vmem:[%s1809_s0 + $0x130] sm:$0xff] }
   0xa   :  { %v102_v36 = vpack.c.bf16 %v63_v35, %v62_v33  ;;  %v23_v38 = vld [vmem:[%s1809_s0 + $0x48] sm:$0xff]  ;;  %v38_v39 = vld [vmem:[%s1809_s0 + $0xc0] sm:$0xff]  ;;  %v53_v44 = vld [vmem:[%s1809_s0 + $0x138] sm:$0xff] }
   0xb   :  { %v39_v40 = vld [vmem:[%s1809_s0 + $0xc8] sm:$0xff]  ;;  %v82_v41 = vpack.c.bf16 %v23_v38, %v22_v37  ;;  %v64_v45 = vld [vmem:[%s1809_s0 + $0x190] sm:$0xff]  ;;  %v97_v46 = vpack.c.bf16 %v53_v44, %v52_v43  ;;  %v65_v47 = vld [vmem:[%s1809_s0 + $0x198] sm:$0xff] }
   0xc   :  { %948 = vmatmul.msk.bf16.vlgmr.msra.gmra.mxu3 %vm118_vm0, %v102_v36  ;;  %v90_v42 = vpack.c.bf16 %v39_v40, %v38_v39  ;;  %v103_v48 = vpack.c.bf16 %v65_v47, %v64_v45  ;;  %v24_v49 = vld [vmem:[%s1809_s0 + $0x50] sm:$0xff]  ;;  %v25_v50 = vld [vmem:[%s1809_s0 + $0x58] sm:$0xff]  ;;  %v54_v55 = vld [vmem:[%s1809_s0 + $0x140] sm:$0xff] }
   0xd   :  { %v40_v51 = vld [vmem:[%s1809_s0 + $0xd0] sm:$0xff]  ;;  %v41_v52 = vld [vmem:[%s1809_s0 + $0xd8] sm:$0xff]  ;;  %v83_v53 = vpack.c.bf16 %v25_v50, %v24_v49  ;;  %v55_v56 = vld [vmem:[%s1809_s0 + $0x148] sm:$0xff] }
   0xe   :  { %v91_v54 = vpack.c.bf16 %v41_v52, %v40_v51  ;;  %v66_v57 = vld [vmem:[%s1809_s0 + $0x1a0] sm:$0xff]  ;;  %v98_v58 = vpack.c.bf16 %v55_v56, %v54_v55  ;;  %v67_v59 = vld [vmem:[%s1809_s0 + $0x1a8] sm:$0xff]  ;;  %v56_v3 = vld [vmem:[%s1809_s0 + $0x150] sm:$0xff] }
   0xf   :  { %v104_v60 = vpack.c.bf16 %v67_v59, %v66_v57  ;;  %v26_v61 = vld [vmem:[%s1809_s0 + $0x60] sm:$0xff]  ;;  %v27_v62 = vld [vmem:[%s1809_s0 + $0x68] sm:$0xff]  ;;  %v57_v4 = vld [vmem:[%s1809_s0 + $0x158] sm:$0xff] }
  0x10   :  { %v42_v63 = vld [vmem:[%s1809_s0 + $0xe0] sm:$0xff]  ;;  %v43_v0 = vld [vmem:[%s1809_s0 + $0xe8] sm:$0xff]  ;;  %v84_v1 = vpack.c.bf16 %v27_v62, %v26_v61  ;;  %v68_v5 = vld [vmem:[%s1809_s0 + $0x1b0] sm:$0xff]  ;;  %v99_v6 = vpack.c.bf16 %v57_v4, %v56_v3 }
  0x11   :  { %v92_v2 = vpack.c.bf16 %v43_v0, %v42_v63  ;;  %v69_v7 = vld [vmem:[%s1809_s0 + $0x1b8] sm:$0xff]  ;;  %v28_v9 = vld [vmem:[%s1809_s0 + $0x70] sm:$0xff]  ;;  %v58_v15 = vld [vmem:[%s1809_s0 + $0x160] sm:$0xff] }
  0x12   :  { %v105_v8 = vpack.c.bf16 %v69_v7, %v68_v5  ;;  %v29_v10 = vld [vmem:[%s1809_s0 + $0x78] sm:$0xff]  ;;  %v59_v16 = vld [vmem:[%s1809_s0 + $0x168] sm:$0xff]  ;;  %v70_v17 = vld [vmem:[%s1809_s0 + $0x1c0] sm:$0xff] }
  0x13   :  { %v85_v13 = vpack.c.bf16 %v29_v10, %v28_v9  ;;  %v100_v18 = vpack.c.bf16 %v59_v16, %v58_v15  ;;  %v71_v19 = vld [vmem:[%s1809_s0 + $0x1c8] sm:$0xff]  ;;  %v60_v25 = vld [vmem:[%s1809_s0 + $0x170] sm:$0xff]  ;;  %v61_v26 = vld [vmem:[%s1809_s0 + $0x178] sm:$0xff] }
  0x14   :  { %v72_v27 = vld [vmem:[%s1809_s0 + $0x1d0] sm:$0xff]  ;;  %v101_v28 = vpack.c.bf16 %v61_v26, %v60_v25  ;;  %v74_v49 = vld [vmem:[%s1809_s0 + $0x1e0] sm:$0xff]  ;;  %v75_v50 = vld [vmem:[%s1809_s0 + $0x1e8] sm:$0xff] }
  0x15   :  { %925 = vmatmul.msk.bf16.gmra.mxu0 %vm118_vm0, %v79_v11  ;;  %v44_v11 = vld [vmem:[%s1809_s0 + $0xf0] sm:$0xff]  ;;  %v108_v52 = vpack.c.bf16 %v75_v50, %v74_v49 }
  0x16   :  { %933 = vmatmul.msk.bf16.gmra.mxu1 %vm118_vm0, %v87_v12  ;;  %v45_v12 = vld [vmem:[%s1809_s0 + $0xf8] sm:$0xff] }
  0x17   :  { %941 = vmatmul.msk.bf16.gmra.mxu2 %vm118_vm0, %v95_v24  ;;  %v93_v14 = vpack.c.bf16 %v45_v12, %v44_v11  ;;  %v76_v12 = vld [vmem:[%s1809_s0 + $0x1f0] sm:$0xff] }
  0x1c   :  { %949 = vmatmul.msk.bf16.gmra.mxu3 %vm118_vm0, %v103_v48 }
  0x25   :  { %926 = vmatmul.msk.bf16.gmra.mxu0 %vm118_vm0, %v80_v20  ;;  %v106_v20 = vpack.c.bf16 %v71_v19, %v70_v17 }
  0x26   :  { %934 = vmatmul.msk.bf16.gmra.mxu1 %vm118_vm0, %v88_v21 }
  0x27   :  { %942 = vmatmul.msk.bf16.gmra.mxu2 %vm118_vm0, %v96_v34 }
  0x2c   :  { %950 = vmatmul.msk.bf16.gmra.mxu3 %vm118_vm0, %v104_v60 }
  0x35   :  { %927 = vmatmul.msk.bf16.gmra.mxu0 %vm118_vm0, %v81_v29  ;;  %v73_v29 = vld [vmem:[%s1809_s0 + $0x1d8] sm:$0xff] }
  0x36   :  { %935 = vmatmul.msk.bf16.gmra.mxu1 %vm118_vm0, %v89_v30  ;;  %v107_v30 = vpack.c.bf16 %v73_v29, %v72_v27 }
  0x37   :  { %943 = vmatmul.msk.bf16.gmra.mxu2 %vm118_vm0, %v97_v46 }
  0x3c   :  { %951 = vmatmul.msk.bf16.gmra.mxu3 %vm118_vm0, %v105_v8 }
  0x45   :  { %928 = vmatmul.msk.bf16.gmra.mxu0 %vm118_vm0, %v82_v41 }
  0x46   :  { %936 = vmatmul.msk.bf16.gmra.mxu1 %vm118_vm0, %v90_v42 }
  0x47   :  { %944 = vmatmul.msk.bf16.gmra.mxu2 %vm118_vm0, %v98_v58 }
  0x4c   :  { %952 = vmatmul.msk.bf16.gmra.mxu3 %vm118_vm0, %v106_v20 }
  0x55   :  { %929 = vmatmul.msk.bf16.gmra.mxu0 %vm118_vm0, %v83_v53 }
  0x56   :  { %937 = vmatmul.msk.bf16.gmra.mxu1 %vm118_vm0, %v91_v54 }
  0x57   :  { %945 = vmatmul.msk.bf16.gmra.mxu2 %vm118_vm0, %v99_v6 }
  0x5c   :  { %953 = vmatmul.msk.bf16.gmra.mxu3 %vm118_vm0, %v107_v30 }
  0x65   :  { %930 = vmatmul.msk.bf16.gmra.mxu0 %vm118_vm0, %v84_v1 }
  0x66   :  { %938 = vmatmul.msk.bf16.gmra.mxu1 %vm118_vm0, %v92_v2 }
  0x67   :  { %946 = vmatmul.msk.bf16.gmra.mxu2 %vm118_vm0, %v100_v18 }
  0x6c   :  { %954 = vmatmul.msk.bf16.gmra.mxu3 %vm118_vm0, %v108_v52 }
  0x75   :  { %931 = vmatmul.msk.bf16.gmra.mxu0 %vm118_vm0, %v85_v13  ;;  %v77_v13 = vld [vmem:[%s1809_s0 + $0x1f8] sm:$0xff] }
  0x76   :  { %939 = vmatmul.msk.bf16.gmra.mxu1 %vm118_vm0, %v93_v14  ;;  %v109_v15 = vpack.c.bf16 %v77_v13, %v76_v12 }
  0x77   :  { %947 = vmatmul.msk.bf16.gmra.mxu2 %vm118_vm0, %v101_v28 }
  0x7c   :  { %955 = vmatmul.msk.bf16.gmra.mxu3 %vm118_vm0, %v109_v15 }
  0x82   :  { %v224_v21 = vpop.f32.mrf.mxu0 }
  0x83   :  { %v264_v22 = vpop.f32.mrf.mxu1  ;;  %v384_v23 = vpack.c.bf16 %v224_v21, %v224_v21 }
  0x84   :  { %v1179_v24 = vpack.c.bf16 %v264_v22, %v264_v22 }
  0x85   :  { %449 = vst.msk [vmem:[%s1810_s2] sm:$0xf] %vm448_vm1, %v384_v23  ;;  %v513_v31 = vunpack.c.l.bf16 %v384_v23 }
  0x86   :  { %465 = vst.msk [vmem:[%s1810_s2 + $0x40] sm:$0xf] %vm448_vm1, %v1179_v24 }
  0x87   :  { %v711_v36 = vmul.f32 %v513_v31, %v513_v31  ;;  %v578_v38 = vsel %vm577_vm2, %v513_v31, 0.0 }
  0x89   :  { %v775_v42 = vsel %vm577_vm2, %v711_v36, 0.0 }
  0x8a   :  { %v226_v32 = vpop.f32.mrf.mxu0  ;;  %v304_v62 = vpop.f32.mrf.mxu2 }
  0x8b   :  { %v266_v33 = vpop.f32.mrf.mxu1  ;;  %v385_v34 = vpack.c.bf16 %v226_v32, %v226_v32  ;;  %v1252_v7 = vpack.c.bf16 %v304_v62, %v304_v62 }
  0x8c   :  { %v1204_v35 = vpack.c.bf16 %v266_v33, %v266_v33 }
  0x8d   :  { %450 = vst.msk [vmem:[%s1810_s2 + $0x4] sm:$0xf] %vm448_vm1, %v385_v34  ;;  %v514_v37 = vunpack.c.l.bf16 %v385_v34 }
  0x8e   :  { %466 = vst.msk [vmem:[%s1810_s2 + $0x44] sm:$0xf] %vm448_vm1, %v1204_v35 }
  0x8f   :  { %v579_v39 = vsel %vm577_vm2, %v514_v37, 0.0  ;;  %v712_v40 = vmul.f32 %v514_v37, %v514_v37  ;;  %481 = vst.msk [vmem:[%s1810_s2 + $0x80] sm:$0xf] %vm448_vm1, %v1252_v7 }
  0x90   :  { %v580_v41 = vadd.f32 %v579_v39, %v578_v38 }
  0x91   :  { %v776_v43 = vsel %vm577_vm2, %v712_v40, 0.0  ;;  %v344_v40 = vpop.f32.mrf.mxu3 }
  0x92   :  { %v777_v44 = vadd.f32 %v776_v43, %v775_v42  ;;  %v229_v45 = vpop.f32.mrf.mxu0  ;;  %v306_v10 = vpop.f32.mrf.mxu2 }
  0x93   :  { %v269_v46 = vpop.f32.mrf.mxu1  ;;  %v386_v47 = vpack.c.bf16 %v229_v45, %v229_v45  ;;  %v1261_v11 = vpack.c.bf16 %v306_v10, %v306_v10 }
  0x94   :  { %v1219_v48 = vpack.c.bf16 %v269_v46, %v269_v46  ;;  %v1352_v46 = vpack.c.bf16 %v344_v40, %v344_v40 }
  0x95   :  { %451 = vst.msk [vmem:[%s1810_s2 + $0x8] sm:$0xf] %vm448_vm1, %v386_v47  ;;  %v515_v51 = vunpack.c.l.bf16 %v386_v47 }
  0x96   :  { %467 = vst.msk [vmem:[%s1810_s2 + $0x48] sm:$0xf] %vm448_vm1, %v1219_v48 }
  0x97   :  { %v581_v53 = vsel %vm577_vm2, %v515_v51, 0.0  ;;  %v713_v54 = vmul.f32 %v515_v51, %v515_v51  ;;  %482 = vst.msk [vmem:[%s1810_s2 + $0x84] sm:$0xf] %vm448_vm1, %v1261_v11 }
  0x98   :  { %v582_v55 = vadd.f32 %v581_v53, %v580_v41  ;;  %497 = vst.msk [vmem:[%s1810_s2 + $0xc0] sm:$0xf] %vm448_vm1, %v1352_v46 }
  0x99   :  { %v778_v56 = vsel %vm577_vm2, %v713_v54, 0.0  ;;  %v346_v49 = vpop.f32.mrf.mxu3 }
  0x9a   :  { %v779_v57 = vadd.f32 %v778_v56, %v777_v44  ;;  %v231_v58 = vpop.f32.mrf.mxu0  ;;  %v309_v26 = vpop.f32.mrf.mxu2  ;;  %v1366_v51 = vpack.c.bf16 %v346_v49, %v346_v49 }
  0x9b   :  { %v271_v59 = vpop.f32.mrf.mxu1  ;;  %v387_v60 = vpack.c.bf16 %v231_v58, %v231_v58  ;;  %v1304_v29 = vpack.c.bf16 %v309_v26, %v309_v26 }
  0x9c   :  { %v1239_v61 = vpack.c.bf16 %v271_v59, %v271_v59  ;;  %498 = vst.msk [vmem:[%s1810_s2 + $0xc4] sm:$0xf] %vm448_vm1, %v1366_v51 }
  0x9d   :  { %452 = vst.msk [vmem:[%s1810_s2 + $0xc] sm:$0xf] %vm448_vm1, %v387_v60  ;;  %v516_v63 = vunpack.c.l.bf16 %v387_v60 }
  0x9e   :  { %468 = vst.msk [vmem:[%s1810_s2 + $0x4c] sm:$0xf] %vm448_vm1, %v1239_v61 }
  0x9f   :  { %v583_v0 = vsel %vm577_vm2, %v516_v63, 0.0  ;;  %v714_v1 = vmul.f32 %v516_v63, %v516_v63  ;;  %483 = vst.msk [vmem:[%s1810_s2 + $0x88] sm:$0xf] %vm448_vm1, %v1304_v29 }
  0xa0   :  { %v584_v2 = vadd.f32 %v583_v0, %v582_v55 }
  0xa1   :  { %v780_v3 = vsel %vm577_vm2, %v714_v1, 0.0 }
  0xa2   :  { %v781_v4 = vadd.f32 %v780_v3, %v779_v57  ;;  %v234_v5 = vpop.f32.mrf.mxu0  ;;  %v311_v32 = vpop.f32.mrf.mxu2 }
  0xa3   :  { %v274_v6 = vpop.f32.mrf.mxu1  ;;  %v388_v8 = vpack.c.bf16 %v234_v5, %v234_v5  ;;  %v1315_v33 = vpack.c.bf16 %v311_v32, %v311_v32  ;;  %v349_v57 = vpop.f32.mrf.mxu3 }
  0xa4   :  { %v1254_v9 = vpack.c.bf16 %v274_v6, %v274_v6  ;;  %v1403_v0 = vpack.c.bf16 %v349_v57, %v349_v57 }
  0xa5   :  { %453 = vst.msk [vmem:[%s1810_s2 + $0x10] sm:$0xf] %vm448_vm1, %v388_v8  ;;  %v517_v14 = vunpack.c.l.bf16 %v388_v8 }
  0xa6   :  { %469 = vst.msk [vmem:[%s1810_s2 + $0x50] sm:$0xf] %vm448_vm1, %v1254_v9 }
  0xa7   :  { %v585_v16 = vsel %vm577_vm2, %v517_v14, 0.0  ;;  %v715_v17 = vmul.f32 %v517_v14, %v517_v14  ;;  %484 = vst.msk [vmem:[%s1810_s2 + $0x8c] sm:$0xf] %vm448_vm1, %v1315_v33 }
  0xa8   :  { %v1284_v18 = vadd.f32 %v585_v16, %v584_v2  ;;  %499 = vst.msk [vmem:[%s1810_s2 + $0xc8] sm:$0xf] %vm448_vm1, %v1403_v0 }
  0xa9   :  { %v782_v19 = vsel %vm577_vm2, %v715_v17, 0.0 }
  0xaa   :  { %v1288_v20 = vadd.f32 %v782_v19, %v781_v4  ;;  %v236_v21 = vpop.f32.mrf.mxu0  ;;  %v314_v39 = vpop.f32.mrf.mxu2 }
  0xab   :  { %v276_v22 = vpop.f32.mrf.mxu1  ;;  %v1290_v23 = vpack.c.bf16 %v236_v21, %v236_v21  ;;  %v1346_v43 = vpack.c.bf16 %v314_v39, %v314_v39  ;;  %v351_v2 = vpop.f32.mrf.mxu3 }
  0xac   :  { %v1292_v25 = vpack.c.bf16 %v276_v22, %v276_v22  ;;  %v1416_v4 = vpack.c.bf16 %v351_v2, %v351_v2 }
  0xad   :  { %454 = vst.msk [vmem:[%s1810_s2 + $0x14] sm:$0xf] %vm448_vm1, %v1290_v23  ;;  %v518_v14 = vunpack.c.l.bf16 %v1290_v23 }
  0xae   :  { %470 = vst.msk [vmem:[%s1810_s2 + $0x54] sm:$0xf] %vm448_vm1, %v1292_v25 }
  0xaf   :  { %485 = vst.msk [vmem:[%s1810_s2 + $0x90] sm:$0xf] %vm448_vm1, %v1346_v43  ;;  %v716_v23 = vmul.f32 %v518_v14, %v518_v14 }
  0xb0   :  { %500 = vst.msk [vmem:[%s1810_s2 + $0xcc] sm:$0xf] %vm448_vm1, %v1416_v4 }
  0xb1   :  { %v784_v40 = vsel %vm577_vm2, %v716_v23, 0.0 }
  0xb2   :  { %v239_v27 = vpop.f32.mrf.mxu0  ;;  %v316_v47 = vpop.f32.mrf.mxu2 }
  0xb3   :  { %v279_v28 = vpop.f32.mrf.mxu1  ;;  %v1306_v30 = vpack.c.bf16 %v239_v27, %v239_v27  ;;  %v1359_v50 = vpack.c.bf16 %v316_v47, %v316_v47  ;;  %v354_v13 = vpop.f32.mrf.mxu3 }
  0xb4   :  { %v1308_v31 = vpack.c.bf16 %v279_v28, %v279_v28  ;;  %v1455_v28 = vpack.c.bf16 %v354_v13, %v354_v13 }
  0xb5   :  { %455 = vst.msk [vmem:[%s1810_s2 + $0x18] sm:$0xf] %vm448_vm1, %v1306_v30  ;;  %v519_v27 = vunpack.c.l.bf16 %v1306_v30 }
  0xb6   :  { %471 = vst.msk [vmem:[%s1810_s2 + $0x58] sm:$0xf] %vm448_vm1, %v1308_v31 }
  0xb7   :  { %486 = vst.msk [vmem:[%s1810_s2 + $0x94] sm:$0xf] %vm448_vm1, %v1359_v50  ;;  %v717_v30 = vmul.f32 %v519_v27, %v519_v27 }
  0xb8   :  { %501 = vst.msk [vmem:[%s1810_s2 + $0xd0] sm:$0xf] %vm448_vm1, %v1455_v28 }
  0xba   :  { %v241_v34 = vpop.f32.mrf.mxu0  ;;  %v319_v56 = vpop.f32.mrf.mxu2 }
  0xbb   :  { %v281_v36 = vpop.f32.mrf.mxu1  ;;  %v1332_v37 = vpack.c.bf16 %v241_v34, %v241_v34  ;;  %v1399_v60 = vpack.c.bf16 %v319_v56, %v319_v56  ;;  %v356_v26 = vpop.f32.mrf.mxu3 }
  0xbc   :  { %v1334_v38 = vpack.c.bf16 %v281_v36, %v281_v36  ;;  %v1469_v36 = vpack.c.bf16 %v356_v26, %v356_v26 }
  0xbd   :  { %456 = vst.msk [vmem:[%s1810_s2 + $0x1c] sm:$0xf] %vm448_vm1, %v1332_v37  ;;  %v520_v34 = vunpack.c.l.bf16 %v1332_v37  ;;  %v587_v37 = vsel %vm577_vm2, %v518_v14, 0.0 }
  0xbe   :  { %472 = vst.msk [vmem:[%s1810_s2 + $0x5c] sm:$0xf] %vm448_vm1, %v1334_v38 }
  0xbf   :  { %487 = vst.msk [vmem:[%s1810_s2 + $0x98] sm:$0xf] %vm448_vm1, %v1399_v60  ;;  %v591_v2 = vsel %vm577_vm2, %v520_v34, 0.0 }
  0xc0   :  { %502 = vst.msk [vmem:[%s1810_s2 + $0xd4] sm:$0xf] %vm448_vm1, %v1469_v36 }
  0xc2   :  { %v244_v41 = vpop.f32.mrf.mxu0  ;;  %v321_v1 = vpop.f32.mrf.mxu2 }
  0xc3   :  { %v284_v42 = vpop.f32.mrf.mxu1  ;;  %v1348_v44 = vpack.c.bf16 %v244_v41, %v244_v41  ;;  %v1410_v3 = vpack.c.bf16 %v321_v1, %v321_v1  ;;  %v718_v41 = vmul.f32 %v520_v34, %v520_v34  ;;  %v359_v57 = vpop.f32.mrf.mxu3  ;;  %v785_v1 = vadd.f32 %v784_v40, %v1288_v20 }
  0xc4   :  { %v1350_v45 = vpack.c.bf16 %v284_v42, %v284_v42 }
  0xc5   :  { %457 = vst.msk [vmem:[%s1810_s2 + $0x20] sm:$0xf] %vm448_vm1, %v1348_v44  ;;  %v521_v39 = vunpack.c.l.bf16 %v1348_v44  ;;  %v589_v44 = vsel %vm577_vm2, %v519_v27, 0.0 }
  0xc6   :  { %473 = vst.msk [vmem:[%s1810_s2 + $0x60] sm:$0xf] %vm448_vm1, %v1350_v45 }
  0xc7   :  { %488 = vst.msk [vmem:[%s1810_s2 + $0x9c] sm:$0xf] %vm448_vm1, %v1410_v3  ;;  %v593_v20 = vsel %vm577_vm2, %v521_v39, 0.0 }
  0xca   :  { %v246_v52 = vpop.f32.mrf.mxu0  ;;  %v324_v12 = vpop.f32.mrf.mxu2 }
  0xcb   :  { %v286_v53 = vpop.f32.mrf.mxu1  ;;  %v393_v54 = vpack.c.bf16 %v246_v52, %v246_v52  ;;  %v1452_v21 = vpack.c.bf16 %v324_v12, %v324_v12  ;;  %v788_v12 = vsel %vm577_vm2, %v718_v41, 0.0 }
  0xcc   :  { %v1388_v55 = vpack.c.bf16 %v286_v53, %v286_v53 }
  0xcd   :  { %458 = vst.msk [vmem:[%s1810_s2 + $0x24] sm:$0xf] %vm448_vm1, %v393_v54  ;;  %v522_v42 = vunpack.c.l.bf16 %v393_v54 }
  0xce   :  { %474 = vst.msk [vmem:[%s1810_s2 + $0x64] sm:$0xf] %vm448_vm1, %v1388_v55 }
  0xcf   :  { %489 = vst.msk [vmem:[%s1810_s2 + $0xa0] sm:$0xf] %vm448_vm1, %v1452_v21  ;;  %v720_v13 = vmul.f32 %v522_v42, %v522_v42  ;;  %v595_v26 = vsel %vm577_vm2, %v522_v42, 0.0  ;;  %v1521_v42 = vpack.c.bf16 %v359_v57, %v359_v57 }
  0xd1   :  { %503 = vst.msk [vmem:[%s1810_s2 + $0xd8] sm:$0xf] %vm448_vm1, %v1521_v42 }
  0xd2   :  { %v249_v58 = vpop.f32.mrf.mxu0  ;;  %v326_v22 = vpop.f32.mrf.mxu2 }
  0xd3   :  { %v289_v59 = vpop.f32.mrf.mxu1  ;;  %v394_v62 = vpack.c.bf16 %v249_v58, %v249_v58  ;;  %v1461_v32 = vpack.c.bf16 %v326_v22, %v326_v22  ;;  %v588_v58 = vadd.f32 %v587_v37, %v1284_v18 }
  0xd4   :  { %v1401_v63 = vpack.c.bf16 %v289_v59, %v289_v59  ;;  %v786_v59 = vsel %vm577_vm2, %v717_v30, 0.0 }
  0xd5   :  { %459 = vst.msk [vmem:[%s1810_s2 + $0x28] sm:$0xf] %vm448_vm1, %v394_v62  ;;  %v523_v54 = vunpack.c.l.bf16 %v394_v62  ;;  %v787_v18 = vadd.f32 %v786_v59, %v785_v1 }
  0xd6   :  { %475 = vst.msk [vmem:[%s1810_s2 + $0x68] sm:$0xf] %vm448_vm1, %v1401_v63 }
  0xd7   :  { %490 = vst.msk [vmem:[%s1810_s2 + $0xa4] sm:$0xf] %vm448_vm1, %v1461_v32  ;;  %v597_v34 = vsel %vm577_vm2, %v523_v54, 0.0 }
  0xda   :  { %v251_v5 = vpop.f32.mrf.mxu0  ;;  %v329_v56 = vpop.f32.mrf.mxu2 }
  0xdb   :  { %v291_v6 = vpop.f32.mrf.mxu1  ;;  %v395_v8 = vpack.c.bf16 %v251_v5, %v251_v5  ;;  %v719_v5 = vmul.f32 %v521_v39, %v521_v39  ;;  %v1518_v39 = vpack.c.bf16 %v329_v56, %v329_v56 }
  0xdc   :  { %v1438_v10 = vpack.c.bf16 %v291_v6, %v291_v6  ;;  %v590_v6 = vadd.f32 %v589_v44, %v588_v58  ;;  %v361_v58 = vpop.f32.mrf.mxu3 }
  0xdd   :  { %460 = vst.msk [vmem:[%s1810_s2 + $0x2c] sm:$0xf] %vm448_vm1, %v395_v8  ;;  %v524_v14 = vunpack.c.l.bf16 %v395_v8  ;;  %v790_v22 = vsel %vm577_vm2, %v719_v5, 0.0  ;;  %v792_v8 = vsel %vm577_vm2, %v720_v13, 0.0  ;;  %v1535_v57 = vpack.c.bf16 %v361_v58, %v361_v58 }
  0xde   :  { %476 = vst.msk [vmem:[%s1810_s2 + $0x6c] sm:$0xf] %vm448_vm1, %v1438_v10  ;;  %v592_v62 = vadd.f32 %v591_v2, %v590_v6  ;;  %v530_v58 = vunpack.c.l.bf16 %v1204_v35 }
  0xdf   :  { %v722_v30 = vmul.f32 %v524_v14, %v524_v14  ;;  %v599_v2 = vsel %vm577_vm2, %v524_v14, 0.0  ;;  %491 = vst.msk [vmem:[%s1810_s2 + $0xa8] sm:$0xf] %vm448_vm1, %v1518_v39 }
  0xe0   :  { %v594_v23 = vadd.f32 %v593_v20, %v592_v62  ;;  %504 = vst.msk [vmem:[%s1810_s2 + $0xdc] sm:$0xf] %vm448_vm1, %v1535_v57 }
  0xe2   :  { %v254_v15 = vpop.f32.mrf.mxu0  ;;  %v331_v44 = vpop.f32.mrf.mxu2  ;;  %v596_v1 = vadd.f32 %v595_v26, %v594_v23 }
  0xe3   :  { %v294_v16 = vpop.f32.mrf.mxu1  ;;  %v396_v17 = vpack.c.bf16 %v254_v15, %v254_v15  ;;  %v721_v15 = vmul.f32 %v523_v54, %v523_v54  ;;  %v1528_v5 = vpack.c.bf16 %v331_v44, %v331_v44 }
  0xe4   :  { %v1450_v19 = vpack.c.bf16 %v294_v16, %v294_v16  ;;  %v789_v16 = vadd.f32 %v788_v12, %v787_v18  ;;  %v598_v6 = vadd.f32 %v597_v34, %v596_v1  ;;  %v796_v12 = vsel %vm577_vm2, %v722_v30, 0.0 }
  0xe5   :  { %461 = vst.msk [vmem:[%s1810_s2 + $0x30] sm:$0xf] %vm448_vm1, %v396_v17  ;;  %v525_v27 = vunpack.c.l.bf16 %v396_v17  ;;  %v794_v17 = vsel %vm577_vm2, %v721_v15, 0.0 }
  0xe6   :  { %477 = vst.msk [vmem:[%s1810_s2 + $0x70] sm:$0xf] %vm448_vm1, %v1450_v19  ;;  %v791_v59 = vadd.f32 %v790_v22, %v789_v16  ;;  %v600_v20 = vadd.f32 %v599_v2, %v598_v6  ;;  %v529_v22 = vunpack.c.l.bf16 %v1179_v24 }
  0xe7   :  { %v723_v54 = vmul.f32 %v525_v27, %v525_v27  ;;  %v601_v13 = vsel %vm577_vm2, %v525_v27, 0.0  ;;  %492 = vst.msk [vmem:[%s1810_s2 + $0xac] sm:$0xf] %vm448_vm1, %v1528_v5 }
  0xe8   :  { %v793_v56 = vadd.f32 %v792_v8, %v791_v59  ;;  %v602_v27 = vadd.f32 %v601_v13, %v600_v20  ;;  %v609_v13 = vsel %vm577_vm2, %v529_v22, 0.0 }
  0xe9   :  { %v798_v62 = vsel %vm577_vm2, %v723_v54, 0.0 }
  0xea   :  { %v256_v47 = vpop.f32.mrf.mxu0  ;;  %v795_v18 = vadd.f32 %v794_v17, %v793_v56  ;;  %v727_v17 = vmul.f32 %v529_v22, %v529_v22 }
  0xeb   :  { %v296_v49 = vpop.f32.mrf.mxu1  ;;  %v397_v52 = vpack.c.bf16 %v256_v47, %v256_v47 }
  0xec   :  { %v1495_v53 = vpack.c.bf16 %v296_v49, %v296_v49  ;;  %v797_v26 = vadd.f32 %v796_v12, %v795_v18  ;;  %v532_v18 = vunpack.c.l.bf16 %v1239_v61 }
  0xed   :  { %462 = vst.msk [vmem:[%s1810_s2 + $0x34] sm:$0xf] %vm448_vm1, %v397_v52  ;;  %v526_v41 = vunpack.c.l.bf16 %v397_v52 }
  0xee   :  { %478 = vst.msk [vmem:[%s1810_s2 + $0x74] sm:$0xf] %vm448_vm1, %v1495_v53  ;;  %v799_v24 = vadd.f32 %v798_v62, %v797_v26  ;;  %v806_v62 = vsel %vm577_vm2, %v727_v17, 0.0  ;;  %v615_v17 = vsel %vm577_vm2, %v532_v18, 0.0 }
  0xef   :  { %v724_v14 = vmul.f32 %v526_v41, %v526_v41  ;;  %v603_v15 = vsel %vm577_vm2, %v526_v41, 0.0  ;;  %v334_v41 = vpop.f32.mrf.mxu2 }
  0xf0   :  { %v604_v44 = vadd.f32 %v603_v15, %v602_v27  ;;  %v611_v15 = vsel %vm577_vm2, %v530_v58, 0.0 }
  0xf1   :  { %v800_v34 = vsel %vm577_vm2, %v724_v14, 0.0  ;;  %v728_v14 = vmul.f32 %v530_v58, %v530_v58 }
  0xf2   :  { %v259_v37 = vpop.f32.mrf.mxu0  ;;  %v801_v2 = vadd.f32 %v800_v34, %v799_v24 }
  0xf3   :  { %v299_v40 = vpop.f32.mrf.mxu1  ;;  %v398_v47 = vpack.c.bf16 %v259_v37, %v259_v37 }
  0xf4   :  { %v1516_v49 = vpack.c.bf16 %v299_v40, %v299_v40 }
  0xf5   :  { %463 = vst.msk [vmem:[%s1810_s2 + $0x38] sm:$0xf] %vm448_vm1, %v398_v47  ;;  %v527_v52 = vunpack.c.l.bf16 %v398_v47  ;;  %v364_v47 = vpop.f32.mrf.mxu3 }
  0xf6   :  { %479 = vst.msk [vmem:[%s1810_s2 + $0x78] sm:$0xf] %vm448_vm1, %v1516_v49 }
  0xf7   :  { %v725_v16 = vmul.f32 %v527_v52, %v527_v52  ;;  %v605_v30 = vsel %vm577_vm2, %v527_v52, 0.0  ;;  %v531_v52 = vunpack.c.l.bf16 %v1219_v48  ;;  %v533_v48 = vunpack.c.l.bf16 %v1254_v9  ;;  %v336_v34 = vpop.f32.mrf.mxu2 }
  0xf8   :  { %v606_v54 = vadd.f32 %v605_v30, %v604_v44  ;;  %v1589_v61 = vpack.c.bf16 %v336_v34, %v336_v34  ;;  %v808_v44 = vsel %vm577_vm2, %v728_v14, 0.0 }
  0xf9   :  { %v802_v59 = vsel %vm577_vm2, %v725_v16, 0.0  ;;  %v729_v27 = vmul.f32 %v531_v52, %v531_v52  ;;  %v613_v58 = vsel %vm577_vm2, %v531_v52, 0.0 }
  0xfa   :  { %v261_v23 = vpop.f32.mrf.mxu0  ;;  %v803_v6 = vadd.f32 %v802_v59, %v801_v2  ;;  %v730_v59 = vmul.f32 %v532_v18, %v532_v18  ;;  %v731_v2 = vmul.f32 %v533_v48, %v533_v48  ;;  %494 = vst.msk [vmem:[%s1810_s2 + $0xb4] sm:$0xf] %vm448_vm1, %v1589_v61 }
  0xfb   :  { %v301_v8 = vpop.f32.mrf.mxu1  ;;  %v399_v37 = vpack.c.bf16 %v261_v23, %v261_v23  ;;  %v1585_v23 = vpack.c.bf16 %v334_v41, %v334_v41 }
  0xfc   :  { %v1564_v40 = vpack.c.bf16 %v301_v8, %v301_v8  ;;  %v1587_v8 = vpack.c.bf16 %v364_v47, %v364_v47  ;;  %v810_v47 = vsel %vm577_vm2, %v729_v27, 0.0  ;;  %v814_v18 = vsel %vm577_vm2, %v731_v2, 0.0 }
  0xfd   :  { %464 = vst.msk [vmem:[%s1810_s2 + $0x3c] sm:$0xf] %vm448_vm1, %v399_v37  ;;  %v528_v1 = vunpack.c.l.bf16 %v399_v37  ;;  %v366_v22 = vpop.f32.mrf.mxu3  ;;  %v540_v2 = vunpack.c.l.bf16 %v1438_v10 }
  0xfe   :  { %480 = vst.msk [vmem:[%s1810_s2 + $0x7c] sm:$0xf] %vm448_vm1, %v1564_v40  ;;  %v1591_v24 = vpack.c.bf16 %v366_v22, %v366_v22 }
  0xff   :  { %v607_v35 = vsel %vm577_vm2, %v528_v1, 0.0  ;;  %v726_v56 = vmul.f32 %v528_v1, %v528_v1  ;;  %v534_v1 = vunpack.c.l.bf16 %v1292_v25  ;;  %493 = vst.msk [vmem:[%s1810_s2 + $0xb0] sm:$0xf] %vm448_vm1, %v1585_v23  ;;  %v535_v25 = vunpack.c.l.bf16 %v1308_v31 }
 0x100   :  { %v608_v12 = vadd.f32 %v607_v35, %v606_v54  ;;  %505 = vst.msk [vmem:[%s1810_s2 + $0xe0] sm:$0xf] %vm448_vm1, %v1587_v8  ;;  %v812_v35 = vsel %vm577_vm2, %v730_v59, 0.0  ;;  %v536_v31 = vunpack.c.l.bf16 %v1334_v38  ;;  %v538_v38 = vunpack.c.l.bf16 %v1388_v55 }
 0x101   :  { %v804_v20 = vsel %vm577_vm2, %v726_v56, 0.0  ;;  %506 = vst.msk [vmem:[%s1810_s2 + $0xe4] sm:$0xf] %vm448_vm1, %v1591_v24  ;;  %v617_v56 = vsel %vm577_vm2, %v533_v48, 0.0  ;;  %v621_v48 = vsel %vm577_vm2, %v535_v25, 0.0  ;;  %v539_v59 = vunpack.c.l.bf16 %v1401_v63 }
 0x102   :  { %v610_v16 = vadd.f32 %v609_v13, %v608_v12  ;;  %v805_v26 = vadd.f32 %v804_v20, %v803_v6  ;;  %v732_v6 = vmul.f32 %v534_v1, %v534_v1  ;;  %v537_v12 = vunpack.c.l.bf16 %v1350_v45 }
 0x103   :  { %v619_v20 = vsel %vm577_vm2, %v534_v1, 0.0  ;;  %v734_v22 = vmul.f32 %v536_v31, %v536_v31 }
 0x104   :  { %v612_v30 = vadd.f32 %v611_v15, %v610_v16  ;;  %v807_v37 = vadd.f32 %v806_v62, %v805_v26  ;;  %v733_v62 = vmul.f32 %v535_v25, %v535_v25  ;;  %v339_v15 = vpop.f32.mrf.mxu2  ;;  %v816_v34 = vsel %vm577_vm2, %v732_v6, 0.0 }
 0x105   :  { %v369_v16 = vpop.f32.mrf.mxu3  ;;  %v627_v25 = vsel %vm577_vm2, %v538_v38, 0.0  ;;  %v1637_v6 = vpack.c.bf16 %v339_v15, %v339_v15 }
 0x106   :  { %v614_v9 = vadd.f32 %v613_v58, %v612_v30  ;;  %v809_v41 = vadd.f32 %v808_v44, %v807_v37  ;;  %v735_v30 = vmul.f32 %v537_v12, %v537_v12  ;;  %v818_v44 = vsel %vm577_vm2, %v733_v62, 0.0 }
 0x107   :  { %v623_v58 = vsel %vm577_vm2, %v536_v31, 0.0  ;;  %v1639_v63 = vpack.c.bf16 %v369_v16, %v369_v16  ;;  %v629_v62 = vsel %vm577_vm2, %v539_v59, 0.0  ;;  %495 = vst.msk [vmem:[%s1810_s2 + $0xb8] sm:$0xf] %vm448_vm1, %v1637_v6 }
 0x108   :  { %v616_v54 = vadd.f32 %v615_v17, %v614_v9  ;;  %v811_v52 = vadd.f32 %v810_v47, %v809_v41  ;;  %v820_v41 = vsel %vm577_vm2, %v734_v22, 0.0  ;;  %v625_v47 = vsel %vm577_vm2, %v537_v12, 0.0 }
 0x109   :  { %v736_v17 = vmul.f32 %v538_v38, %v538_v38  ;;  %v822_v55 = vsel %vm577_vm2, %v735_v30, 0.0  ;;  %507 = vst.msk [vmem:[%s1810_s2 + $0xe8] sm:$0xf] %vm448_vm1, %v1639_v63 }
 0x10a   :  { %v618_v13 = vadd.f32 %v617_v56, %v616_v54  ;;  %v813_v14 = vadd.f32 %v812_v35, %v811_v52  ;;  %v737_v35 = vmul.f32 %v539_v59, %v539_v59  ;;  %v541_v56 = vunpack.c.l.bf16 %v1450_v19 }
 0x10c   :  { %v620_v26 = vadd.f32 %v619_v20, %v618_v13  ;;  %v815_v27 = vadd.f32 %v814_v18, %v813_v14  ;;  %v341_v31 = vpop.f32.mrf.mxu2  ;;  %v824_v20 = vsel %vm577_vm2, %v736_v17, 0.0  ;;  %v826_v16 = vsel %vm577_vm2, %v737_v35, 0.0 }
 0x10d   :  { %v371_v13 = vpop.f32.mrf.mxu3  ;;  %v1641_v18 = vpack.c.bf16 %v341_v31, %v341_v31 }
 0x10e   :  { %v817_v45 = vadd.f32 %v816_v34, %v815_v27  ;;  %v622_v37 = vadd.f32 %v621_v48, %v620_v26  ;;  %v1643_v10 = vpack.c.bf16 %v371_v13, %v371_v13  ;;  %v738_v26 = vmul.f32 %v540_v2, %v540_v2 }
 0x10f   :  { %v542_v27 = vunpack.c.l.bf16 %v1495_v53  ;;  %v631_v34 = vsel %vm577_vm2, %v540_v2, 0.0  ;;  %v739_v48 = vmul.f32 %v541_v56, %v541_v56  ;;  %v543_v53 = vunpack.c.l.bf16 %v1516_v49  ;;  %496 = vst.msk [vmem:[%s1810_s2 + $0xbc] sm:$0xf] %vm448_vm1, %v1641_v18 }
 0x110   :  { %v624_v1 = vadd.f32 %v623_v58, %v622_v37  ;;  %v819_v9 = vadd.f32 %v818_v44, %v817_v45  ;;  %508 = vst.msk [vmem:[%s1810_s2 + $0xec] sm:$0xf] %vm448_vm1, %v1643_v10  ;;  %v828_v30 = vsel %vm577_vm2, %v738_v26, 0.0  ;;  %v633_v45 = vsel %vm577_vm2, %v541_v56, 0.0 }
 0x111   :  { %v740_v37 = vmul.f32 %v542_v27, %v542_v27  ;;  %v544_v49 = vunpack.c.l.bf16 %v1564_v40  ;;  %v545_v44 = vunpack.c.l.bf16 %v1252_v7  ;;  %v547_v56 = vunpack.c.l.bf16 %v1304_v29 }
 0x112   :  { %v626_v54 = vadd.f32 %v625_v47, %v624_v1  ;;  %v821_v52 = vadd.f32 %v820_v41, %v819_v9  ;;  %v830_v1 = vsel %vm577_vm2, %v739_v48, 0.0  ;;  %v635_v9 = vsel %vm577_vm2, %v542_v27, 0.0 }
 0x113   :  { %v741_v41 = vmul.f32 %v543_v53, %v543_v53  ;;  %v743_v40 = vmul.f32 %v545_v44, %v545_v44  ;;  %v639_v13 = vsel %vm577_vm2, %v544_v49, 0.0  ;;  %v745_v29 = vmul.f32 %v547_v56, %v547_v56 }
 0x114   :  { %v628_v14 = vadd.f32 %v627_v25, %v626_v54  ;;  %v823_v12 = vadd.f32 %v822_v55, %v821_v52  ;;  %v546_v55 = vunpack.c.l.bf16 %v1261_v11  ;;  %v832_v25 = vsel %vm577_vm2, %v740_v37, 0.0 }
 0x115   :  { %v374_v47 = vpop.f32.mrf.mxu3  ;;  %v637_v54 = vsel %vm577_vm2, %v543_v53, 0.0  ;;  %v742_v52 = vmul.f32 %v544_v49, %v544_v49  ;;  %v834_v31 = vsel %vm577_vm2, %v741_v41, 0.0  ;;  %v548_v11 = vunpack.c.l.bf16 %v1315_v33 }
 0x116   :  { %v630_v19 = vadd.f32 %v629_v62, %v628_v14  ;;  %v825_v15 = vadd.f32 %v824_v20, %v823_v12  ;;  %v641_v20 = vsel %vm577_vm2, %v545_v44, 0.0  ;;  %v744_v62 = vmul.f32 %v546_v55, %v546_v55 }
 0x117   :  { %v836_v26 = vsel %vm577_vm2, %v742_v52, 0.0  ;;  %v838_v27 = vsel %vm577_vm2, %v743_v40, 0.0  ;;  %v1689_v48 = vpack.c.bf16 %v374_v47, %v374_v47  ;;  %v746_v37 = vmul.f32 %v548_v11, %v548_v11 }
 0x118   :  { %v632_v22 = vadd.f32 %v631_v34, %v630_v19  ;;  %v827_v38 = vadd.f32 %v826_v16, %v825_v15  ;;  %v643_v16 = vsel %vm577_vm2, %v546_v55, 0.0  ;;  %v549_v34 = vunpack.c.l.bf16 %v1346_v43 }
 0x119   :  { %v840_v33 = vsel %vm577_vm2, %v744_v62, 0.0  ;;  %v550_v49 = vunpack.c.l.bf16 %v1359_v50  ;;  %509 = vst.msk [vmem:[%s1810_s2 + $0xf0] sm:$0xf] %vm448_vm1, %v1689_v48  ;;  %v551_v50 = vunpack.c.l.bf16 %v1399_v60  ;;  %v844_v47 = vsel %vm577_vm2, %v746_v37, 0.0 }
 0x11a   :  { %v634_v58 = vadd.f32 %v633_v45, %v632_v22  ;;  %v829_v59 = vadd.f32 %v828_v30, %v827_v38  ;;  %v645_v45 = vsel %vm577_vm2, %v547_v56, 0.0  ;;  %v552_v55 = vunpack.c.l.bf16 %v1410_v3 }
 0x11b   :  { %v651_v40 = vsel %vm577_vm2, %v550_v49, 0.0  ;;  %v557_v37 = vunpack.c.l.bf16 %v1585_v23 }
 0x11c   :  { %v831_v17 = vadd.f32 %v830_v1, %v829_v59  ;;  %v636_v2 = vadd.f32 %v635_v9, %v634_v58  ;;  %v842_v58 = vsel %vm577_vm2, %v745_v29, 0.0  ;;  %v647_v59 = vsel %vm577_vm2, %v548_v11, 0.0 }
 0x11d   :  { %v376_v53 = vpop.f32.mrf.mxu3  ;;  %v747_v1 = vmul.f32 %v549_v34, %v549_v34 }
 0x11e   :  { %v833_v35 = vadd.f32 %v832_v25, %v831_v17  ;;  %v638_v7 = vadd.f32 %v637_v54, %v636_v2  ;;  %v1691_v30 = vpack.c.bf16 %v376_v53, %v376_v53  ;;  %v649_v17 = vsel %vm577_vm2, %v549_v34, 0.0 }
 0x11f   :  { %v748_v2 = vmul.f32 %v550_v49, %v550_v49  ;;  %v846_v52 = vsel %vm577_vm2, %v747_v1, 0.0  ;;  %v556_v53 = vunpack.c.l.bf16 %v1528_v5 }
 0x120   :  { %v835_v14 = vadd.f32 %v834_v31, %v833_v35  ;;  %v640_v12 = vadd.f32 %v639_v13, %v638_v7  ;;  %510 = vst.msk [vmem:[%s1810_s2 + $0xf4] sm:$0xf] %vm448_vm1, %v1691_v30  ;;  %v749_v35 = vmul.f32 %v551_v50, %v551_v50  ;;  %v553_v7 = vunpack.c.l.bf16 %v1452_v21 }
 0x121   :  { %v848_v13 = vsel %vm577_vm2, %v748_v2, 0.0  ;;  %v754_v1 = vmul.f32 %v556_v53, %v556_v53 }
 0x122   :  { %v642_v19 = vadd.f32 %v641_v20, %v640_v12  ;;  %v837_v15 = vadd.f32 %v836_v26, %v835_v14  ;;  %v653_v14 = vsel %vm577_vm2, %v551_v50, 0.0  ;;  %v750_v12 = vmul.f32 %v552_v55, %v552_v55 }
 0x123   :  { %v554_v20 = vunpack.c.l.bf16 %v1461_v32  ;;  %v850_v11 = vsel %vm577_vm2, %v749_v35, 0.0  ;;  %v655_v26 = vsel %vm577_vm2, %v552_v55, 0.0  ;;  %v657_v29 = vsel %vm577_vm2, %v553_v7, 0.0 }
 0x124   :  { %v644_v22 = vadd.f32 %v643_v16, %v642_v19  ;;  %v839_v38 = vadd.f32 %v838_v27, %v837_v15  ;;  %v751_v27 = vmul.f32 %v553_v7, %v553_v7  ;;  %v555_v19 = vunpack.c.l.bf16 %v1518_v39 }
 0x125   :  { %v379_v56 = vpop.f32.mrf.mxu3  ;;  %v852_v16 = vsel %vm577_vm2, %v750_v12, 0.0  ;;  %v752_v34 = vmul.f32 %v554_v20, %v554_v20  ;;  %v659_v32 = vsel %vm577_vm2, %v554_v20, 0.0  ;;  %v558_v50 = vunpack.c.l.bf16 %v1589_v61 }
 0x126   :  { %v646_v43 = vadd.f32 %v645_v45, %v644_v22  ;;  %v841_v44 = vadd.f32 %v840_v33, %v839_v38  ;;  %v854_v33 = vsel %vm577_vm2, %v751_v27, 0.0  ;;  %v753_v45 = vmul.f32 %v555_v19, %v555_v19 }
 0x127   :  { %v1727_v49 = vpack.c.bf16 %v379_v56, %v379_v56  ;;  %v661_v5 = vsel %vm577_vm2, %v555_v19, 0.0  ;;  %v559_v61 = vunpack.c.l.bf16 %v1637_v6  ;;  %v561_v56 = vunpack.c.l.bf16 %v1352_v46 }
 0x128   :  { %v648_v9 = vadd.f32 %v647_v59, %v646_v43  ;;  %v843_v41 = vadd.f32 %v842_v58, %v841_v44  ;;  %v856_v59 = vsel %vm577_vm2, %v752_v34, 0.0  ;;  %v562_v12 = vunpack.c.l.bf16 %v1366_v51 }
 0x129   :  { %511 = vst.msk [vmem:[%s1810_s2 + $0xf8] sm:$0xf] %vm448_vm1, %v1727_v49  ;;  %v563_v27 = vunpack.c.l.bf16 %v1403_v0  ;;  %v564_v51 = vunpack.c.l.bf16 %v1416_v4  ;;  %v566_v4 = vunpack.c.l.bf16 %v1469_v36 }
 0x12a   :  { %v650_v25 = vadd.f32 %v649_v17, %v648_v9  ;;  %v845_v54 = vadd.f32 %v844_v47, %v843_v41  ;;  %v858_v41 = vsel %vm577_vm2, %v753_v45, 0.0  ;;  %v663_v47 = vsel %vm577_vm2, %v556_v53, 0.0 }
 0x12b   :  { %v755_v17 = vmul.f32 %v557_v37, %v557_v37  ;;  %v761_v0 = vmul.f32 %v563_v27, %v563_v27 }
 0x12c   :  { %v652_v60 = vadd.f32 %v651_v40, %v650_v25  ;;  %v847_v31 = vadd.f32 %v846_v52, %v845_v54  ;;  %v860_v25 = vsel %vm577_vm2, %v754_v1, 0.0  ;;  %v665_v54 = vsel %vm577_vm2, %v557_v37, 0.0 }
 0x12d   :  { %v381_v39 = vpop.f32.mrf.mxu3  ;;  %v756_v52 = vmul.f32 %v558_v50, %v558_v50  ;;  %v560_v40 = vunpack.c.l.bf16 %v1641_v18  ;;  %v874_v1 = vsel %vm577_vm2, %v761_v0, 0.0 }
 0x12e   :  { %v849_v3 = vadd.f32 %v848_v13, %v847_v31  ;;  %v654_v62 = vadd.f32 %v653_v14, %v652_v60  ;;  %v1729_v58 = vpack.c.bf16 %v381_v39, %v381_v39  ;;  %v862_v60 = vsel %vm577_vm2, %v755_v17, 0.0 }
 0x12f   :  { %v667_v31 = vsel %vm577_vm2, %v558_v50, 0.0  ;;  %v757_v13 = vmul.f32 %v559_v61, %v559_v61  ;;  %v864_v20 = vsel %vm577_vm2, %v756_v52, 0.0  ;;  %v671_v19 = vsel %vm577_vm2, %v560_v40, 0.0 }
 0x130   :  { %v656_v21 = vadd.f32 %v655_v26, %v654_v62  ;;  %v851_v15 = vadd.f32 %v850_v11, %v849_v3  ;;  %512 = vst.msk [vmem:[%s1810_s2 + $0xfc] sm:$0xf] %vm448_vm1, %v1729_v58  ;;  %v669_v3 = vsel %vm577_vm2, %v559_v61, 0.0  ;;  %v758_v62 = vmul.f32 %v560_v40, %v560_v40 }
 0x131   :  { %v759_v26 = vmul.f32 %v561_v56, %v561_v56  ;;  %v866_v46 = vsel %vm577_vm2, %v757_v13, 0.0  ;;  %v679_v50 = vsel %vm577_vm2, %v564_v51, 0.0  ;;  %v764_v61 = vmul.f32 %v566_v4, %v566_v4 }
 0x132   :  { %v658_v22 = vadd.f32 %v657_v29, %v656_v21  ;;  %v853_v38 = vadd.f32 %v852_v16, %v851_v15  ;;  %v673_v16 = vsel %vm577_vm2, %v561_v56, 0.0  ;;  %v760_v29 = vmul.f32 %v562_v12, %v562_v12 }
 0x133   :  { %v868_v34 = vsel %vm577_vm2, %v758_v62, 0.0  ;;  %v569_v40 = vunpack.c.l.bf16 %v1587_v8 }
 0x134   :  { %v660_v43 = vadd.f32 %v659_v32, %v658_v22  ;;  %v855_v44 = vadd.f32 %v854_v33, %v853_v38  ;;  %v870_v22 = vsel %vm577_vm2, %v759_v26, 0.0  ;;  %v675_v38 = vsel %vm577_vm2, %v562_v12, 0.0 }
 0x135   :  { %v565_v33 = vunpack.c.l.bf16 %v1455_v28  ;;  %v872_v39 = vsel %vm577_vm2, %v760_v29, 0.0  ;;  %v767_v12 = vmul.f32 %v569_v40, %v569_v40  ;;  %v572_v26 = vunpack.c.l.bf16 %v1643_v10 }
 0x136   :  { %v662_v23 = vadd.f32 %v661_v5, %v660_v43  ;;  %v857_v9 = vadd.f32 %v856_v59, %v855_v44  ;;  %v677_v43 = vsel %vm577_vm2, %v563_v27, 0.0  ;;  %v762_v44 = vmul.f32 %v564_v51, %v564_v51 }
 0x137   :  { %v681_v17 = vsel %vm577_vm2, %v565_v33, 0.0 }
 0x138   :  { %v664_v2 = vadd.f32 %v663_v47, %v662_v23  ;;  %v859_v55 = vadd.f32 %v858_v41, %v857_v9  ;;  %v763_v23 = vmul.f32 %v565_v33, %v565_v33  ;;  %v567_v9 = vunpack.c.l.bf16 %v1521_v42 }
 0x139   :  { %v876_v47 = vsel %vm577_vm2, %v762_v44, 0.0  ;;  %v575_v33 = vunpack.c.l.bf16 %v1727_v49  ;;  %v576_v44 = vunpack.c.l.bf16 %v1729_v58 }
 0x13a   :  { %v861_v35 = vadd.f32 %v860_v25, %v859_v55  ;;  %v666_v7 = vadd.f32 %v665_v54, %v664_v2  ;;  %v568_v2 = vunpack.c.l.bf16 %v1535_v57  ;;  %v878_v25 = vsel %vm577_vm2, %v763_v23, 0.0 }
 0x13b   :  { %v683_v54 = vsel %vm577_vm2, %v566_v4, 0.0  ;;  %v765_v52 = vmul.f32 %v567_v9, %v567_v9  ;;  %v685_v56 = vsel %vm577_vm2, %v567_v9, 0.0  ;;  %v701_v9 = vsel %vm577_vm2, %v575_v33, 0.0 }
 0x13c   :  { %v863_v14 = vadd.f32 %v862_v60, %v861_v35  ;;  %v668_v6 = vadd.f32 %v667_v31, %v666_v7  ;;  %v880_v7 = vsel %vm577_vm2, %v764_v61, 0.0  ;;  %v766_v60 = vmul.f32 %v568_v2, %v568_v2 }
 0x13d   :  { %v570_v31 = vunpack.c.l.bf16 %v1591_v24  ;;  %v703_v58 = vsel %vm577_vm2, %v576_v44, 0.0 }
 0x13e   :  { %v865_v11 = vadd.f32 %v864_v20, %v863_v14  ;;  %v670_v18 = vadd.f32 %v669_v3, %v668_v6  ;;  %v882_v14 = vsel %vm577_vm2, %v765_v52, 0.0  ;;  %v687_v6 = vsel %vm577_vm2, %v568_v2, 0.0 }
 0x13f   :  { %v571_v20 = vunpack.c.l.bf16 %v1639_v63  ;;  %v884_v62 = vsel %vm577_vm2, %v766_v60, 0.0 }
 0x140   :  { %v867_v21 = vadd.f32 %v866_v46, %v865_v11  ;;  %v672_v15 = vadd.f32 %v671_v19, %v670_v18  ;;  %v689_v11 = vsel %vm577_vm2, %v569_v40, 0.0  ;;  %v768_v18 = vmul.f32 %v570_v31, %v570_v31 }
 0x141   :  { %v886_v46 = vsel %vm577_vm2, %v767_v12, 0.0  ;;  %v691_v19 = vsel %vm577_vm2, %v570_v31, 0.0  ;;  %v693_v51 = vsel %vm577_vm2, %v571_v20, 0.0 }
 0x142   :  { %v674_v53 = vadd.f32 %v673_v16, %v672_v15  ;;  %v869_v32 = vadd.f32 %v868_v34, %v867_v21  ;;  %v769_v21 = vmul.f32 %v571_v20, %v571_v20  ;;  %v573_v15 = vunpack.c.l.bf16 %v1689_v48 }
 0x143   :  { %v888_v29 = vsel %vm577_vm2, %v768_v18, 0.0  ;;  %v770_v34 = vmul.f32 %v572_v26, %v572_v26 }
 0x144   :  { %v676_v45 = vadd.f32 %v675_v38, %v674_v53  ;;  %v871_v37 = vadd.f32 %v870_v22, %v869_v32  ;;  %v574_v53 = vunpack.c.l.bf16 %v1691_v30  ;;  %v890_v22 = vsel %vm577_vm2, %v769_v21, 0.0 }
 0x145   :  { %v695_v38 = vsel %vm577_vm2, %v572_v26, 0.0  ;;  %v771_v0 = vmul.f32 %v573_v15, %v573_v15 }
 0x146   :  { %v678_v59 = vadd.f32 %v677_v43, %v676_v45  ;;  %v873_v5 = vadd.f32 %v872_v39, %v871_v37  ;;  %v892_v37 = vsel %vm577_vm2, %v770_v34, 0.0  ;;  %v697_v39 = vsel %vm577_vm2, %v573_v15, 0.0 }
 0x147   :  { %v772_v43 = vmul.f32 %v574_v53, %v574_v53 }
 0x148   :  { %v680_v41 = vadd.f32 %v679_v50, %v678_v59  ;;  %v875_v28 = vadd.f32 %v874_v1, %v873_v5  ;;  %v894_v59 = vsel %vm577_vm2, %v771_v0, 0.0  ;;  %v699_v5 = vsel %vm577_vm2, %v574_v53, 0.0 }
 0x149   :  { %v773_v1 = vmul.f32 %v575_v33, %v575_v33  ;;  %v896_v49 = vsel %vm577_vm2, %v772_v43, 0.0 }
 0x14a   :  { %v682_v55 = vadd.f32 %v681_v17, %v680_v41  ;;  %v877_v36 = vadd.f32 %v876_v47, %v875_v28  ;;  %v774_v41 = vmul.f32 %v576_v44, %v576_v44 }
 0x14b   :  { %v898_v17 = vsel %vm577_vm2, %v773_v1, 0.0 }
 0x14c   :  { %v684_v35 = vadd.f32 %v683_v54, %v682_v55  ;;  %v879_v42 = vadd.f32 %v878_v25, %v877_v36  ;;  %v900_v55 = vsel %vm577_vm2, %v774_v41, 0.0 }
 0x14e   :  { %v881_v13 = vadd.f32 %v880_v7, %v879_v42  ;;  %v686_v57 = vadd.f32 %v685_v56, %v684_v35 }
 0x150   :  { %v688_v3 = vadd.f32 %v687_v6, %v686_v57  ;;  %v883_v8 = vadd.f32 %v882_v14, %v881_v13 }
 0x152   :  { %v690_v27 = vadd.f32 %v689_v11, %v688_v3  ;;  %v885_v24 = vadd.f32 %v884_v62, %v883_v8 }
 0x154   :  { %v692_v16 = vadd.f32 %v691_v19, %v690_v27  ;;  %v887_v63 = vadd.f32 %v886_v46, %v885_v24 }
 0x156   :  { %v694_v32 = vadd.f32 %v693_v51, %v692_v16  ;;  %v889_v10 = vadd.f32 %v888_v29, %v887_v63 }
 0x158   :  { %v696_v45 = vadd.f32 %v695_v38, %v694_v32  ;;  %v891_v48 = vadd.f32 %v890_v22, %v889_v10 }
 0x15a   :  { %v893_v4 = vadd.f32 %v892_v37, %v891_v48  ;;  %v698_v30 = vadd.f32 %v697_v39, %v696_v45 }
 0x15c   :  { %v895_v50 = vadd.f32 %v894_v59, %v893_v4  ;;  %v700_v23 = vadd.f32 %v699_v5, %v698_v30 }
 0x15e   :  { %v897_v28 = vadd.f32 %v896_v49, %v895_v50  ;;  %v702_v47 = vadd.f32 %v701_v9, %v700_v23 }
 0x160   :  { %v899_v61 = vadd.f32 %v898_v17, %v897_v28  ;;  %v704_v2 = vadd.f32 %v703_v58, %v702_v47 }
 0x162   :  { %v705_v36 = vrot.slane %v704_v2, 4  ;;  %v901_v25 = vadd.f32 %v900_v55, %v899_v61 }
 0x164   :  { %v706_v54 = vadd.f32 %v705_v36, %v704_v2  ;;  %v902_v52 = vrot.slane %v901_v25, 4 }
 0x166   :  { %v707_v40 = vrot.slane %v706_v54, 2  ;;  %v903_v35 = vadd.f32 %v902_v52, %v901_v25 }
 0x168   :  { %v708_v42 = vadd.f32 %v707_v40, %v706_v54  ;;  %v904_v7 = vrot.slane %v903_v35, 2 }
 0x16a   :  { %v709_v56 = vrot.slane %v708_v42, 1  ;;  %v905_v60 = vadd.f32 %v904_v7, %v903_v35 }
 0x16c   :  { %v906_v31 = vrot.slane %v905_v60, 1  ;;  %v710_v13 = vadd.f32 %v709_v56, %v708_v42 }
 0x16e   :  { %v907_v57 = vadd.f32 %v906_v31, %v905_v60 }
 0x170   :  { %v909_v14 = vsel %vm908_vm3, %v710_v13, %v907_v57 }
 0x171   :  { %911 = vst.msk [vmem:[%s1811_s3] sm:$0x3] %vm910_vm4, %v909_v14 }

// kernel: bottleneck_forward.6
= control target key start
LH: loop header
LB: loop body
LE: loop exit
PB: predicated region body
PF: predicated region fallthrough
CT: control target
= control target key end

     0   :  { %vm469_vm0 = vcmask 1041408   ;;  %vm372_vm1 = vcmask 31744   ;;  %vm642_vm2 = vcmask 130048   ;;  %vm973_vm3 = vcmask 1040384   ;;  %s1792_s1 = inlined_call_operand.vmem [shape: bf16[4,16], index: 1, kind: input, shape index: {}]   ;;  %s1793_s0 = inlined_call_operand.vmem [shape: bf16[512,4], index: 0, kind: input, shape index: {}]   ;;  %s1794_s2 = inlined_call_operand.vmem [shape: f32[2,4], index: 2, kind: input, shape index: {}]   ;;  %s1795_s3 = inlined_call_operand.vmem [shape: f32[1,2,16], index: 3, kind: output, shape index: {}]  }
   0x1   :  { %v371_v0 = vld [vmem:[%s1792_s1] sm:$0x3]  ;;  %v1141_v10 = vld [vmem:[%s1793_s0 + $0x8] sm:$0xff]   ;;  %v1142_v41 = vld [vmem:[%s1793_s0 + $0x10] sm:$0xff]   ;;  %vm975_vm4 = vcmask 123904  }
   0x2   :  { %v1014_v1 = vld [vmem:[%s1793_s0] sm:$0xff]   ;;  %v471_v2 = vsel %vm469_vm0, %v371_v0, 0  ;;  %v1019_v17 = vunpack.c.l.bf16 %v1141_v10  ;;  %v1020_v18 = vunpack.c.h.bf16 %v1141_v10  ;;  %v1149_v23 = vld [vmem:[%s1793_s0 + $0x48] sm:$0xff]   ;;  %v1023_v48 = vunpack.c.l.bf16 %v1142_v41  ;;  %v1150_v54 = vld [vmem:[%s1793_s0 + $0x50] sm:$0xff]  }
   0x3   :  { %v1015_v3 = vunpack.c.l.bf16 %v1014_v1  ;;  %v1016_v4 = vunpack.c.h.bf16 %v1014_v1  ;;  %v1206_v5 = vld [vmem:[%s1794_s2] ss:$0 sm:$0xff]  ;;  %480 = vmatpush.bf16.msra.mxu0 %v471_v2  ;;  %v1211_v6 = vld [vmem:[%s1794_s2 + $0x1] ss:$0 sm:$0xff]  ;;  %1172 = vmatpush.bf16.msra.mxu1 %v471_v2  ;;  %v1051_v27 = vunpack.c.l.bf16 %v1149_v23  ;;  %v1052_v28 = vunpack.c.h.bf16 %v1149_v23 }
   0x4   :  { %v1148_v7 = vld [vmem:[%s1793_s0 + $0x40] sm:$0xff]   ;;  %1173 = vmatpush.bf16.msra.mxu2 %v471_v2  ;;  %1174 = vmatpush.bf16.msra.mxu3 %v471_v2  ;;  %v147_v29 = vmul.f32 %v1206_v5, %v1019_v17  ;;  %v148_v30 = vmul.f32 %v1206_v5, %v1020_v18  ;;  %v1024_v50 = vunpack.c.h.bf16 %v1142_v41  ;;  %v1055_v57 = vunpack.c.l.bf16 %v1150_v54 }
   0x5   :  { %v145_v8 = vmul.f32 %v1206_v5, %v1015_v3  ;;  %v146_v9 = vmul.f32 %v1206_v5, %v1016_v4  ;;  %v1047_v11 = vunpack.c.l.bf16 %v1148_v7  ;;  %v1048_v12 = vunpack.c.h.bf16 %v1148_v7  ;;  %v1156_v38 = vld [vmem:[%s1793_s0 + $0x80] sm:$0xff]   ;;  %v1157_v4 = vld [vmem:[%s1793_s0 + $0x88] sm:$0xff]  }
   0x6   :  { %v163_v32 = vmul.f32 %v1206_v5, %v1051_v27  ;;  %v164_v33 = vmul.f32 %v1206_v5, %v1052_v28  ;;  %v213_v34 = vadd.f32 %v1211_v6, %v147_v29  ;;  %v214_v35 = vadd.f32 %v1211_v6, %v148_v30 }
   0x7   :  { %v211_v13 = vadd.f32 %v1211_v6, %v145_v8  ;;  %v212_v14 = vadd.f32 %v1211_v6, %v146_v9  ;;  %v161_v15 = vmul.f32 %v1206_v5, %v1047_v11  ;;  %v162_v16 = vmul.f32 %v1206_v5, %v1048_v12  ;;  %v1143_v9 = vld [vmem:[%s1793_s0 + $0x18] sm:$0xff]  }
   0x8   :  { %v229_v36 = vadd.f32 %v1211_v6, %v163_v32  ;;  %v230_v37 = vadd.f32 %v1211_v6, %v164_v33  ;;  %v277_v39 = vmax.f32 %v213_v34, 0.0  ;;  %v278_v40 = vmax.f32 %v214_v35, 0.0 }
   0x9   :  { %v275_v19 = vmax.f32 %v211_v13, 0.0  ;;  %v276_v20 = vmax.f32 %v212_v14, 0.0  ;;  %v227_v21 = vadd.f32 %v1211_v6, %v161_v15  ;;  %v228_v22 = vadd.f32 %v1211_v6, %v162_v16 }
   0xa   :  { %v1079_v42 = vunpack.c.l.bf16 %v1156_v38  ;;  %v1080_v43 = vunpack.c.h.bf16 %v1156_v38  ;;  %v293_v44 = vmax.f32 %v229_v36, 0.0  ;;  %v294_v45 = vmax.f32 %v230_v37, 0.0  ;;  %v1158_v38 = vld [vmem:[%s1793_s0 + $0x90] sm:$0xff]  }
   0xb   :  { %v339_v24 = vpack.c.bf16 %v276_v20, %v275_v19  ;;  %v291_v25 = vmax.f32 %v227_v21, 0.0  ;;  %v292_v26 = vmax.f32 %v228_v22, 0.0  ;;  %v340_v49 = vpack.c.bf16 %v278_v40, %v277_v39  ;;  %v1151_v22 = vld [vmem:[%s1793_s0 + $0x58] sm:$0xff]   ;;  %v1164_v39 = vld [vmem:[%s1793_s0 + $0xc0] sm:$0xff]  }
   0xc   :  { %v177_v46 = vmul.f32 %v1206_v5, %v1079_v42  ;;  %v178_v47 = vmul.f32 %v1206_v5, %v1080_v43  ;;  %v348_v53 = vpack.c.bf16 %v294_v45, %v293_v44  ;;  %v1056_v58 = vunpack.c.h.bf16 %v1150_v54  ;;  %v1144_v40 = vld [vmem:[%s1793_s0 + $0x20] sm:$0xff]  }
   0xd   :  { %981 = vmatmul.msk.bf16.vlgmr.msra.gmra.mxu0 %vm372_vm1, %v339_v24  ;;  %v347_v31 = vpack.c.bf16 %v292_v26, %v291_v25  ;;  %v149_v59 = vmul.f32 %v1206_v5, %v1023_v48  ;;  %v150_v60 = vmul.f32 %v1206_v5, %v1024_v50  ;;  %v165_v62 = vmul.f32 %v1206_v5, %v1055_v57 }
   0xe   :  { %v243_v51 = vadd.f32 %v1211_v6, %v177_v46  ;;  %v244_v52 = vadd.f32 %v1211_v6, %v178_v47  ;;  %v166_v63 = vmul.f32 %v1206_v5, %v1056_v58  ;;  %v1083_v10 = vunpack.c.l.bf16 %v1157_v4 }
   0xf   :  { %989 = vmatmul.msk.bf16.vlgmr.msra.gmra.mxu1 %vm372_vm1, %v347_v31  ;;  %v215_v0 = vadd.f32 %v1211_v6, %v149_v59  ;;  %v216_v1 = vadd.f32 %v1211_v6, %v150_v60  ;;  %v231_v2 = vadd.f32 %v1211_v6, %v165_v62  ;;  %v1084_v11 = vunpack.c.h.bf16 %v1157_v4  ;;  %v1152_v59 = vld [vmem:[%s1793_s0 + $0x60] sm:$0xff]  }
  0x10   :  { %v307_v55 = vmax.f32 %v243_v51, 0.0  ;;  %v308_v56 = vmax.f32 %v244_v52, 0.0  ;;  %v232_v3 = vadd.f32 %v1211_v6, %v166_v63  ;;  %v179_v14 = vmul.f32 %v1206_v5, %v1083_v10 }
  0x11   :  { %v279_v7 = vmax.f32 %v215_v0, 0.0  ;;  %v280_v8 = vmax.f32 %v216_v1, 0.0  ;;  %v295_v12 = vmax.f32 %v231_v2, 0.0  ;;  %v180_v15 = vmul.f32 %v1206_v5, %v1084_v11 }
  0x12   :  { %v355_v61 = vpack.c.bf16 %v308_v56, %v307_v55  ;;  %v296_v13 = vmax.f32 %v232_v3, 0.0  ;;  %v1027_v16 = vunpack.c.l.bf16 %v1143_v9  ;;  %v1028_v17 = vunpack.c.h.bf16 %v1143_v9 }
  0x13   :  { %v341_v18 = vpack.c.bf16 %v280_v8, %v279_v7  ;;  %v245_v19 = vadd.f32 %v1211_v6, %v179_v14  ;;  %v246_v20 = vadd.f32 %v1211_v6, %v180_v15  ;;  %v1059_v25 = vunpack.c.l.bf16 %v1151_v22 }
  0x14   :  { %997 = vmatmul.msk.bf16.vlgmr.msra.gmra.mxu2 %vm372_vm1, %v355_v61  ;;  %v349_v21 = vpack.c.bf16 %v296_v13, %v295_v12  ;;  %v1060_v26 = vunpack.c.h.bf16 %v1151_v22  ;;  %v151_v27 = vmul.f32 %v1206_v5, %v1027_v16  ;;  %v152_v28 = vmul.f32 %v1206_v5, %v1028_v17  ;;  %v1159_v16 = vld [vmem:[%s1793_s0 + $0x98] sm:$0xff]   ;;  %v1165_v17 = vld [vmem:[%s1793_s0 + $0xc8] sm:$0xff]  }
  0x15   :  { %v309_v23 = vmax.f32 %v245_v19, 0.0  ;;  %v310_v24 = vmax.f32 %v246_v20, 0.0  ;;  %v167_v30 = vmul.f32 %v1206_v5, %v1059_v25  ;;  %v1087_v41 = vunpack.c.l.bf16 %v1158_v38 }
  0x16   :  { %v168_v31 = vmul.f32 %v1206_v5, %v1060_v26  ;;  %v217_v32 = vadd.f32 %v1211_v6, %v151_v27  ;;  %v218_v33 = vadd.f32 %v1211_v6, %v152_v28  ;;  %v1088_v42 = vunpack.c.h.bf16 %v1158_v38 }
  0x17   :  { %v356_v29 = vpack.c.bf16 %v310_v24, %v309_v23  ;;  %v233_v34 = vadd.f32 %v1211_v6, %v167_v30  ;;  %v1111_v43 = vunpack.c.l.bf16 %v1164_v39  ;;  %v1112_v44 = vunpack.c.h.bf16 %v1164_v39 }
  0x18   :  { %v234_v35 = vadd.f32 %v1211_v6, %v168_v31  ;;  %v281_v36 = vmax.f32 %v217_v32, 0.0  ;;  %v282_v37 = vmax.f32 %v218_v33, 0.0  ;;  %v181_v47 = vmul.f32 %v1206_v5, %v1087_v41 }
  0x19   :  { %v297_v45 = vmax.f32 %v233_v34, 0.0  ;;  %v182_v48 = vmul.f32 %v1206_v5, %v1088_v42  ;;  %v194_v50 = vmul.f32 %v1206_v5, %v1112_v44  ;;  %v1031_v52 = vunpack.c.l.bf16 %v1144_v40 }
  0x1a   :  { %v298_v46 = vmax.f32 %v234_v35, 0.0  ;;  %v342_v51 = vpack.c.bf16 %v282_v37, %v281_v36  ;;  %v247_v54 = vadd.f32 %v1211_v6, %v181_v47  ;;  %v1063_v2 = vunpack.c.l.bf16 %v1152_v59  ;;  %v1153_v37 = vld [vmem:[%s1793_s0 + $0x68] sm:$0xff]  }
  0x1b   :  { %v248_v55 = vadd.f32 %v1211_v6, %v182_v48  ;;  %v260_v57 = vadd.f32 %v1211_v6, %v194_v50  ;;  %v153_v0 = vmul.f32 %v1206_v5, %v1031_v52  ;;  %v1064_v3 = vunpack.c.h.bf16 %v1152_v59 }
  0x1c   :  { %v350_v58 = vpack.c.bf16 %v298_v46, %v297_v45  ;;  %v311_v60 = vmax.f32 %v247_v54, 0.0  ;;  %v169_v8 = vmul.f32 %v1206_v5, %v1063_v2  ;;  %v1091_v19 = vunpack.c.l.bf16 %v1159_v16 }
  0x1d   :  { %982 = vmatmul.msk.bf16.gmra.mxu0 %vm372_vm1, %v340_v49  ;;  %v193_v49 = vmul.f32 %v1206_v5, %v1111_v43  ;;  %v312_v61 = vmax.f32 %v248_v55, 0.0  ;;  %v324_v63 = vmax.f32 %v260_v57, 0.0  ;;  %v170_v9 = vmul.f32 %v1206_v5, %v1064_v3  ;;  %v1166_v57 = vld [vmem:[%s1793_s0 + $0xd0] sm:$0xff]  }
  0x1e   :  { %v219_v10 = vadd.f32 %v1211_v6, %v153_v0  ;;  %v235_v12 = vadd.f32 %v1211_v6, %v169_v8  ;;  %v1092_v20 = vunpack.c.h.bf16 %v1159_v16  ;;  %v1116_v22 = vunpack.c.h.bf16 %v1165_v17 }
  0x1f   :  { %990 = vmatmul.msk.bf16.gmra.mxu1 %vm372_vm1, %v348_v53  ;;  %v1032_v53 = vunpack.c.h.bf16 %v1144_v40  ;;  %v259_v56 = vadd.f32 %v1211_v6, %v193_v49  ;;  %v357_v4 = vpack.c.bf16 %v312_v61, %v311_v60  ;;  %v236_v13 = vadd.f32 %v1211_v6, %v170_v9 }
  0x20   :  { %v283_v14 = vmax.f32 %v219_v10, 0.0  ;;  %v299_v23 = vmax.f32 %v235_v12, 0.0  ;;  %v183_v25 = vmul.f32 %v1206_v5, %v1091_v19  ;;  %v184_v26 = vmul.f32 %v1206_v5, %v1092_v20 }
  0x21   :  { %v323_v62 = vmax.f32 %v259_v56, 0.0  ;;  %v154_v1 = vmul.f32 %v1206_v5, %v1032_v53  ;;  %v300_v24 = vmax.f32 %v236_v13, 0.0  ;;  %v196_v28 = vmul.f32 %v1206_v5, %v1116_v22  ;;  %v1160_v56 = vld [vmem:[%s1793_s0 + $0xa0] sm:$0xff]  }
  0x22   :  { %v249_v32 = vadd.f32 %v1211_v6, %v183_v25  ;;  %v250_v33 = vadd.f32 %v1211_v6, %v184_v26  ;;  %v1067_v44 = vunpack.c.l.bf16 %v1153_v37  ;;  %v1068_v45 = vunpack.c.h.bf16 %v1153_v37 }
  0x23   :  { %v363_v7 = vpack.c.bf16 %v324_v63, %v323_v62  ;;  %v220_v11 = vadd.f32 %v1211_v6, %v154_v1  ;;  %v262_v35 = vadd.f32 %v1211_v6, %v196_v28  ;;  %v351_v36 = vpack.c.bf16 %v300_v24, %v299_v23 }
  0x24   :  { %998 = vmatmul.msk.bf16.gmra.mxu2 %vm372_vm1, %v356_v29  ;;  %v313_v38 = vmax.f32 %v249_v32, 0.0  ;;  %v314_v39 = vmax.f32 %v250_v33, 0.0  ;;  %v171_v48 = vmul.f32 %v1206_v5, %v1067_v44  ;;  %v172_v49 = vmul.f32 %v1206_v5, %v1068_v45 }
  0x25   :  { %1005 = vmatmul.msk.bf16.vlgmr.msra.gmra.mxu3 %vm372_vm1, %v363_v7  ;;  %v284_v15 = vmax.f32 %v220_v11, 0.0  ;;  %v326_v41 = vmax.f32 %v262_v35, 0.0  ;;  %v1095_v59 = vunpack.c.l.bf16 %v1160_v56  ;;  %v1096_v60 = vunpack.c.h.bf16 %v1160_v56  ;;  %v1167_v35 = vld [vmem:[%s1793_s0 + $0xd8] sm:$0xff]  }
  0x26   :  { %v358_v46 = vpack.c.bf16 %v314_v39, %v313_v38  ;;  %v237_v52 = vadd.f32 %v1211_v6, %v171_v48  ;;  %v238_v53 = vadd.f32 %v1211_v6, %v172_v49  ;;  %v1119_v61 = vunpack.c.l.bf16 %v1166_v57 }
  0x27   :  { %v343_v29 = vpack.c.bf16 %v284_v15, %v283_v14  ;;  %v1120_v62 = vunpack.c.h.bf16 %v1166_v57  ;;  %v185_v1 = vmul.f32 %v1206_v5, %v1095_v59  ;;  %v186_v2 = vmul.f32 %v1206_v5, %v1096_v60  ;;  %v1154_v15 = vld [vmem:[%s1793_s0 + $0x70] sm:$0xff]  }
  0x28   :  { %v301_v63 = vmax.f32 %v237_v52, 0.0  ;;  %v302_v0 = vmax.f32 %v238_v53, 0.0  ;;  %v197_v3 = vmul.f32 %v1206_v5, %v1119_v61  ;;  %v1071_v22 = vunpack.c.l.bf16 %v1154_v15 }
  0x29   :  { %v251_v10 = vadd.f32 %v1211_v6, %v185_v1  ;;  %v252_v11 = vadd.f32 %v1211_v6, %v186_v2  ;;  %v1072_v23 = vunpack.c.h.bf16 %v1154_v15  ;;  %v1123_v39 = vunpack.c.l.bf16 %v1167_v35 }
  0x2a   :  { %v263_v12 = vadd.f32 %v1211_v6, %v197_v3  ;;  %v352_v14 = vpack.c.bf16 %v302_v0, %v301_v63  ;;  %v173_v26 = vmul.f32 %v1206_v5, %v1071_v22 }
  0x2b   :  { %v315_v16 = vmax.f32 %v251_v10, 0.0  ;;  %v199_v45 = vmul.f32 %v1206_v5, %v1123_v39 }
  0x2d   :  { %983 = vmatmul.msk.bf16.gmra.mxu0 %vm372_vm1, %v341_v18  ;;  %v1145_v18 = vld [vmem:[%s1793_s0 + $0x28] sm:$0xff]   ;;  %v265_v52 = vadd.f32 %v1211_v6, %v199_v45 }
  0x2e   :  { %v1035_v30 = vunpack.c.l.bf16 %v1145_v18  ;;  %v1036_v31 = vunpack.c.h.bf16 %v1145_v18  ;;  %v327_v18 = vmax.f32 %v263_v12, 0.0  ;;  %v1162_v12 = vld [vmem:[%s1793_s0 + $0xb0] sm:$0xff]  }
  0x2f   :  { %991 = vmatmul.msk.bf16.gmra.mxu1 %vm372_vm1, %v349_v21  ;;  %v1115_v21 = vunpack.c.l.bf16 %v1165_v17  ;;  %v316_v17 = vmax.f32 %v252_v11, 0.0  ;;  %v1104_v15 = vunpack.c.h.bf16 %v1162_v12 }
  0x30   :  { %v155_v42 = vmul.f32 %v1206_v5, %v1035_v30  ;;  %v156_v43 = vmul.f32 %v1206_v5, %v1036_v31  ;;  %v239_v30 = vadd.f32 %v1211_v6, %v173_v26 }
  0x31   :  { %v195_v27 = vmul.f32 %v1206_v5, %v1115_v21  ;;  %v359_v24 = vpack.c.bf16 %v316_v17, %v315_v16 }
  0x32   :  { %v221_v50 = vadd.f32 %v1211_v6, %v155_v42 }
  0x33   :  { %v261_v34 = vadd.f32 %v1211_v6, %v195_v27  ;;  %v174_v27 = vmul.f32 %v1206_v5, %v1072_v23 }
  0x34   :  { %999 = vmatmul.msk.bf16.gmra.mxu2 %vm372_vm1, %v357_v4  ;;  %v285_v54 = vmax.f32 %v221_v50, 0.0  ;;  %v198_v4 = vmul.f32 %v1206_v5, %v1120_v62 }
  0x35   :  { %v325_v40 = vmax.f32 %v261_v34, 0.0  ;;  %v240_v31 = vadd.f32 %v1211_v6, %v174_v27  ;;  %v1161_v34 = vld [vmem:[%s1793_s0 + $0xa8] sm:$0xff]  }
  0x36   :  { %v264_v13 = vadd.f32 %v1211_v6, %v198_v4  ;;  %v1099_v37 = vunpack.c.l.bf16 %v1161_v34  ;;  %v1100_v38 = vunpack.c.h.bf16 %v1161_v34 }
  0x37   :  { %v364_v47 = vpack.c.bf16 %v326_v41, %v325_v40  ;;  %v1124_v40 = vunpack.c.h.bf16 %v1167_v35  ;;  %v303_v41 = vmax.f32 %v239_v30, 0.0  ;;  %v304_v42 = vmax.f32 %v240_v31, 0.0 }
  0x38   :  { %v328_v19 = vmax.f32 %v264_v13, 0.0  ;;  %v188_v44 = vmul.f32 %v1206_v5, %v1100_v38  ;;  %v1168_v13 = vld [vmem:[%s1793_s0 + $0xe0] sm:$0xff]  }
  0x39   :  { %1006 = vmatmul.msk.bf16.gmra.mxu3 %vm372_vm1, %v364_v47  ;;  %v1127_v16 = vunpack.c.l.bf16 %v1168_v13  ;;  %v1128_v17 = vunpack.c.h.bf16 %v1168_v13 }
  0x3a   :  { %v365_v25 = vpack.c.bf16 %v328_v19, %v327_v18 }
  0x3b   :  { %v201_v22 = vmul.f32 %v1206_v5, %v1127_v16  ;;  %v202_v23 = vmul.f32 %v1206_v5, %v1128_v17 }
  0x3d   :  { %984 = vmatmul.msk.bf16.gmra.mxu0 %vm372_vm1, %v342_v51  ;;  %v222_v51 = vadd.f32 %v1211_v6, %v156_v43  ;;  %v187_v43 = vmul.f32 %v1206_v5, %v1099_v37  ;;  %v267_v27 = vadd.f32 %v1211_v6, %v201_v22  ;;  %v1169_v37 = vld [vmem:[%s1793_s0 + $0xe8] sm:$0xff]  }
  0x3f   :  { %992 = vmatmul.msk.bf16.gmra.mxu1 %vm372_vm1, %v350_v58  ;;  %v286_v55 = vmax.f32 %v222_v51, 0.0  ;;  %v1146_v58 = vld [vmem:[%s1793_s0 + $0x30] sm:$0xff]   ;;  %v253_v50 = vadd.f32 %v1211_v6, %v187_v43  ;;  %v254_v51 = vadd.f32 %v1211_v6, %v188_v44 }
  0x40   :  { %v1039_v8 = vunpack.c.l.bf16 %v1146_v58  ;;  %v1040_v9 = vunpack.c.h.bf16 %v1146_v58  ;;  %v329_v58 = vmax.f32 %v265_v52, 0.0 }
  0x41   :  { %v344_v7 = vpack.c.bf16 %v286_v55, %v285_v54  ;;  %v353_v54 = vpack.c.bf16 %v304_v42, %v303_v41  ;;  %v1155_v55 = vld [vmem:[%s1793_s0 + $0x78] sm:$0xff]   ;;  %v317_v56 = vmax.f32 %v253_v50, 0.0  ;;  %v318_v57 = vmax.f32 %v254_v51, 0.0 }
  0x42   :  { %v157_v20 = vmul.f32 %v1206_v5, %v1039_v8  ;;  %v158_v21 = vmul.f32 %v1206_v5, %v1040_v9  ;;  %v1075_v62 = vunpack.c.l.bf16 %v1155_v55  ;;  %v1076_v63 = vunpack.c.h.bf16 %v1155_v55 }
  0x43   :  { %v360_v0 = vpack.c.bf16 %v318_v57, %v317_v56  ;;  %v1132_v41 = vunpack.c.h.bf16 %v1169_v37 }
  0x44   :  { %1000 = vmatmul.msk.bf16.gmra.mxu2 %vm372_vm1, %v358_v46  ;;  %v223_v28 = vadd.f32 %v1211_v6, %v157_v20  ;;  %v200_v46 = vmul.f32 %v1206_v5, %v1124_v40  ;;  %v175_v2 = vmul.f32 %v1206_v5, %v1075_v62  ;;  %v176_v3 = vmul.f32 %v1206_v5, %v1076_v63 }
  0x45   :  { %v1131_v40 = vunpack.c.l.bf16 %v1169_v37  ;;  %v204_v45 = vmul.f32 %v1206_v5, %v1132_v41 }
  0x46   :  { %v287_v32 = vmax.f32 %v223_v28, 0.0  ;;  %v266_v53 = vadd.f32 %v1211_v6, %v200_v46  ;;  %v241_v8 = vadd.f32 %v1211_v6, %v175_v2  ;;  %v242_v9 = vadd.f32 %v1211_v6, %v176_v3 }
  0x47   :  { %v268_v28 = vadd.f32 %v1211_v6, %v202_v23  ;;  %v203_v44 = vmul.f32 %v1206_v5, %v1131_v40 }
  0x48   :  { %v330_v59 = vmax.f32 %v266_v53, 0.0  ;;  %v305_v18 = vmax.f32 %v241_v8, 0.0  ;;  %v306_v19 = vmax.f32 %v242_v9, 0.0 }
  0x49   :  { %1007 = vmatmul.msk.bf16.gmra.mxu3 %vm372_vm1, %v365_v25 }
  0x4a   :  { %v366_v1 = vpack.c.bf16 %v330_v59, %v329_v58 }
  0x4d   :  { %985 = vmatmul.msk.bf16.gmra.mxu0 %vm372_vm1, %v343_v29  ;;  %v224_v29 = vadd.f32 %v1211_v6, %v158_v21  ;;  %v190_v21 = vmul.f32 %v1206_v5, %v1104_v15 }
  0x4f   :  { %993 = vmatmul.msk.bf16.gmra.mxu1 %vm372_vm1, %v351_v36  ;;  %v288_v33 = vmax.f32 %v224_v29, 0.0  ;;  %v1147_v36 = vld [vmem:[%s1793_s0 + $0x38] sm:$0xff]   ;;  %v256_v26 = vadd.f32 %v1211_v6, %v190_v21  ;;  %v354_v29 = vpack.c.bf16 %v306_v19, %v305_v18 }
  0x50   :  { %v1043_v48 = vunpack.c.l.bf16 %v1147_v36  ;;  %v1044_v49 = vunpack.c.h.bf16 %v1147_v36  ;;  %v1163_v36 = vld [vmem:[%s1793_s0 + $0xb8] sm:$0xff]  }
  0x51   :  { %v345_v47 = vpack.c.bf16 %v288_v33, %v287_v32  ;;  %v320_v31 = vmax.f32 %v256_v26, 0.0  ;;  %v331_v32 = vmax.f32 %v267_v27, 0.0  ;;  %v332_v33 = vmax.f32 %v268_v28, 0.0  ;;  %v1171_v27 = vld [vmem:[%s1793_s0 + $0xf8] sm:$0xff]  }
  0x52   :  { %v159_v60 = vmul.f32 %v1206_v5, %v1043_v48  ;;  %v160_v61 = vmul.f32 %v1206_v5, %v1044_v49  ;;  %v1107_v38 = vunpack.c.l.bf16 %v1163_v36  ;;  %v1108_v39 = vunpack.c.h.bf16 %v1163_v36 }
  0x53   :  { %v367_v35 = vpack.c.bf16 %v332_v33, %v331_v32  ;;  %v269_v48 = vadd.f32 %v1211_v6, %v203_v44  ;;  %v270_v49 = vadd.f32 %v1211_v6, %v204_v45  ;;  %v1140_v32 = vunpack.c.h.bf16 %v1171_v27 }
  0x54   :  { %1001 = vmatmul.msk.bf16.gmra.mxu2 %vm372_vm1, %v359_v24  ;;  %v225_v4 = vadd.f32 %v1211_v6, %v159_v60  ;;  %v191_v42 = vmul.f32 %v1206_v5, %v1107_v38  ;;  %v192_v43 = vmul.f32 %v1206_v5, %v1108_v39 }
  0x55   :  { %v334_v55 = vmax.f32 %v270_v49, 0.0 }
  0x56   :  { %v289_v10 = vmax.f32 %v225_v4, 0.0  ;;  %v257_v46 = vadd.f32 %v1211_v6, %v191_v42 }
  0x58   :  { %v321_v51 = vmax.f32 %v257_v46, 0.0 }
  0x59   :  { %1008 = vmatmul.msk.bf16.gmra.mxu3 %vm372_vm1, %v366_v1  ;;  %v1170_v1 = vld [vmem:[%s1793_s0 + $0xf0] sm:$0xff]  }
  0x5a   :  { %v1135_v4 = vunpack.c.l.bf16 %v1170_v1  ;;  %v1136_v8 = vunpack.c.h.bf16 %v1170_v1 }
  0x5c   :  { %v205_v9 = vmul.f32 %v1206_v5, %v1135_v4 }
  0x5d   :  { %986 = vmatmul.msk.bf16.gmra.mxu0 %vm372_vm1, %v344_v7  ;;  %v226_v7 = vadd.f32 %v1211_v6, %v160_v61 }
  0x5f   :  { %994 = vmatmul.msk.bf16.gmra.mxu1 %vm372_vm1, %v352_v14  ;;  %v290_v11 = vmax.f32 %v226_v7, 0.0  ;;  %v1103_v14 = vunpack.c.l.bf16 %v1162_v12 }
  0x61   :  { %v189_v20 = vmul.f32 %v1206_v5, %v1103_v14  ;;  %v346_v24 = vpack.c.bf16 %v290_v11, %v289_v10  ;;  %v206_v10 = vmul.f32 %v1206_v5, %v1136_v8  ;;  %v271_v11 = vadd.f32 %v1211_v6, %v205_v9 }
  0x63   :  { %v255_v25 = vadd.f32 %v1211_v6, %v189_v20  ;;  %v272_v13 = vadd.f32 %v1211_v6, %v206_v10  ;;  %v335_v16 = vmax.f32 %v271_v11, 0.0 }
  0x64   :  { %1002 = vmatmul.msk.bf16.gmra.mxu2 %vm372_vm1, %v360_v0 }
  0x65   :  { %v319_v30 = vmax.f32 %v255_v25, 0.0  ;;  %v336_v19 = vmax.f32 %v272_v13, 0.0 }
  0x67   :  { %v361_v34 = vpack.c.bf16 %v320_v31, %v319_v30  ;;  %v369_v22 = vpack.c.bf16 %v336_v19, %v335_v16 }
  0x69   :  { %1009 = vmatmul.msk.bf16.gmra.mxu3 %vm372_vm1, %v367_v35  ;;  %v208_v35 = vmul.f32 %v1206_v5, %v1140_v32 }
  0x6b   :  { %v274_v38 = vadd.f32 %v1211_v6, %v208_v35 }
  0x6d   :  { %987 = vmatmul.msk.bf16.gmra.mxu0 %vm372_vm1, %v345_v47  ;;  %v258_v47 = vadd.f32 %v1211_v6, %v192_v43  ;;  %v338_v43 = vmax.f32 %v274_v38, 0.0 }
  0x6f   :  { %995 = vmatmul.msk.bf16.gmra.mxu1 %vm372_vm1, %v353_v54  ;;  %v322_v52 = vmax.f32 %v258_v47, 0.0  ;;  %v333_v54 = vmax.f32 %v269_v48, 0.0 }
  0x71   :  { %v362_v56 = vpack.c.bf16 %v322_v52, %v321_v51  ;;  %v368_v57 = vpack.c.bf16 %v334_v55, %v333_v54 }
  0x74   :  { %1003 = vmatmul.msk.bf16.gmra.mxu2 %vm372_vm1, %v361_v34 }
  0x79   :  { %1010 = vmatmul.msk.bf16.gmra.mxu3 %vm372_vm1, %v368_v57 }
  0x7d   :  { %988 = vmatmul.msk.bf16.gmra.mxu0 %vm372_vm1, %v346_v24 }
  0x7f   :  { %996 = vmatmul.msk.bf16.gmra.mxu1 %vm372_vm1, %v354_v29  ;;  %v1139_v29 = vunpack.c.l.bf16 %v1171_v27 }
  0x81   :  { %v207_v33 = vmul.f32 %v1206_v5, %v1139_v29 }
  0x83   :  { %v273_v36 = vadd.f32 %v1211_v6, %v207_v33 }
  0x84   :  { %1004 = vmatmul.msk.bf16.gmra.mxu2 %vm372_vm1, %v362_v56 }
  0x85   :  { %v337_v42 = vmax.f32 %v273_v36, 0.0 }
  0x87   :  { %v370_v46 = vpack.c.bf16 %v338_v43, %v337_v42 }
  0x89   :  { %1011 = vmatmul.msk.bf16.gmra.mxu3 %vm372_vm1, %v369_v22 }
  0x8a   :  { %v482_v50 = vpop.f32.mrf.mxu0 }
  0x8b   :  { %v776_v58 = vmul.f32 %v482_v50, %v482_v50  ;;  %v643_v60 = vsel %vm642_vm2, %v482_v50, 0.0 }
  0x8c   :  { %v1448_v53 = vpop.f32.mrf.mxu1 }
  0x8d   :  { %v840_v2 = vsel %vm642_vm2, %v776_v58, 0.0 }
  0x92   :  { %v484_v59 = vpop.f32.mrf.mxu0 }
  0x93   :  { %v644_v61 = vsel %vm642_vm2, %v484_v59, 0.0  ;;  %v777_v62 = vmul.f32 %v484_v59, %v484_v59 }
  0x94   :  { %v645_v63 = vadd.f32 %v644_v61, %v643_v60  ;;  %v1454_v0 = vpop.f32.mrf.mxu1 }
  0x95   :  { %v841_v3 = vsel %vm642_vm2, %v777_v62, 0.0 }
  0x96   :  { %v842_v7 = vadd.f32 %v841_v3, %v840_v2 }
  0x97   :  { %v1478_v34 = vpop.f32.mrf.mxu2 }
  0x99   :  { %1012 = vmatmul.msk.bf16.gmra.mxu3 %vm372_vm1, %v370_v46 }
  0x9a   :  { %v487_v12 = vpop.f32.mrf.mxu0 }
  0x9b   :  { %v646_v14 = vsel %vm642_vm2, %v487_v12, 0.0  ;;  %v778_v15 = vmul.f32 %v487_v12, %v487_v12 }
  0x9c   :  { %v647_v17 = vadd.f32 %v646_v14, %v645_v63  ;;  %v1466_v18 = vpop.f32.mrf.mxu1 }
  0x9d   :  { %v843_v20 = vsel %vm642_vm2, %v778_v15, 0.0 }
  0x9e   :  { %v844_v21 = vadd.f32 %v843_v20, %v842_v7 }
  0x9f   :  { %v1488_v48 = vpop.f32.mrf.mxu2 }
  0xa2   :  { %v489_v23 = vpop.f32.mrf.mxu0 }
  0xa3   :  { %v648_v24 = vsel %vm642_vm2, %v489_v23, 0.0  ;;  %v779_v25 = vmul.f32 %v489_v23, %v489_v23 }
  0xa4   :  { %v649_v26 = vadd.f32 %v648_v24, %v647_v17  ;;  %v1475_v31 = vpop.f32.mrf.mxu1 }
  0xa5   :  { %v845_v28 = vsel %vm642_vm2, %v779_v25, 0.0 }
  0xa6   :  { %v846_v30 = vadd.f32 %v845_v28, %v844_v21 }
  0xa7   :  { %v1492_v6 = vpop.f32.mrf.mxu2 }
  0xa8   :  { %v1498_v55 = vpop.f32.mrf.mxu3 }
  0xaa   :  { %v492_v37 = vpop.f32.mrf.mxu0 }
  0xab   :  { %v650_v39 = vsel %vm642_vm2, %v492_v37, 0.0  ;;  %v780_v40 = vmul.f32 %v492_v37, %v492_v37 }
  0xac   :  { %v651_v41 = vadd.f32 %v650_v39, %v649_v26  ;;  %v1485_v47 = vpop.f32.mrf.mxu1 }
  0xad   :  { %v847_v44 = vsel %vm642_vm2, %v780_v40, 0.0 }
  0xae   :  { %v848_v45 = vadd.f32 %v847_v44, %v846_v30 }
  0xaf   :  { %v1496_v54 = vpop.f32.mrf.mxu2 }
  0xb0   :  { %v1504_v60 = vpop.f32.mrf.mxu3 }
  0xb2   :  { %v494_v5 = vpop.f32.mrf.mxu0 }
  0xb3   :  { %v781_v9 = vmul.f32 %v494_v5, %v494_v5  ;;  %v652_v11 = vsel %vm642_vm2, %v494_v5, 0.0 }
  0xb4   :  { %v1490_v50 = vpop.f32.mrf.mxu1  ;;  %v653_v17 = vadd.f32 %v652_v11, %v651_v41 }
  0xb5   :  { %v849_v14 = vsel %vm642_vm2, %v781_v9, 0.0 }
  0xb6   :  { %v850_v23 = vadd.f32 %v849_v14, %v848_v45 }
  0xb7   :  { %v1502_v58 = vpop.f32.mrf.mxu2 }
  0xba   :  { %v497_v49 = vpop.f32.mrf.mxu0 }
  0xbb   :  { %v782_v12 = vmul.f32 %v497_v49, %v497_v49  ;;  %v654_v15 = vsel %vm642_vm2, %v497_v49, 0.0 }
  0xbc   :  { %v1494_v52 = vpop.f32.mrf.mxu1  ;;  %v1510_v1 = vpop.f32.mrf.mxu3  ;;  %v655_v24 = vadd.f32 %v654_v15, %v653_v17 }
  0xbd   :  { %v851_v20 = vsel %vm642_vm2, %v782_v12, 0.0 }
  0xbe   :  { %v852_v29 = vadd.f32 %v851_v20, %v850_v23 }
  0xbf   :  { %v1508_v63 = vpop.f32.mrf.mxu2 }
  0xc2   :  { %v499_v51 = vpop.f32.mrf.mxu0 }
  0xc3   :  { %v783_v16 = vmul.f32 %v499_v51, %v499_v51  ;;  %v656_v21 = vsel %vm642_vm2, %v499_v51, 0.0 }
  0xc4   :  { %v1500_v57 = vpop.f32.mrf.mxu1  ;;  %v1516_v7 = vpop.f32.mrf.mxu3  ;;  %v657_v30 = vadd.f32 %v656_v21, %v655_v24 }
  0xc5   :  { %v853_v26 = vsel %vm642_vm2, %v783_v16, 0.0 }
  0xc6   :  { %v854_v36 = vadd.f32 %v853_v26, %v852_v29 }
  0xc7   :  { %v1514_v4 = vpop.f32.mrf.mxu2 }
  0xca   :  { %v502_v56 = vpop.f32.mrf.mxu0 }
  0xcb   :  { %v784_v22 = vmul.f32 %v502_v56, %v502_v56  ;;  %v658_v27 = vsel %vm642_vm2, %v502_v56, 0.0 }
  0xcc   :  { %v1506_v61 = vpop.f32.mrf.mxu1  ;;  %v1525_v19 = vpop.f32.mrf.mxu3  ;;  %v659_v37 = vadd.f32 %v658_v27, %v657_v30 }
  0xcd   :  { %v855_v32 = vsel %vm642_vm2, %v784_v22, 0.0 }
  0xce   :  { %v856_v42 = vadd.f32 %v855_v32, %v854_v36 }
  0xcf   :  { %v1521_v13 = vpop.f32.mrf.mxu2 }
  0xd2   :  { %v504_v59 = vpop.f32.mrf.mxu0 }
  0xd3   :  { %v785_v28 = vmul.f32 %v504_v59, %v504_v59  ;;  %v660_v33 = vsel %vm642_vm2, %v504_v59, 0.0 }
  0xd4   :  { %v1512_v3 = vpop.f32.mrf.mxu1  ;;  %v661_v43 = vadd.f32 %v660_v33, %v659_v37  ;;  %v1541_v59 = vpop.f32.mrf.mxu3 }
  0xd5   :  { %v857_v39 = vsel %vm642_vm2, %v785_v28, 0.0 }
  0xd6   :  { %v858_v49 = vadd.f32 %v857_v39, %v856_v42  ;;  %v674_v39 = vsel %vm642_vm2, %v1448_v53, 0.0 }
  0xd7   :  { %v1537_v44 = vpop.f32.mrf.mxu2 }
  0xda   :  { %v507_v62 = vpop.f32.mrf.mxu0 }
  0xdb   :  { %v786_v35 = vmul.f32 %v507_v62, %v507_v62  ;;  %v662_v40 = vsel %vm642_vm2, %v507_v62, 0.0 }
  0xdc   :  { %v1518_v10 = vpop.f32.mrf.mxu1  ;;  %v663_v51 = vadd.f32 %v662_v40, %v661_v43  ;;  %v1557_v37 = vpop.f32.mrf.mxu3  ;;  %v793_v40 = vmul.f32 %v1454_v0, %v1454_v0 }
  0xdd   :  { %v859_v45 = vsel %vm642_vm2, %v786_v35, 0.0 }
  0xde   :  { %v860_v12 = vadd.f32 %v859_v45, %v858_v49 }
  0xdf   :  { %v1552_v30 = vpop.f32.mrf.mxu2 }
  0xe2   :  { %v509_v2 = vpop.f32.mrf.mxu0 }
  0xe3   :  { %v787_v41 = vmul.f32 %v509_v2, %v509_v2  ;;  %v664_v46 = vsel %vm642_vm2, %v509_v2, 0.0 }
  0xe4   :  { %v1533_v38 = vpop.f32.mrf.mxu1  ;;  %v665_v14 = vadd.f32 %v664_v46, %v663_v51  ;;  %v676_v46 = vsel %vm642_vm2, %v1454_v0, 0.0  ;;  %v680_v0 = vsel %vm642_vm2, %v1475_v31, 0.0 }
  0xe5   :  { %v861_v9 = vsel %vm642_vm2, %v787_v41, 0.0 }
  0xe6   :  { %v862_v20 = vadd.f32 %v861_v9, %v860_v12  ;;  %v795_v9 = vmul.f32 %v1475_v31, %v1475_v31 }
  0xea   :  { %v512_v8 = vpop.f32.mrf.mxu0 }
  0xeb   :  { %v788_v5 = vmul.f32 %v512_v8, %v512_v8  ;;  %v666_v11 = vsel %vm642_vm2, %v512_v8, 0.0 }
  0xec   :  { %v667_v2 = vadd.f32 %v666_v11, %v665_v14  ;;  %v1549_v26 = vpop.f32.mrf.mxu1 }
  0xed   :  { %v863_v15 = vsel %vm642_vm2, %v788_v5, 0.0  ;;  %v794_v5 = vmul.f32 %v1466_v18, %v1466_v18 }
  0xee   :  { %v864_v23 = vadd.f32 %v863_v15, %v862_v20  ;;  %v796_v15 = vmul.f32 %v1485_v47, %v1485_v47  ;;  %v1579_v20 = vpop.f32.mrf.mxu2 }
  0xef   :  { %v875_v14 = vsel %vm642_vm2, %v794_v5, 0.0 }
  0xf0   :  { %v879_v31 = vsel %vm642_vm2, %v796_v15, 0.0 }
  0xf2   :  { %v514_v25 = vpop.f32.mrf.mxu0 }
  0xf3   :  { %v789_v62 = vmul.f32 %v514_v25, %v514_v25  ;;  %v668_v16 = vsel %vm642_vm2, %v514_v25, 0.0  ;;  %v792_v25 = vmul.f32 %v1448_v53, %v1448_v53  ;;  %v678_v53 = vsel %vm642_vm2, %v1466_v18, 0.0 }
  0xf4   :  { %v669_v24 = vadd.f32 %v668_v16, %v667_v2  ;;  %v554_v12 = vpop.f32.mrf.mxu1  ;;  %v877_v18 = vsel %vm642_vm2, %v795_v9, 0.0  ;;  %v682_v2 = vsel %vm642_vm2, %v1485_v47, 0.0  ;;  %v686_v47 = vsel %vm642_vm2, %v1494_v52, 0.0 }
  0xf5   :  { %v865_v21 = vsel %vm642_vm2, %v789_v62, 0.0  ;;  %v871_v45 = vsel %vm642_vm2, %v792_v25, 0.0 }
  0xf6   :  { %v866_v27 = vadd.f32 %v865_v21, %v864_v23  ;;  %v797_v21 = vmul.f32 %v1490_v50, %v1490_v50 }
  0xf8   :  { %v881_v25 = vsel %vm642_vm2, %v797_v21, 0.0 }
  0xfa   :  { %v517_v56 = vpop.f32.mrf.mxu0 }
  0xfb   :  { %v790_v17 = vmul.f32 %v517_v56, %v517_v56  ;;  %v670_v22 = vsel %vm642_vm2, %v517_v56, 0.0  ;;  %v873_v56 = vsel %vm642_vm2, %v793_v40, 0.0 }
  0xfc   :  { %v671_v28 = vadd.f32 %v670_v22, %v669_v24  ;;  %v1586_v24 = vpop.f32.mrf.mxu3 }
  0xfd   :  { %v867_v8 = vsel %vm642_vm2, %v790_v17, 0.0 }
  0xfe   :  { %v868_v35 = vadd.f32 %v867_v8, %v866_v27  ;;  %v684_v8 = vsel %vm642_vm2, %v1490_v50, 0.0  ;;  %v798_v27 = vmul.f32 %v1494_v52, %v1494_v52  ;;  %v688_v50 = vsel %vm642_vm2, %v1500_v57, 0.0 }
  0xff   :  { %v690_v52 = vsel %vm642_vm2, %v1506_v61, 0.0 }
 0x102   :  { %v519_v29 = vpop.f32.mrf.mxu0 }
 0x103   :  { %v672_v32 = vsel %vm642_vm2, %v519_v29, 0.0  ;;  %v791_v33 = vmul.f32 %v519_v29, %v519_v29 }
 0x104   :  { %v673_v36 = vadd.f32 %v672_v32, %v671_v28  ;;  %v799_v32 = vmul.f32 %v1500_v57, %v1500_v57 }
 0x105   :  { %v869_v41 = vsel %vm642_vm2, %v791_v33, 0.0 }
 0x106   :  { %v675_v42 = vadd.f32 %v674_v39, %v673_v36  ;;  %v870_v43 = vadd.f32 %v869_v41, %v868_v35  ;;  %v883_v36 = vsel %vm642_vm2, %v798_v27, 0.0  ;;  %v800_v39 = vmul.f32 %v1506_v61, %v1506_v61 }
 0x108   :  { %v677_v49 = vadd.f32 %v676_v46, %v675_v42  ;;  %v872_v51 = vadd.f32 %v871_v45, %v870_v43  ;;  %v557_v42 = vpop.f32.mrf.mxu1  ;;  %v885_v43 = vsel %vm642_vm2, %v799_v32, 0.0  ;;  %v801_v45 = vmul.f32 %v1512_v3, %v1512_v3 }
 0x109   :  { %v887_v57 = vsel %vm642_vm2, %v800_v39, 0.0  ;;  %v808_v39 = vmul.f32 %v1478_v34, %v1478_v34 }
 0x10a   :  { %v679_v11 = vadd.f32 %v678_v53, %v677_v49  ;;  %v874_v62 = vadd.f32 %v873_v56, %v872_v51  ;;  %v1608_v49 = vpop.f32.mrf.mxu2  ;;  %v692_v51 = vsel %vm642_vm2, %v1512_v3, 0.0  ;;  %v802_v56 = vmul.f32 %v1518_v10, %v1518_v10 }
 0x10b   :  { %v889_v61 = vsel %vm642_vm2, %v801_v45, 0.0  ;;  %v696_v3 = vsel %vm642_vm2, %v1533_v38, 0.0 }
 0x10c   :  { %v681_v16 = vadd.f32 %v680_v0, %v679_v11  ;;  %v876_v17 = vadd.f32 %v875_v14, %v874_v62  ;;  %v1615_v11 = vpop.f32.mrf.mxu3  ;;  %v694_v62 = vsel %vm642_vm2, %v1518_v10, 0.0  ;;  %v803_v14 = vmul.f32 %v1533_v38, %v1533_v38 }
 0x10d   :  { %v698_v10 = vsel %vm642_vm2, %v1549_v26, 0.0 }
 0x10e   :  { %v683_v22 = vadd.f32 %v682_v2, %v681_v16  ;;  %v878_v23 = vadd.f32 %v877_v18, %v876_v17  ;;  %v891_v16 = vsel %vm642_vm2, %v802_v56, 0.0  ;;  %v804_v17 = vmul.f32 %v1549_v26, %v1549_v26 }
 0x10f   :  { %v893_v21 = vsel %vm642_vm2, %v803_v14, 0.0  ;;  %v810_v56 = vmul.f32 %v1492_v6, %v1492_v6 }
 0x110   :  { %v685_v28 = vadd.f32 %v684_v8, %v683_v22  ;;  %v880_v29 = vadd.f32 %v879_v31, %v878_v23  ;;  %v805_v22 = vmul.f32 %v554_v12, %v554_v12  ;;  %v559_v8 = vpop.f32.mrf.mxu1  ;;  %v895_v27 = vsel %vm642_vm2, %v804_v17, 0.0 }
 0x112   :  { %v882_v33 = vadd.f32 %v881_v25, %v880_v29  ;;  %v687_v35 = vadd.f32 %v686_v47, %v685_v28  ;;  %v700_v28 = vsel %vm642_vm2, %v554_v12, 0.0  ;;  %v806_v29 = vmul.f32 %v557_v42, %v557_v42  ;;  %v1632_v47 = vpop.f32.mrf.mxu2 }
 0x113   :  { %v897_v32 = vsel %vm642_vm2, %v805_v22, 0.0  ;;  %v704_v12 = vsel %vm642_vm2, %v559_v8, 0.0 }
 0x114   :  { %v689_v40 = vadd.f32 %v688_v50, %v687_v35  ;;  %v884_v41 = vadd.f32 %v883_v36, %v882_v33  ;;  %v702_v33 = vsel %vm642_vm2, %v557_v42, 0.0  ;;  %v807_v35 = vmul.f32 %v559_v8, %v559_v8  ;;  %v1636_v50 = vpop.f32.mrf.mxu3 }
 0x115   :  { %v809_v42 = vmul.f32 %v1488_v48, %v1488_v48  ;;  %v814_v8 = vmul.f32 %v1514_v4, %v1514_v4 }
 0x116   :  { %v691_v46 = vadd.f32 %v690_v52, %v689_v40  ;;  %v886_v5 = vadd.f32 %v885_v43, %v884_v41  ;;  %v899_v40 = vsel %vm642_vm2, %v806_v29, 0.0  ;;  %v706_v52 = vsel %vm642_vm2, %v1478_v34, 0.0 }
 0x117   :  { %v901_v45 = vsel %vm642_vm2, %v807_v35, 0.0  ;;  %v710_v34 = vsel %vm642_vm2, %v1492_v6, 0.0  ;;  %v816_v35 = vmul.f32 %v1537_v44, %v1537_v44 }
 0x118   :  { %v693_v53 = vadd.f32 %v692_v51, %v691_v46  ;;  %v888_v9 = vadd.f32 %v887_v57, %v886_v5  ;;  %v903_v57 = vsel %vm642_vm2, %v808_v39, 0.0  ;;  %v708_v51 = vsel %vm642_vm2, %v1488_v48, 0.0 }
 0x119   :  { %v712_v48 = vsel %vm642_vm2, %v1496_v54, 0.0 }
 0x11a   :  { %v695_v0 = vadd.f32 %v694_v62, %v693_v53  ;;  %v890_v15 = vadd.f32 %v889_v61, %v888_v9  ;;  %v905_v61 = vsel %vm642_vm2, %v809_v42, 0.0  ;;  %v811_v62 = vmul.f32 %v1496_v54, %v1496_v54 }
 0x11b   :  { %v716_v54 = vsel %vm642_vm2, %v1508_v63, 0.0  ;;  %v724_v42 = vsel %vm642_vm2, %v1552_v30, 0.0 }
 0x11c   :  { %v697_v18 = vadd.f32 %v696_v3, %v695_v0  ;;  %v892_v2 = vadd.f32 %v891_v16, %v890_v15  ;;  %v594_v15 = vpop.f32.mrf.mxu2  ;;  %v907_v16 = vsel %vm642_vm2, %v810_v56, 0.0  ;;  %v812_v3 = vmul.f32 %v1502_v58, %v1502_v58 }
 0x11d   :  { %v909_v6 = vsel %vm642_vm2, %v811_v62, 0.0 }
 0x11e   :  { %v699_v23 = vadd.f32 %v698_v10, %v697_v18  ;;  %v894_v31 = vadd.f32 %v893_v21, %v892_v2  ;;  %v1662_v2 = vpop.f32.mrf.mxu3  ;;  %v714_v21 = vsel %vm642_vm2, %v1502_v58, 0.0  ;;  %v813_v10 = vmul.f32 %v1508_v63, %v1508_v63 }
 0x11f   :  { %v718_v58 = vsel %vm642_vm2, %v1514_v4, 0.0  ;;  %v720_v63 = vsel %vm642_vm2, %v1521_v13, 0.0  ;;  %v722_v4 = vsel %vm642_vm2, %v1537_v44, 0.0  ;;  %v726_v44 = vsel %vm642_vm2, %v1579_v20, 0.0 }
 0x120   :  { %v896_v38 = vadd.f32 %v895_v27, %v894_v31  ;;  %v701_v25 = vadd.f32 %v700_v28, %v699_v23  ;;  %v911_v31 = vsel %vm642_vm2, %v812_v3, 0.0  ;;  %v913_v29 = vsel %vm642_vm2, %v813_v10, 0.0 }
 0x122   :  { %v898_v36 = vadd.f32 %v897_v32, %v896_v38  ;;  %v703_v26 = vadd.f32 %v702_v33, %v701_v25  ;;  %v815_v38 = vmul.f32 %v1521_v13, %v1521_v13  ;;  %v915_v33 = vsel %vm642_vm2, %v814_v8, 0.0 }
 0x123   :  { %v919_v13 = vsel %vm642_vm2, %v816_v35, 0.0  ;;  %v824_v8 = vmul.f32 %v1498_v55, %v1498_v55  ;;  %v740_v35 = vsel %vm642_vm2, %v1504_v60, 0.0 }
 0x124   :  { %v900_v41 = vadd.f32 %v899_v40, %v898_v36  ;;  %v705_v43 = vadd.f32 %v704_v12, %v703_v26  ;;  %v597_v39 = vpop.f32.mrf.mxu2  ;;  %v917_v40 = vsel %vm642_vm2, %v815_v38, 0.0  ;;  %v817_v12 = vmul.f32 %v1552_v30, %v1552_v30 }
 0x125   :  { %v728_v30 = vsel %vm642_vm2, %v1608_v49, 0.0  ;;  %v825_v38 = vmul.f32 %v1504_v60, %v1504_v60  ;;  %v744_v60 = vsel %vm642_vm2, %v1516_v7, 0.0 }
 0x126   :  { %v707_v46 = vadd.f32 %v706_v52, %v705_v43  ;;  %v902_v5 = vadd.f32 %v901_v45, %v900_v41  ;;  %v1689_v52 = vpop.f32.mrf.mxu3  ;;  %v818_v45 = vmul.f32 %v1579_v20, %v1579_v20  ;;  %v730_v20 = vsel %vm642_vm2, %v1632_v47, 0.0 }
 0x128   :  { %v709_v53 = vadd.f32 %v708_v51, %v707_v46  ;;  %v904_v9 = vadd.f32 %v903_v57, %v902_v5  ;;  %v921_v57 = vsel %vm642_vm2, %v817_v12, 0.0  ;;  %v819_v51 = vmul.f32 %v1608_v49, %v1608_v49 }
 0x12a   :  { %v711_v14 = vadd.f32 %v710_v34, %v709_v53  ;;  %v906_v0 = vadd.f32 %v905_v61, %v904_v9  ;;  %v923_v9 = vsel %vm642_vm2, %v818_v45, 0.0  ;;  %v820_v61 = vmul.f32 %v1632_v47, %v1632_v47 }
 0x12c   :  { %v713_v17 = vadd.f32 %v712_v48, %v711_v14  ;;  %v908_v18 = vadd.f32 %v907_v16, %v906_v0  ;;  %v925_v14 = vsel %vm642_vm2, %v819_v51, 0.0  ;;  %v821_v0 = vmul.f32 %v594_v15, %v594_v15  ;;  %v599_v3 = vpop.f32.mrf.mxu2 }
 0x12e   :  { %v715_v22 = vadd.f32 %v714_v21, %v713_v17  ;;  %v910_v23 = vadd.f32 %v909_v6, %v908_v18  ;;  %v927_v17 = vsel %vm642_vm2, %v820_v61, 0.0  ;;  %v732_v18 = vsel %vm642_vm2, %v594_v15, 0.0  ;;  %v1711_v10 = vpop.f32.mrf.mxu3 }
 0x12f   :  { %v822_v6 = vmul.f32 %v597_v39, %v597_v39 }
 0x130   :  { %v717_v27 = vadd.f32 %v716_v54, %v715_v22  ;;  %v912_v28 = vadd.f32 %v911_v31, %v910_v23  ;;  %v929_v22 = vsel %vm642_vm2, %v821_v0, 0.0  ;;  %v734_v23 = vsel %vm642_vm2, %v597_v39, 0.0 }
 0x131   :  { %v823_v31 = vmul.f32 %v599_v3, %v599_v3  ;;  %v832_v0 = vmul.f32 %v1615_v11, %v1615_v11 }
 0x132   :  { %v914_v25 = vadd.f32 %v913_v29, %v912_v28  ;;  %v719_v32 = vadd.f32 %v718_v58, %v717_v27  ;;  %v931_v27 = vsel %vm642_vm2, %v822_v6, 0.0  ;;  %v736_v28 = vsel %vm642_vm2, %v599_v3, 0.0 }
 0x133   :  { %v738_v58 = vsel %vm642_vm2, %v1498_v55, 0.0  ;;  %v742_v55 = vsel %vm642_vm2, %v1510_v1, 0.0 }
 0x134   :  { %v721_v36 = vadd.f32 %v720_v63, %v719_v32  ;;  %v916_v26 = vadd.f32 %v915_v33, %v914_v25  ;;  %v933_v25 = vsel %vm642_vm2, %v823_v31, 0.0  ;;  %v935_v63 = vsel %vm642_vm2, %v824_v8, 0.0 }
 0x136   :  { %v723_v41 = vadd.f32 %v722_v4, %v721_v36  ;;  %v918_v43 = vadd.f32 %v917_v40, %v916_v26  ;;  %v826_v36 = vmul.f32 %v1510_v1, %v1510_v1  ;;  %v937_v40 = vsel %vm642_vm2, %v825_v38, 0.0 }
 0x137   :  { %v827_v4 = vmul.f32 %v1516_v7, %v1516_v7  ;;  %v746_v1 = vsel %vm642_vm2, %v1525_v19, 0.0  ;;  %v748_v7 = vsel %vm642_vm2, %v1541_v59, 0.0 }
 0x138   :  { %v725_v46 = vadd.f32 %v724_v42, %v723_v41  ;;  %v920_v5 = vadd.f32 %v919_v13, %v918_v43  ;;  %v634_v43 = vpop.f32.mrf.mxu3  ;;  %v939_v13 = vsel %vm642_vm2, %v826_v36, 0.0  ;;  %v828_v42 = vmul.f32 %v1525_v19, %v1525_v19 }
 0x139   :  { %v750_v19 = vsel %vm642_vm2, %v1557_v37, 0.0  ;;  %v764_v36 = vsel %vm642_vm2, %v634_v43, 0.0 }
 0x13a   :  { %v727_v56 = vadd.f32 %v726_v44, %v725_v46  ;;  %v922_v53 = vadd.f32 %v921_v57, %v920_v5  ;;  %v941_v5 = vsel %vm642_vm2, %v827_v4, 0.0  ;;  %v829_v57 = vmul.f32 %v1541_v59, %v1541_v59 }
 0x13b   :  { %v752_v59 = vsel %vm642_vm2, %v1586_v24, 0.0 }
 0x13c   :  { %v729_v34 = vadd.f32 %v728_v30, %v727_v56  ;;  %v924_v62 = vadd.f32 %v923_v9, %v922_v53  ;;  %v943_v56 = vsel %vm642_vm2, %v828_v42, 0.0  ;;  %v830_v53 = vmul.f32 %v1557_v37, %v1557_v37 }
 0x13d   :  { %v945_v61 = vsel %vm642_vm2, %v829_v57, 0.0  ;;  %v754_v37 = vsel %vm642_vm2, %v1615_v11, 0.0  ;;  %v758_v11 = vsel %vm642_vm2, %v1662_v2, 0.0 }
 0x13e   :  { %v926_v16 = vadd.f32 %v925_v14, %v924_v62  ;;  %v731_v48 = vadd.f32 %v730_v20, %v729_v34  ;;  %v831_v34 = vmul.f32 %v1586_v24, %v1586_v24  ;;  %v947_v20 = vsel %vm642_vm2, %v830_v53, 0.0 }
 0x13f   :  { %v756_v24 = vsel %vm642_vm2, %v1636_v50, 0.0 }
 0x140   :  { %v928_v49 = vadd.f32 %v927_v17, %v926_v16  ;;  %v733_v21 = vadd.f32 %v732_v18, %v731_v48  ;;  %v637_v3 = vpop.f32.mrf.mxu3  ;;  %v949_v17 = vsel %vm642_vm2, %v831_v34, 0.0  ;;  %v833_v18 = vmul.f32 %v1636_v50, %v1636_v50 }
 0x141   :  { %v760_v50 = vsel %vm642_vm2, %v1689_v52, 0.0 }
 0x142   :  { %v930_v54 = vadd.f32 %v929_v22, %v928_v49  ;;  %v735_v47 = vadd.f32 %v734_v23, %v733_v21  ;;  %v951_v21 = vsel %vm642_vm2, %v832_v0, 0.0  ;;  %v834_v22 = vmul.f32 %v1662_v2, %v1662_v2 }
 0x143   :  { %v762_v2 = vsel %vm642_vm2, %v1711_v10, 0.0 }
 0x144   :  { %v932_v15 = vadd.f32 %v931_v27, %v930_v54  ;;  %v737_v29 = vadd.f32 %v736_v28, %v735_v47  ;;  %v953_v54 = vsel %vm642_vm2, %v833_v18, 0.0  ;;  %v835_v47 = vmul.f32 %v1689_v52, %v1689_v52 }
 0x145   :  { %v955_v28 = vsel %vm642_vm2, %v834_v22, 0.0 }
 0x146   :  { %v739_v32 = vadd.f32 %v738_v58, %v737_v29  ;;  %v934_v33 = vadd.f32 %v933_v25, %v932_v15  ;;  %v836_v15 = vmul.f32 %v1711_v10, %v1711_v10  ;;  %v957_v38 = vsel %vm642_vm2, %v835_v47, 0.0 }
 0x147   :  { %v837_v25 = vmul.f32 %v634_v43, %v634_v43 }
 0x148   :  { %v741_v26 = vadd.f32 %v740_v35, %v739_v32  ;;  %v936_v39 = vadd.f32 %v935_v63, %v934_v33  ;;  %v639_v63 = vpop.f32.mrf.mxu3  ;;  %v959_v35 = vsel %vm642_vm2, %v836_v15, 0.0 }
 0x149   :  { %v839_v4 = vmul.f32 %v639_v63, %v639_v63 }
 0x14a   :  { %v743_v12 = vadd.f32 %v742_v55, %v741_v26  ;;  %v938_v41 = vadd.f32 %v937_v40, %v936_v39  ;;  %v838_v26 = vmul.f32 %v637_v3, %v637_v3  ;;  %v961_v40 = vsel %vm642_vm2, %v837_v25, 0.0 }
 0x14b   :  { %v766_v55 = vsel %vm642_vm2, %v637_v3, 0.0 }
 0x14c   :  { %v745_v45 = vadd.f32 %v744_v60, %v743_v12  ;;  %v940_v46 = vadd.f32 %v939_v13, %v938_v41  ;;  %v963_v10 = vsel %vm642_vm2, %v838_v26, 0.0  ;;  %v768_v13 = vsel %vm642_vm2, %v639_v63, 0.0 }
 0x14e   :  { %v747_v44 = vadd.f32 %v746_v1, %v745_v45  ;;  %v942_v51 = vadd.f32 %v941_v5, %v940_v46  ;;  %v965_v45 = vsel %vm642_vm2, %v839_v4, 0.0 }
 0x150   :  { %v749_v9 = vadd.f32 %v748_v7, %v747_v44  ;;  %v944_v30 = vadd.f32 %v943_v56, %v942_v51 }
 0x152   :  { %v946_v62 = vadd.f32 %v945_v61, %v944_v30  ;;  %v751_v14 = vadd.f32 %v750_v19, %v749_v9 }
 0x154   :  { %v753_v16 = vadd.f32 %v752_v59, %v751_v14  ;;  %v948_v48 = vadd.f32 %v947_v20, %v946_v62 }
 0x156   :  { %v755_v6 = vadd.f32 %v754_v37, %v753_v16  ;;  %v950_v49 = vadd.f32 %v949_v17, %v948_v48 }
 0x158   :  { %v757_v23 = vadd.f32 %v756_v24, %v755_v6  ;;  %v952_v31 = vadd.f32 %v951_v21, %v950_v49 }
 0x15a   :  { %v759_v8 = vadd.f32 %v758_v11, %v757_v23  ;;  %v954_v27 = vadd.f32 %v953_v54, %v952_v31 }
 0x15c   :  { %v761_v29 = vadd.f32 %v760_v50, %v759_v8  ;;  %v956_v58 = vadd.f32 %v955_v28, %v954_v27 }
 0x15e   :  { %v958_v32 = vadd.f32 %v957_v38, %v956_v58  ;;  %v763_v33 = vadd.f32 %v762_v2, %v761_v29 }
 0x160   :  { %v960_v52 = vadd.f32 %v959_v35, %v958_v32  ;;  %v765_v39 = vadd.f32 %v764_v36, %v763_v33 }
 0x162   :  { %v962_v12 = vadd.f32 %v961_v40, %v960_v52  ;;  %v767_v41 = vadd.f32 %v766_v55, %v765_v39 }
 0x164   :  { %v964_v60 = vadd.f32 %v963_v10, %v962_v12  ;;  %v769_v42 = vadd.f32 %v768_v13, %v767_v41 }
 0x166   :  { %v770_v46 = vrot.slane %v769_v42, 4  ;;  %v966_v43 = vadd.f32 %v965_v45, %v964_v60 }
 0x168   :  { %v771_v5 = vadd.f32 %v770_v46, %v769_v42  ;;  %v967_v1 = vrot.slane %v966_v43, 4 }
 0x16a   :  { %v772_v57 = vrot.slane %v771_v5, 2  ;;  %v968_v44 = vadd.f32 %v967_v1, %v966_v43 }
 0x16c   :  { %v773_v51 = vadd.f32 %v772_v57, %v771_v5  ;;  %v969_v56 = vrot.slane %v968_v44, 2 }
 0x16e   :  { %v774_v7 = vrot.slane %v773_v51, 1  ;;  %v970_v53 = vadd.f32 %v969_v56, %v968_v44 }
 0x170   :  { %v971_v9 = vrot.slane %v970_v53, 1  ;;  %v775_v30 = vadd.f32 %v774_v7, %v773_v51 }
 0x172   :  { %v972_v61 = vadd.f32 %v971_v9, %v970_v53 }
 0x174   :  { %v974_v19 = vsel %vm973_vm3, %v775_v30, %v972_v61 }
 0x175   :  { %976 = vst.msk [vmem:[%s1795_s3] sm:$0x3] %vm975_vm4, %v974_v19 }

// kernel: bottleneck_forward.5
= control target key start
LH: loop header
LB: loop body
LE: loop exit
PB: predicated region body
PF: predicated region fallthrough
CT: control target
= control target key end

     0   :  { %s2636_s15 = smov 0   ;;  %s3428_s0 = inlined_call_operand.vmem [shape: bf16[2,16,16,4], index: 0, kind: input, shape index: {}]   ;;  %s3429_s1 = inlined_call_operand.vmem [shape: bf16[3,12,4], index: 1, kind: input, shape index: {}]   ;;  %s3430_s2 = inlined_call_operand.vmem [shape: f32[2,4], index: 2, kind: input, shape index: {}]   ;;  %s3431_s3 = inlined_call_operand.vmem [shape: bf16[2,16,16,4], index: 3, kind: output, shape index: {0}]   ;;  %s3432_s4 = inlined_call_operand.vmem [shape: f32[2,2,4], index: 4, kind: output, shape index: {1}]  }
   0x1 LB: > { %s2184_s16 = sadd.s32 4294967295, %s2606_s15   ;;  %p2188_p0 = scmp.ge.s32.totalorder %s2606_s15, 1  ;;  %s2606_s15 = sphi %s2636_s15, %s15_s15  }
   0x2   : > { %p165_p1 = scmp.lt.s32.totalorder %s2606_s15, 3 }
   0x4   : > { %p166_p2 = pnand %p2188_p0, %p165_p1 }
   0x5   : > { %p195_p3 = scmp.lt.s32.totalorder (!%p166_p2), %s2184_s16, 1  ;;  %s2608_s25 = smov (!%p166_p2), 4  }
   0x6   : > { %169 = sbr.rel (%p166_p2) target bundleno = 523 (0x20b), region = 32  ;;  %s2609_s26 = smov (!%p166_p2), 8  }
   0xb   : > { %s3438_s16 = smov (!%p195_p3, %s2184_s16), 1  ;;  %v2657_v0 = vld [vmem:[%s3430_s2] ss:$0 sm:$0xff]  ;;  %v2665_v6 = vld [vmem:[%s3430_s2 + $0x1] ss:$0 sm:$0xff]  ;;  %vm681_vm0 = vcmask 1047552  }
   0xc   : > { %s2452_s17 = sshll.u32 %s3438_s16, 7  ;;  %vm682_vm1 = vsmask.f32 7424  ;;  %vm862_vm3 = vcmask 93184   ;;  %vm1216_vm4 = vcmask 1045504   ;;  %vm1167_vm5 = vcmask 97280  }
   0xd   : > { %s2652_s20 = scalar_lea.vmem %s3428_s0, %s2452_s17  ;;  %vm2714_vm2 = vmand %vm681_vm0, %vm682_vm1  ;;  %vm614_vm6 = vcmask 1040384   ;;  %vm615_vm7 = vsmask.f32 256  ;;  %vm780_vm9 = vcmask 31744   ;;  %vm829_vm10 = vcmask 64512   ;;  %s3196_s18 = scalar_lea.vmem %s3431_s3, %s2452_s17 }
   0xe   : > { %v2569_v1 = vld [vmem:[%s2652_s20 + $0x8] sm:$0xff]   ;;  %v2506_v2 = vld [vmem:[%s2652_s20] sm:$0xff]   ;;  %v2570_v3 = vld [vmem:[%s2652_s20 + $0x10] sm:$0xff]   ;;  %vm1859_vm11 = vcmask 27648   ;;  %s2193_s17 = sshll.u32 %s3438_s16, 1  ;;  %vm2096_vm12 = vcmask 25600  }
   0xf   : > { %v2511_v4 = vunpack.c.l.bf16 %v2569_v1  ;;  %v2512_v5 = vunpack.c.h.bf16 %v2569_v1  ;;  %v2507_v7 = vunpack.c.l.bf16 %v2506_v2  ;;  %v2508_v8 = vunpack.c.h.bf16 %v2506_v2  ;;  %v2580_v9 = vld [vmem:[%s2652_s20 + $0x60] sm:$0xff]   ;;  %v2581_v46 = vld [vmem:[%s2652_s20 + $0x68] sm:$0xff]   ;;  %v2571_v51 = vld [vmem:[%s2652_s20 + $0x18] sm:$0xff]   ;;  %s208_s21 = scalar_lea.vmem %s3432_s4, %s2193_s17 }
  0x10   : > { %v2515_v10 = vunpack.c.l.bf16 %v2570_v3  ;;  %v2516_v11 = vunpack.c.h.bf16 %v2570_v3  ;;  %v2555_v12 = vunpack.c.l.bf16 %v2580_v9  ;;  %v2556_v13 = vunpack.c.h.bf16 %v2580_v9  ;;  %vm2978_vm8 = vmand %vm614_vm6, %vm615_vm7 }
  0x11   : > { %v279_v14 = vmul.f32 %v2657_v0, %v2511_v4  ;;  %v280_v15 = vmul.f32 %v2657_v0, %v2512_v5  ;;  %v277_v16 = vmul.f32 %v2657_v0, %v2507_v7  ;;  %v278_v17 = vmul.f32 %v2657_v0, %v2508_v8 }
  0x12   : > { %v281_v18 = vmul.f32 %v2657_v0, %v2515_v10  ;;  %v282_v19 = vmul.f32 %v2657_v0, %v2516_v11  ;;  %v301_v20 = vmul.f32 %v2657_v0, %v2555_v12  ;;  %v302_v21 = vmul.f32 %v2657_v0, %v2556_v13 }
  0x13   : > { %v312_v22 = vadd.f32 %v2665_v6, %v279_v14  ;;  %v313_v23 = vadd.f32 %v2665_v6, %v280_v15  ;;  %v310_v24 = vadd.f32 %v2665_v6, %v277_v16  ;;  %v311_v25 = vadd.f32 %v2665_v6, %v278_v17 }
  0x14   : > { %v314_v26 = vadd.f32 %v2665_v6, %v281_v18  ;;  %v315_v27 = vadd.f32 %v2665_v6, %v282_v19  ;;  %v334_v28 = vadd.f32 %v2665_v6, %v301_v20  ;;  %v335_v29 = vadd.f32 %v2665_v6, %v302_v21 }
  0x15   : > { %v344_v30 = vmax.f32 %v312_v22, 0.0  ;;  %v345_v31 = vmax.f32 %v313_v23, 0.0  ;;  %v342_v32 = vmax.f32 %v310_v24, 0.0  ;;  %v343_v33 = vmax.f32 %v311_v25, 0.0  ;;  %v2572_v23 = vld [vmem:[%s2652_s20 + $0x20] sm:$0xff]  }
  0x16   : > { %v346_v34 = vmax.f32 %v314_v26, 0.0  ;;  %v347_v35 = vmax.f32 %v315_v27, 0.0  ;;  %v366_v36 = vmax.f32 %v334_v28, 0.0  ;;  %v367_v37 = vmax.f32 %v335_v29, 0.0  ;;  %v2582_v28 = vld [vmem:[%s2652_s20 + $0x70] sm:$0xff]  }
  0x17   : > { %v376_v38 = vpack.c.bf16 %v344_v30, %v344_v30  ;;  %v377_v39 = vpack.c.bf16 %v345_v31, %v345_v31  ;;  %v374_v40 = vpack.c.bf16 %v342_v32, %v342_v32  ;;  %v375_v41 = vpack.c.bf16 %v343_v33, %v343_v33 }
  0x18   : > { %v378_v42 = vpack.c.bf16 %v346_v34, %v346_v34  ;;  %v379_v43 = vpack.c.bf16 %v347_v35, %v347_v35  ;;  %v398_v44 = vpack.c.bf16 %v366_v36, %v366_v36  ;;  %v399_v45 = vpack.c.bf16 %v367_v37, %v367_v37 }
  0x19   : > { %v440_v47 = vunpack.c.l.b16 %v376_v38  ;;  %v441_v48 = vunpack.c.l.b16 %v377_v39  ;;  %v438_v49 = vunpack.c.l.b16 %v374_v40  ;;  %v439_v50 = vunpack.c.l.b16 %v375_v41 }
  0x1a   : > { %v442_v52 = vunpack.c.l.b16 %v378_v42  ;;  %v443_v53 = vunpack.c.l.b16 %v379_v43  ;;  %v462_v54 = vunpack.c.l.b16 %v398_v44  ;;  %v463_v55 = vunpack.c.l.b16 %v399_v45 }
  0x1b   : > { %v2686_v56 = vpack.c.b16 %v441_v48, %v440_v47  ;;  %v2688_v57 = vpack.c.b16 %v439_v50, %v438_v49  ;;  %v2559_v58 = vunpack.c.l.bf16 %v2581_v46  ;;  %v2560_v59 = vunpack.c.h.bf16 %v2581_v46  ;;  %v2573_v49 = vld [vmem:[%s2652_s20 + $0x28] sm:$0xff]  }
  0x1c   : > { %v2690_v60 = vpack.c.b16 %v443_v53, %v442_v52  ;;  %v2692_v61 = vpack.c.b16 %v463_v55, %v462_v54  ;;  %v2519_v62 = vunpack.c.l.bf16 %v2571_v51  ;;  %v2520_v63 = vunpack.c.h.bf16 %v2571_v51 }
  0x1d   : > { %702 = vrot.lane.b32.xlu0 %v2686_v56, %s2608_s25  ;;  %700 = vrot.lane.b32.xlu1 %v2688_v57, %s2608_s25  ;;  %v494_v1 = vshrl.u32 %v2686_v56, 16  ;;  %v497_v2 = vshll.u32 %v2686_v56, 16  ;;  %v487_v3 = vshrl.u32 %v2688_v57, 16  ;;  %v490_v4 = vshll.u32 %v2688_v57, 16 }
  0x1e   : > { %v501_v5 = vshrl.u32 %v2690_v60, 16  ;;  %v504_v7 = vshll.u32 %v2690_v60, 16  ;;  %v571_v8 = vshrl.u32 %v2692_v61, 16  ;;  %v574_v9 = vshll.u32 %v2692_v61, 16  ;;  %704 = vrot.lane.b32.xlu2 %v2690_v60, %s2608_s25 }
  0x1f   : > { %v635_v10 = vrot.slane %v497_v2, 1  ;;  %v633_v11 = vrot.slane %v490_v4, 1  ;;  %v303_v17 = vmul.f32 %v2657_v0, %v2559_v58  ;;  %v304_v18 = vmul.f32 %v2657_v0, %v2560_v59 }
  0x20   : > { %v637_v13 = vrot.slane %v504_v7, 1  ;;  %v657_v14 = vrot.slane %v574_v9, 1  ;;  %v283_v21 = vmul.f32 %v2657_v0, %v2519_v62  ;;  %v284_v22 = vmul.f32 %v2657_v0, %v2520_v63 }
  0x21   : > { %v636_v15 = vor.u32 %v635_v10, %v494_v1  ;;  %v634_v16 = vor.u32 %v633_v11, %v487_v3  ;;  %v336_v26 = vadd.f32 %v2665_v6, %v303_v17  ;;  %v337_v27 = vadd.f32 %v2665_v6, %v304_v18 }
  0x22   : > { %v638_v19 = vor.u32 %v637_v13, %v501_v5  ;;  %v658_v20 = vor.u32 %v657_v14, %v571_v8  ;;  %v316_v31 = vadd.f32 %v2665_v6, %v283_v21  ;;  %v317_v32 = vadd.f32 %v2665_v6, %v284_v22 }
  0x23   : > { %v685_v24 = vsel %vm2714_vm2, %v636_v15, 0  ;;  %v684_v25 = vsel %vm2714_vm2, %v634_v16, 0  ;;  %v368_v33 = vmax.f32 %v336_v26, 0.0  ;;  %v369_v34 = vmax.f32 %v337_v27, 0.0 }
  0x24   : > { %v686_v29 = vsel %vm2714_vm2, %v638_v19, 0  ;;  %v696_v30 = vsel %vm2714_vm2, %v658_v20, 0  ;;  %v2523_v35 = vunpack.c.l.bf16 %v2572_v23  ;;  %v2524_v36 = vunpack.c.h.bf16 %v2572_v23 }
  0x25   : > { %750 = vrot.lane.b32.xlu0 %v685_v24, %s2609_s26  ;;  %748 = vrot.lane.b32.xlu1 %v684_v25, %s2609_s26  ;;  %v348_v37 = vmax.f32 %v316_v31, 0.0  ;;  %v349_v38 = vmax.f32 %v317_v32, 0.0  ;;  %v2563_v39 = vunpack.c.l.bf16 %v2582_v28  ;;  %v2564_v40 = vunpack.c.h.bf16 %v2582_v28  ;;  %v2583_v28 = vld [vmem:[%s2652_s20 + $0x78] sm:$0xff]  }
  0x26   : > { %724 = vrot.lane.b32.xlu2 %v2692_v61, %s2608_s25  ;;  %v400_v41 = vpack.c.bf16 %v368_v33, %v368_v33  ;;  %v401_v42 = vpack.c.bf16 %v369_v34, %v369_v34  ;;  %v285_v43 = vmul.f32 %v2657_v0, %v2523_v35  ;;  %v286_v44 = vmul.f32 %v2657_v0, %v2524_v36 }
  0x27   : > { %v380_v45 = vpack.c.bf16 %v348_v37, %v348_v37  ;;  %v381_v46 = vpack.c.bf16 %v349_v38, %v349_v38  ;;  %v305_v47 = vmul.f32 %v2657_v0, %v2563_v39  ;;  %v306_v48 = vmul.f32 %v2657_v0, %v2564_v40 }
  0x28   : > { %v464_v50 = vunpack.c.l.b16 %v400_v41  ;;  %v465_v51 = vunpack.c.l.b16 %v401_v42  ;;  %v318_v52 = vadd.f32 %v2665_v6, %v285_v43  ;;  %v319_v53 = vadd.f32 %v2665_v6, %v286_v44 }
  0x29   : > { %v444_v54 = vunpack.c.l.b16 %v380_v45  ;;  %v445_v55 = vunpack.c.l.b16 %v381_v46  ;;  %v338_v58 = vadd.f32 %v2665_v6, %v305_v47  ;;  %v339_v59 = vadd.f32 %v2665_v6, %v306_v48  ;;  %v2579_v46 = vld [vmem:[%s2652_s20 + $0x58] sm:$0xff]  }
  0x2a   : > { %v2761_v62 = vpack.c.b16 %v465_v51, %v464_v50  ;;  %v350_v63 = vmax.f32 %v318_v52, 0.0  ;;  %v351_v10 = vmax.f32 %v319_v53, 0.0  ;;  %v2527_v11 = vunpack.c.l.bf16 %v2573_v49 }
  0x2b   : > { %v2763_v13 = vpack.c.b16 %v445_v55, %v444_v54  ;;  %v370_v14 = vmax.f32 %v338_v58, 0.0  ;;  %v371_v15 = vmax.f32 %v339_v59, 0.0  ;;  %v2528_v16 = vunpack.c.h.bf16 %v2573_v49 }
  0x2c   : > { %v382_v17 = vpack.c.bf16 %v350_v63, %v350_v63  ;;  %v383_v18 = vpack.c.bf16 %v351_v10, %v351_v10  ;;  %v578_v19 = vshrl.u32 %v2761_v62, 16  ;;  %v581_v20 = vshll.u32 %v2761_v62, 16 }
  0x2d   : > { %752 = vrot.lane.b32.xlu0 %v686_v29, %s2609_s26  ;;  %772 = vrot.lane.b32.xlu1 %v696_v30, %s2609_s26  ;;  %v508_v21 = vshrl.u32 %v2763_v13, 16  ;;  %v511_v22 = vshll.u32 %v2763_v13, 16  ;;  %v402_v23 = vpack.c.bf16 %v370_v14, %v370_v14  ;;  %v403_v24 = vpack.c.bf16 %v371_v15, %v371_v15  ;;  %v2574_v15 = vld [vmem:[%s2652_s20 + $0x30] sm:$0xff]  }
  0x2e   : > { %706 = vrot.lane.b32.xlu2 %v2763_v13, %s2608_s25  ;;  %v446_v25 = vunpack.c.l.b16 %v382_v17  ;;  %v447_v26 = vunpack.c.l.b16 %v383_v18  ;;  %v659_v27 = vrot.slane %v581_v20, 1  ;;  %v287_v33 = vmul.f32 %v2657_v0, %v2527_v11 }
  0x2f   : > { %v639_v29 = vrot.slane %v511_v22, 1  ;;  %v466_v30 = vunpack.c.l.b16 %v402_v23  ;;  %v467_v31 = vunpack.c.l.b16 %v403_v24  ;;  %v288_v34 = vmul.f32 %v2657_v0, %v2528_v16 }
  0x30   : > { %v660_v32 = vor.u32 %v659_v27, %v578_v19  ;;  %v2567_v37 = vunpack.c.l.bf16 %v2583_v28  ;;  %v2568_v38 = vunpack.c.h.bf16 %v2583_v28  ;;  %v2786_v39 = vpack.c.b16 %v447_v26, %v446_v25 }
  0x31   : > { %v640_v35 = vor.u32 %v639_v29, %v508_v21  ;;  %v2784_v36 = vpack.c.b16 %v467_v31, %v466_v30  ;;  %v320_v41 = vadd.f32 %v2665_v6, %v287_v33  ;;  %v321_v42 = vadd.f32 %v2665_v6, %v288_v34 }
  0x32   : > { %v697_v40 = vsel %vm2714_vm2, %v660_v32, 0  ;;  %v307_v45 = vmul.f32 %v2657_v0, %v2567_v37  ;;  %v308_v49 = vmul.f32 %v2657_v0, %v2568_v38  ;;  %v515_v50 = vshrl.u32 %v2786_v39, 16  ;;  %v2575_v32 = vld [vmem:[%s2652_s20 + $0x38] sm:$0xff]  }
  0x33   : > { %v687_v43 = vsel %vm2714_vm2, %v640_v35, 0  ;;  %v588_v44 = vshll.u32 %v2784_v36, 16  ;;  %v352_v47 = vmax.f32 %v320_v41, 0.0  ;;  %v353_v48 = vmax.f32 %v321_v42, 0.0 }
  0x34   : > { %v585_v51 = vshrl.u32 %v2784_v36, 16  ;;  %v340_v53 = vadd.f32 %v2665_v6, %v307_v45  ;;  %v518_v54 = vshll.u32 %v2786_v39, 16  ;;  %v341_v59 = vadd.f32 %v2665_v6, %v308_v49 }
  0x35   : > { %726 = vrot.lane.b32.xlu0 %v2761_v62, %s2608_s25  ;;  %754 = vrot.lane.b32.xlu1 %v687_v43, %s2609_s26  ;;  %v661_v52 = vrot.slane %v588_v44, 1  ;;  %v384_v55 = vpack.c.bf16 %v352_v47, %v352_v47  ;;  %v385_v58 = vpack.c.bf16 %v353_v48, %v353_v48  ;;  %v2551_v63 = vunpack.c.l.bf16 %v2579_v46 }
  0x36   : > { %774 = vrot.lane.b32.xlu2 %v697_v40, %s2609_s26  ;;  %v372_v10 = vmax.f32 %v340_v53, 0.0  ;;  %v641_v11 = vrot.slane %v518_v54, 1  ;;  %v2552_v14 = vunpack.c.h.bf16 %v2579_v46  ;;  %v373_v18 = vmax.f32 %v341_v59, 0.0 }
  0x37   : > { %v448_v16 = vunpack.c.l.b16 %v384_v55  ;;  %v449_v17 = vunpack.c.l.b16 %v385_v58  ;;  %v299_v23 = vmul.f32 %v2657_v0, %v2551_v63  ;;  %v662_v24 = vor.u32 %v661_v52, %v585_v51 }
  0x38   : > { %v404_v25 = vpack.c.bf16 %v372_v10, %v372_v10  ;;  %v642_v26 = vor.u32 %v641_v11, %v515_v50  ;;  %v300_v27 = vmul.f32 %v2657_v0, %v2552_v14  ;;  %v405_v29 = vpack.c.bf16 %v373_v18, %v373_v18 }
  0x39   : > { %v2818_v28 = vpack.c.b16 %v449_v17, %v448_v16  ;;  %v332_v30 = vadd.f32 %v2665_v6, %v299_v23  ;;  %v2531_v31 = vunpack.c.l.bf16 %v2574_v15  ;;  %v2532_v37 = vunpack.c.h.bf16 %v2574_v15 }
  0x3a   : > { %v468_v33 = vunpack.c.l.b16 %v404_v25  ;;  %v688_v34 = vsel %vm2714_vm2, %v642_v26, 0  ;;  %v333_v35 = vadd.f32 %v2665_v6, %v300_v27  ;;  %v469_v38 = vunpack.c.l.b16 %v405_v29 }
  0x3b   : > { %v525_v40 = vshll.u32 %v2818_v28, 16  ;;  %v364_v41 = vmax.f32 %v332_v30, 0.0  ;;  %v289_v43 = vmul.f32 %v2657_v0, %v2531_v31  ;;  %v290_v45 = vmul.f32 %v2657_v0, %v2532_v37 }
  0x3c   : > { %v365_v42 = vmax.f32 %v333_v35, 0.0  ;;  %v2535_v46 = vunpack.c.l.bf16 %v2575_v32  ;;  %v698_v47 = vsel %vm2714_vm2, %v662_v24, 0  ;;  %v2835_v48 = vpack.c.b16 %v469_v38, %v468_v33 }
  0x3d   : > { %708 = vrot.lane.b32.xlu0 %v2786_v39, %s2608_s25  ;;  %728 = vrot.lane.b32.xlu1 %v2784_v36, %s2608_s25  ;;  %v522_v49 = vshrl.u32 %v2818_v28, 16  ;;  %v396_v52 = vpack.c.bf16 %v364_v41, %v364_v41  ;;  %v322_v55 = vadd.f32 %v2665_v6, %v289_v43  ;;  %v323_v58 = vadd.f32 %v2665_v6, %v290_v45 }
  0x3e   : > { %756 = vrot.lane.b32.xlu2 %v688_v34, %s2609_s26  ;;  %v397_v53 = vpack.c.bf16 %v365_v42, %v365_v42  ;;  %v2536_v59 = vunpack.c.h.bf16 %v2575_v32  ;;  %v592_v63 = vshrl.u32 %v2835_v48, 16  ;;  %v595_v10 = vshll.u32 %v2835_v48, 16 }
  0x3f   : > { %v643_v11 = vrot.slane %v525_v40, 1  ;;  %v460_v14 = vunpack.c.l.b16 %v396_v52  ;;  %v354_v16 = vmax.f32 %v322_v55, 0.0  ;;  %v355_v17 = vmax.f32 %v323_v58, 0.0 }
  0x40   : > { %v461_v15 = vunpack.c.l.b16 %v397_v53  ;;  %v291_v18 = vmul.f32 %v2657_v0, %v2535_v46  ;;  %v663_v23 = vrot.slane %v595_v10, 1  ;;  %v292_v24 = vmul.f32 %v2657_v0, %v2536_v59 }
  0x41   : > { %v386_v25 = vpack.c.bf16 %v354_v16, %v354_v16  ;;  %v387_v26 = vpack.c.bf16 %v355_v17, %v355_v17  ;;  %v644_v29 = vor.u32 %v643_v11, %v522_v49  ;;  %v517_v62 = vrot.slane %v515_v50, 7 }
  0x42   : > { %v324_v27 = vadd.f32 %v2665_v6, %v291_v18  ;;  %v2854_v30 = vpack.c.b16 %v461_v15, %v460_v14  ;;  %v325_v31 = vadd.f32 %v2665_v6, %v292_v24  ;;  %v664_v32 = vor.u32 %v663_v23, %v592_v63 }
  0x43   : > { %v450_v33 = vunpack.c.l.b16 %v386_v25  ;;  %v451_v34 = vunpack.c.l.b16 %v387_v26  ;;  %v689_v43 = vsel %vm2714_vm2, %v644_v29, 0  ;;  %v2576_v29 = vld [vmem:[%s2652_s20 + $0x40] sm:$0xff]   ;;  %v594_v36 = vrot.slane %v592_v63, 7 }
  0x44   : > { %v356_v35 = vmax.f32 %v324_v27, 0.0  ;;  %v357_v37 = vmax.f32 %v325_v31, 0.0  ;;  %v567_v38 = vshll.u32 %v2854_v30, 16  ;;  %v699_v46 = vsel %vm2714_vm2, %v664_v32, 0 }
  0x45   : > { %776 = vrot.lane.b32.xlu0 %v698_v47, %s2609_s26  ;;  %710 = vrot.lane.b32.xlu1 %v2818_v28, %s2608_s25  ;;  %v2862_v41 = vpack.c.b16 %v451_v34, %v450_v33  ;;  %v564_v58 = vshrl.u32 %v2854_v30, 16  ;;  %v2539_v31 = vunpack.c.l.bf16 %v2576_v29  ;;  %v2540_v32 = vunpack.c.h.bf16 %v2576_v29 }
  0x46   : > { %730 = vrot.lane.b32.xlu2 %v2835_v48, %s2608_s25  ;;  %v388_v42 = vpack.c.bf16 %v356_v35, %v356_v35  ;;  %v389_v45 = vpack.c.bf16 %v357_v37, %v357_v37  ;;  %v655_v59 = vrot.slane %v567_v38, 1  ;;  %v597_v63 = vor.u32 %v595_v10, %v594_v36 }
  0x47   : > { %v529_v47 = vshrl.u32 %v2862_v41, 16  ;;  %v532_v52 = vshll.u32 %v2862_v41, 16  ;;  %v293_v33 = vmul.f32 %v2657_v0, %v2539_v31  ;;  %v294_v34 = vmul.f32 %v2657_v0, %v2540_v32 }
  0x48   : > { %v452_v53 = vunpack.c.l.b16 %v388_v42  ;;  %v453_v55 = vunpack.c.l.b16 %v389_v45  ;;  %v656_v16 = vor.u32 %v655_v59, %v564_v58  ;;  %v632_v10 = vsel %vm2978_vm8, 0, %v597_v63 }
  0x49   : > { %v645_v11 = vrot.slane %v532_v52, 1  ;;  %v326_v35 = vadd.f32 %v2665_v6, %v293_v33  ;;  %v327_v37 = vadd.f32 %v2665_v6, %v294_v34  ;;  %v2577_v33 = vld [vmem:[%s2652_s20 + $0x48] sm:$0xff]  }
  0x4a   : > { %v2877_v14 = vpack.c.b16 %v453_v55, %v452_v53  ;;  %v695_v25 = vsel %vm2714_vm2, %v656_v16, 0  ;;  %v2346_v16 = vld [vmem:[%s3429_s1] sm:$0xf]  ;;  %v2543_v34 = vunpack.c.l.bf16 %v2577_v33 }
  0x4b   : > { %v646_v15 = vor.u32 %v645_v11, %v529_v47  ;;  %v358_v42 = vmax.f32 %v326_v35, 0.0  ;;  %v2610_v11 = vmov 0   ;;  %v2544_v35 = vunpack.c.h.bf16 %v2577_v33  ;;  %v2578_v33 = vld [vmem:[%s2652_s20 + $0x50] sm:$0xff]  }
  0x4c   : > { %v539_v17 = vshll.u32 %v2877_v14, 16  ;;  %v536_v23 = vshrl.u32 %v2877_v14, 16  ;;  %863 = vst.msk [vmem:[#allocation2] sm:$0xf] %vm862_vm3, %v2610_v11 }
  0x4d   : > { %778 = vrot.lane.b32.xlu1 %v699_v46, %s2609_s26  ;;  %758 = vrot.lane.b32.xlu0 %v689_v43, %s2609_s26  ;;  %v690_v18 = vsel %vm2714_vm2, %v646_v15, 0  ;;  %v359_v43 = vmax.f32 %v327_v37, 0.0  ;;  %v390_v45 = vpack.c.bf16 %v358_v42, %v358_v42  ;;  %864 = vst.msk [vmem:[#allocation2 + $0x4] sm:$0xf] %vm862_vm3, %v2610_v11  ;;  %v295_v37 = vmul.f32 %v2657_v0, %v2543_v34 }
  0x4e   : > { %712 = vrot.lane.b32.xlu2 %v2862_v41, %s2608_s25  ;;  %v647_v24 = vrot.slane %v539_v17, 1  ;;  %866 = vst.msk [vmem:[#allocation2 + $0x88] sm:$0xf] %vm862_vm3, %v2610_v11  ;;  %v296_v42 = vmul.f32 %v2657_v0, %v2544_v35 }
  0x4f   : > { %v391_v46 = vpack.c.bf16 %v359_v43, %v359_v43  ;;  %v454_v53 = vunpack.c.l.b16 %v390_v45  ;;  %867 = vst.msk [vmem:[#allocation2 + $0x8c] sm:$0xf] %vm862_vm3, %v2610_v11  ;;  %v328_v43 = vadd.f32 %v2665_v6, %v295_v37  ;;  %v2547_v37 = vunpack.c.l.bf16 %v2578_v33 }
  0x50   : > { %v648_v26 = vor.u32 %v647_v24, %v536_v23  ;;  %v329_v45 = vadd.f32 %v2665_v6, %v296_v42  ;;  %v2548_v42 = vunpack.c.h.bf16 %v2578_v33 }
  0x51   : > { %v455_v55 = vunpack.c.l.b16 %v391_v46  ;;  %v360_v46 = vmax.f32 %v328_v43, 0.0 }
  0x52   : > { %v691_v27 = vsel %vm2714_vm2, %v648_v26, 0 }
  0x53   : > { %v2909_v59 = vpack.c.b16 %v455_v55, %v454_v53  ;;  %v361_v53 = vmax.f32 %v329_v45, 0.0  ;;  %v392_v55 = vpack.c.bf16 %v360_v46, %v360_v46 }
  0x54   : > { %v2454_v32 = vld [vmem:[#allocation2] sm:$0xff] }
  0x55   : > { %722 = vrot.lane.b32.xlu0 %v2854_v30, %s2608_s25  ;;  %760 = vrot.lane.b32.xlu1 %v690_v18, %s2609_s26  ;;  %v546_v15 = vshll.u32 %v2909_v59, 16  ;;  %v2470_v18 = vld [vmem:[%s3429_s1] sm:$0x30]  ;;  %v393_v11 = vpack.c.bf16 %v361_v53, %v361_v53  ;;  %v297_v53 = vmul.f32 %v2657_v0, %v2547_v37 }
  0x56   : > { %770 = vrot.lane.b32.xlu2 %v695_v25, %s2609_s26  ;;  %v2347_v24 = vor.u32 %v2470_v18, %v2346_v16  ;;  %v543_v25 = vshrl.u32 %v2909_v59, 16  ;;  %v2262_v16 = vld [vmem:[%s3429_s1 + $0x8] sm:$0xf]  ;;  %v2487_v18 = vld [vmem:[%s3429_s1 + $0x8] sm:$0x30] }
  0x57   : > { %v649_v26 = vrot.slane %v546_v15, 1 }
  0x59   : > { %v650_v29 = vor.u32 %v649_v26, %v543_v25  ;;  %v2263_v26 = vor.u32 %v2487_v18, %v2262_v16 }
  0x5b   : > { %v692_v31 = vsel %vm2714_vm2, %v650_v29, 0  ;;  %v2504_v29 = vld [vmem:[%s3429_s1 + $0x10] sm:$0x30]  ;;  %v1218_v43 = vsel %vm1216_vm4, %v2263_v26, 0  ;;  %v496_v26 = vrot.slane %v494_v1, 7 }
  0x5c   : > { %1227 = vmatpush.bf16.msra.mxu0 %v1218_v43  ;;  %2584 = vmatpush.bf16.msra.mxu3 %v1218_v43 }
  0x5d   : > { %714 = vrot.lane.b32.xlu0 %v2877_v14, %s2608_s25  ;;  %762 = vrot.lane.b32.xlu1 %v691_v27, %s2609_s26  ;;  %v1443_v27 = vsel %vm1216_vm4, %v2347_v24, 0  ;;  %v2432_v24 = vld [vmem:[%s3429_s1 + $0x10] sm:$0xf] }
  0x5e   : > { %716 = vrot.lane.b32.xlu2 %v2909_v59, %s2608_s25  ;;  %1452 = vmatpush.bf16.msra.mxu1 %v1443_v27  ;;  %v2433_v35 = vor.u32 %v2504_v29, %v2432_v24  ;;  %v489_v29 = vrot.slane %v487_v3, 7  ;;  %v503_v3 = vrot.slane %v501_v5, 7 }
  0x60   : > { %v2958_v46 = vsel %vm1216_vm4, %v2433_v35, 0  ;;  %2585 = vmatpush.bf16.msrb.mxu3 %v1443_v27  ;;  %v492_v27 = vor.u32 %v490_v4, %v489_v29  ;;  %v510_v29 = vrot.slane %v508_v21, 7 }
  0x61   : > { %2348 = vmatmul.msk.bf16.vlgmr.msra.gmra.mxu1 %vm1167_vm5, %v2454_v32  ;;  %v457_v32 = vunpack.c.l.b16 %v393_v11  ;;  %1713 = vmatpush.bf16.msra.mxu2 %v2958_v46  ;;  %v330_v11 = vadd.f32 %v2665_v6, %v297_v53  ;;  %v573_v53 = vrot.slane %v571_v8, 7  ;;  %v506_v8 = vor.u32 %v504_v7, %v503_v3 }
  0x62   : > { %v617_v4 = vsel %vm2978_vm8, 0, %v492_v27 }
  0x63   : > { %v362_v18 = vmax.f32 %v330_v11, 0.0 }
  0x65   : > { %764 = vrot.lane.b32.xlu0 %v692_v31, %s2609_s26  ;;  %v456_v31 = vunpack.c.l.b16 %v392_v55  ;;  %v298_v55 = vmul.f32 %v2657_v0, %v2548_v42 }
  0x67   : > { %v2955_v45 = vpack.c.b16 %v457_v32, %v456_v31  ;;  %v331_v16 = vadd.f32 %v2665_v6, %v298_v55  ;;  %v394_v31 = vpack.c.bf16 %v362_v18, %v362_v18  ;;  %v499_v6 = vor.u32 %v497_v2, %v496_v26 }
  0x68   : > { %v576_v55 = vor.u32 %v574_v9, %v573_v53 }
  0x69   : > { %718 = vrot.lane.b32.xlu1 %v2955_v45, %s2608_s25  ;;  %v363_v24 = vmax.f32 %v331_v16, 0.0  ;;  %v458_v33 = vunpack.c.l.b16 %v394_v31  ;;  %v618_v2 = vsel %vm2978_vm8, 0, %v499_v6  ;;  %v553_v6 = vshll.u32 %v2955_v45, 16 }
  0x6a   : > { %v629_v21 = vsel %vm2978_vm8, 0, %v576_v55 }
  0x6b   : > { %v395_v0 = vpack.c.bf16 %v363_v24, %v363_v24 }
  0x6d   : > { %v459_v35 = vunpack.c.l.b16 %v395_v0 }
  0x6f   : > { %v2975_v43 = vpack.c.b16 %v459_v35, %v458_v33 }
  0x71   : > { %720 = vrot.lane.b32.xlu0 %v2975_v43, %s2608_s25  ;;  %v557_v56 = vshrl.u32 %v2975_v43, 16  ;;  %v560_v57 = vshll.u32 %v2975_v43, 16 }
  0x73   : > { %v653_v5 = vrot.slane %v560_v57, 1 }
  0x75   : > { %v654_v11 = vor.u32 %v653_v5, %v557_v56  ;;  %v651_v5 = vrot.slane %v553_v6, 1 }
  0x77   : > { %v694_v61 = vsel %vm2714_vm2, %v654_v11, 0  ;;  %v513_v11 = vor.u32 %v511_v22, %v510_v29 }
  0x78   : > { %v2952_v34 = vpop.permute.xlu2 %704  ;;  %768 = vrot.lane.b32.xlu1 %v694_v61, %s2609_s26 }
  0x80   : > { %v725_v32 = vpop.permute.xlu2 %724 }
  0x81   : > { %v819_v55 = vsel %vm780_vm9, %v629_v21, %v725_v32 }
  0x88   : > { %v707_v7 = vpop.permute.xlu2 %706 }
  0x8f   : > { %v703_v37 = vpop.permute.xlu0 %702  ;;  %v701_v42 = vpop.permute.xlu1 %700 }
  0x90   : > { %v786_v16 = vsel %vm780_vm9, %v618_v2, %v703_v37  ;;  %v783_v18 = vsel %vm780_vm9, %v617_v4, %v701_v42  ;;  %v619_v37 = vsel %vm2978_vm8, 0, %v506_v8  ;;  %v550_v42 = vshrl.u32 %v2955_v45, 16  ;;  %v775_v61 = vpop.permute.xlu2 %774 }
  0x91   : > { %v580_v2 = vrot.slane %v578_v19, 7  ;;  %v789_v8 = vsel %vm780_vm9, %v619_v37, %v2952_v34 }
  0x93   : > { %v583_v32 = vor.u32 %v581_v20, %v580_v2 }
  0x95   : > { %v630_v37 = vsel %vm2978_vm8, 0, %v583_v32 }
  0x97   : > { %v751_v24 = vpop.permute.xlu0 %750  ;;  %v749_v26 = vpop.permute.xlu1 %748 }
  0x98   : > { %v833_v31 = vsel %vm829_vm10, %v786_v16, %v751_v24  ;;  %v831_v60 = vsel %vm829_vm10, %v783_v18, %v749_v26  ;;  %v652_v16 = vor.u32 %v651_v5, %v550_v42 }
  0x99   : > { %v886_v9 = vunpack.c.l.b16 %v833_v31  ;;  %v887_v0 = vunpack.c.h.b16 %v833_v31  ;;  %v884_v33 = vunpack.c.l.b16 %v831_v60  ;;  %v885_v35 = vunpack.c.h.b16 %v831_v60 }
  0x9a   : > { %v693_v13 = vsel %vm2714_vm2, %v652_v16, 0  ;;  %v620_v60 = vsel %vm2978_vm8, 0, %v513_v11 }
  0x9b   : > { %v918_v27 = vpack.c.b16 %v886_v9, %v886_v9  ;;  %v919_v3 = vpack.c.b16 %v887_v0, %v887_v0  ;;  %v916_v53 = vpack.c.b16 %v884_v33, %v884_v33  ;;  %v917_v4 = vpack.c.b16 %v885_v35, %v885_v35  ;;  %766 = vrot.lane.b32.xlu2 %v693_v13, %s2609_s26 }
  0x9c   : > { %v792_v12 = vsel %vm780_vm9, %v620_v60, %v707_v7 }
  0x9d   : > { %983 = vst.msk [vmem:[#allocation2 + $0x10] sm:$0xf] %vm862_vm3, %v918_v27 }
  0x9e   : > { %984 = vst.msk [vmem:[#allocation2 + $0x14] sm:$0xf] %vm862_vm3, %v919_v3 }
  0x9f   : > { %981 = vst.msk [vmem:[#allocation2 + $0x8] sm:$0xf] %vm862_vm3, %v916_v53  ;;  %v753_v19 = vpop.permute.xlu0 %752  ;;  %v773_v18 = vpop.permute.xlu1 %772 }
  0xa0   : > { %982 = vst.msk [vmem:[#allocation2 + $0xc] sm:$0xf] %vm862_vm3, %v917_v4  ;;  %v835_v34 = vsel %vm829_vm10, %v789_v8, %v753_v19  ;;  %v855_v24 = vsel %vm829_vm10, %v819_v55, %v773_v18  ;;  %v520_v8 = vor.u32 %v518_v54, %v517_v62  ;;  %v587_v55 = vrot.slane %v585_v51, 7  ;;  %v757_v19 = vpop.permute.xlu2 %756 }
  0xa1   : > { %v888_v22 = vunpack.c.l.b16 %v835_v34  ;;  %v889_v26 = vunpack.c.h.b16 %v835_v34  ;;  %v908_v29 = vunpack.c.l.b16 %v855_v24  ;;  %v909_v31 = vunpack.c.h.b16 %v855_v24 }
  0xa2   : > { %v621_v13 = vsel %vm2978_vm8, 0, %v520_v8  ;;  %v590_v39 = vor.u32 %v588_v44, %v587_v55 }
  0xa3   : > { %v920_v9 = vpack.c.b16 %v888_v22, %v888_v22  ;;  %v921_v0 = vpack.c.b16 %v889_v26, %v889_v26  ;;  %v940_v33 = vpack.c.b16 %v908_v29, %v908_v29  ;;  %v941_v35 = vpack.c.b16 %v909_v31, %v909_v31 }
  0xa4   : > { %v524_v29 = vrot.slane %v522_v49, 7  ;;  %v631_v44 = vsel %vm2978_vm8, 0, %v590_v39 }
  0xa5   : > { %985 = vst.msk [vmem:[#allocation2 + $0x18] sm:$0xf] %vm862_vm3, %v920_v9  ;;  %v2488_v20 = vld [vmem:[#allocation2 + $0x10] sm:$0xff] }
  0xa6   : > { %986 = vst.msk [vmem:[#allocation2 + $0x1c] sm:$0xf] %vm862_vm3, %v921_v0  ;;  %2434 = vmatmul.msk.bf16.vlgmr.msra.gmra.mxu2 %vm1167_vm5, %v2488_v20  ;;  %v527_v62 = vor.u32 %v525_v40, %v524_v29  ;;  %v2456_v20 = vld [vmem:[#allocation2 + $0x10] sm:$0xff]  ;;  %v531_v40 = vrot.slane %v529_v47, 7 }
  0xa7   : > { %1005 = vst.msk [vmem:[#allocation2 + $0x68] sm:$0xf] %vm862_vm3, %v940_v33  ;;  %v2471_v21 = vld [vmem:[#allocation2 + $0x8] sm:$0xff]  ;;  %v727_v3 = vpop.permute.xlu0 %726  ;;  %v755_v53 = vpop.permute.xlu1 %754 }
  0xa8   : > { %v2455_v27 = vld [vmem:[#allocation2 + $0x8] sm:$0xff]  ;;  %1006 = vst.msk [vmem:[#allocation2 + $0x6c] sm:$0xf] %vm862_vm3, %v941_v35  ;;  %v822_v50 = vsel %vm780_vm9, %v630_v37, %v727_v3  ;;  %v837_v7 = vsel %vm829_vm10, %v792_v12, %v755_v53  ;;  %2264 = vmatmul.msk.bf16.vlgmr.msra.gmra.mxu0 %vm1167_vm5, %v2471_v21  ;;  %v731_v9 = vpop.permute.xlu2 %730  ;;  %v2472_v12 = vld [vmem:[#allocation2 + $0x10] sm:$0xff]  ;;  %v622_v48 = vsel %vm2978_vm8, 0, %v527_v62  ;;  %v534_v47 = vor.u32 %v532_v52, %v531_v40 }
  0xa9   : > { %2349 = vmatmul.msk.bf16.gmra.mxu1 %vm1167_vm5, %v2455_v27  ;;  %v857_v2 = vsel %vm829_vm10, %v822_v50, %v775_v61  ;;  %v890_v4 = vunpack.c.l.b16 %v837_v7  ;;  %v891_v5 = vunpack.c.h.b16 %v837_v7  ;;  %v566_v50 = vrot.slane %v564_v58, 7 }
  0xaa   : > { %v910_v11 = vunpack.c.l.b16 %v857_v2  ;;  %v911_v16 = vunpack.c.h.b16 %v857_v2 }
  0xab   : > { %v922_v18 = vpack.c.b16 %v890_v4, %v890_v4  ;;  %v923_v32 = vpack.c.b16 %v891_v5, %v891_v5  ;;  %v828_v5 = vsel %vm780_vm9, %v632_v10, %v731_v9  ;;  %v569_v58 = vor.u32 %v567_v38, %v566_v50 }
  0xac   : > { %v942_v34 = vpack.c.b16 %v910_v11, %v910_v11  ;;  %v943_v24 = vpack.c.b16 %v911_v16, %v911_v16  ;;  %v545_v50 = vrot.slane %v543_v25, 7 }
  0xad   : > { %987 = vst.msk [vmem:[#allocation2 + $0x20] sm:$0xf] %vm862_vm3, %v922_v18  ;;  %v2489_v35 = vld [vmem:[#allocation2 + $0x18] sm:$0xff]  ;;  %v628_v30 = vsel %vm2978_vm8, 0, %v569_v58 }
  0xae   : > { %1007 = vst.msk [vmem:[#allocation2 + $0x70] sm:$0xf] %vm862_vm3, %v942_v34 }
  0xaf   : > { %1008 = vst.msk [vmem:[#allocation2 + $0x74] sm:$0xf] %vm862_vm3, %v943_v24  ;;  %v2483_v51 = vld [vmem:[#allocation2 + $0x68] sm:$0xff]  ;;  %v709_v54 = vpop.permute.xlu0 %708  ;;  %v729_v22 = vpop.permute.xlu1 %728 }
  0xb0   : > { %988 = vst.msk [vmem:[#allocation2 + $0x24] sm:$0xf] %vm862_vm3, %v923_v32  ;;  %v795_v26 = vsel %vm780_vm9, %v621_v13, %v709_v54  ;;  %2276 = vmatmul.msk.bf16.vlgmr.msra.gmra.mxu3 %vm1167_vm5, %v2483_v51  ;;  %v825_v49 = vsel %vm780_vm9, %v631_v44, %v729_v22  ;;  %v713_v7 = vpop.permute.xlu2 %712  ;;  %v623_v32 = vsel %vm2978_vm8, 0, %v534_v47  ;;  %v2473_v22 = vld [vmem:[#allocation2 + $0x18] sm:$0xff] }
  0xb1   : > { %v839_v31 = vsel %vm829_vm10, %v795_v26, %v757_v19  ;;  %2586 = vmatpush.bf16.msra.mxu3 %v2958_v46  ;;  %v801_v54 = vsel %vm780_vm9, %v623_v32, %v713_v7  ;;  %v2457_v26 = vld [vmem:[#allocation2 + $0x18] sm:$0xff] }
  0xb2   : > { %v892_v60 = vunpack.c.l.b16 %v839_v31  ;;  %v893_v61 = vunpack.c.h.b16 %v839_v31 }
  0xb4   : > { %v924_v0 = vpack.c.b16 %v892_v60, %v892_v60  ;;  %v925_v33 = vpack.c.b16 %v893_v61, %v893_v61 }
  0xb6   : > { %989 = vst.msk [vmem:[#allocation2 + $0x28] sm:$0xf] %vm862_vm3, %v924_v0  ;;  %2435 = vmatmul.msk.bf16.gmra.mxu2 %vm1167_vm5, %v2489_v35  ;;  %v2484_v2 = vld [vmem:[#allocation2 + $0x70] sm:$0xff] }
  0xb7   : > { %v777_v37 = vpop.permute.xlu0 %776  ;;  %990 = vst.msk [vmem:[#allocation2 + $0x2c] sm:$0xf] %vm862_vm3, %v925_v33  ;;  %v711_v46 = vpop.permute.xlu1 %710  ;;  %v2490_v51 = vld [vmem:[#allocation2 + $0x20] sm:$0xff] }
  0xb8   : > { %v859_v21 = vsel %vm829_vm10, %v825_v49, %v777_v37  ;;  %2265 = vmatmul.msk.bf16.gmra.mxu0 %vm1167_vm5, %v2472_v12  ;;  %v798_v4 = vsel %vm780_vm9, %v622_v48, %v711_v46  ;;  %v771_v38 = vpop.permute.xlu2 %770  ;;  %v538_v12 = vrot.slane %v536_v23, 7  ;;  %v2458_v40 = vld [vmem:[#allocation2 + $0x20] sm:$0xff] }
  0xb9   : > { %2350 = vmatmul.msk.bf16.gmra.mxu1 %vm1167_vm5, %v2456_v20  ;;  %v912_v27 = vunpack.c.l.b16 %v859_v21  ;;  %v913_v28 = vunpack.c.h.b16 %v859_v21 }
  0xba   : > { %v541_v37 = vor.u32 %v539_v17, %v538_v12 }
  0xbb   : > { %v944_v3 = vpack.c.b16 %v912_v27, %v912_v27  ;;  %v945_v53 = vpack.c.b16 %v913_v28, %v913_v28  ;;  %v2474_v28 = vld [vmem:[#allocation2 + $0x20] sm:$0xff] }
  0xbc   : > { %v624_v21 = vsel %vm2978_vm8, 0, %v541_v37 }
  0xbd   : > { %1009 = vst.msk [vmem:[#allocation2 + $0x78] sm:$0xf] %vm862_vm3, %v944_v3 }
  0xbe   : > { %1010 = vst.msk [vmem:[#allocation2 + $0x7c] sm:$0xf] %vm862_vm3, %v945_v53  ;;  %v2491_v27 = vld [vmem:[#allocation2 + $0x28] sm:$0xff] }
  0xbf   : > { %v779_v8 = vpop.permute.xlu1 %778  ;;  %v759_v55 = vpop.permute.xlu0 %758 }
  0xc0   : > { %v861_v11 = vsel %vm829_vm10, %v828_v5, %v779_v8  ;;  %v841_v16 = vsel %vm829_vm10, %v798_v4, %v759_v55  ;;  %2277 = vmatmul.msk.bf16.gmra.mxu3 %vm1167_vm5, %v2484_v2  ;;  %v548_v2 = vor.u32 %v546_v15, %v545_v50  ;;  %v717_v5 = vpop.permute.xlu2 %716  ;;  %v2475_v55 = vld [vmem:[#allocation2 + $0x28] sm:$0xff] }
  0xc1   : > { %v914_v19 = vunpack.c.l.b16 %v861_v11  ;;  %v915_v18 = vunpack.c.h.b16 %v861_v11  ;;  %v894_v34 = vunpack.c.l.b16 %v841_v16  ;;  %v895_v24 = vunpack.c.h.b16 %v841_v16  ;;  %v2459_v11 = vld [vmem:[#allocation2 + $0x28] sm:$0xff] }
  0xc2   : > { %v625_v4 = vsel %vm2978_vm8, 0, %v548_v2 }
  0xc3   : > { %v946_v41 = vpack.c.b16 %v914_v19, %v914_v19  ;;  %v947_v52 = vpack.c.b16 %v915_v18, %v915_v18  ;;  %v926_v13 = vpack.c.b16 %v894_v34, %v894_v34  ;;  %v927_v39 = vpack.c.b16 %v895_v24, %v895_v24 }
  0xc4   : > { %v807_v8 = vsel %vm780_vm9, %v625_v4, %v717_v5  ;;  %v552_v34 = vrot.slane %v550_v42, 7 }
  0xc5   : > { %1011 = vst.msk [vmem:[#allocation2 + $0x80] sm:$0xf] %vm862_vm3, %v946_v41  ;;  %v2485_v20 = vld [vmem:[#allocation2 + $0x78] sm:$0xff] }
  0xc6   : > { %1012 = vst.msk [vmem:[#allocation2 + $0x84] sm:$0xf] %vm862_vm3, %v947_v52  ;;  %2436 = vmatmul.msk.bf16.gmra.mxu2 %vm1167_vm5, %v2490_v51  ;;  %v555_v24 = vor.u32 %v553_v6, %v552_v34  ;;  %v2469_v37 = vld [vmem:[#allocation2 + $0x78] sm:$0xff] }
  0xc7   : > { %991 = vst.msk [vmem:[#allocation2 + $0x30] sm:$0xf] %vm862_vm3, %v926_v13  ;;  %v723_v29 = vpop.permute.xlu0 %722  ;;  %v761_v31 = vpop.permute.xlu1 %760 }
  0xc8   : > { %992 = vst.msk [vmem:[#allocation2 + $0x34] sm:$0xf] %vm862_vm3, %v927_v39  ;;  %v816_v36 = vsel %vm780_vm9, %v628_v30, %v723_v29  ;;  %v843_v44 = vsel %vm829_vm10, %v801_v54, %v761_v31  ;;  %2266 = vmatmul.msk.bf16.gmra.mxu0 %vm1167_vm5, %v2473_v22  ;;  %v626_v13 = vsel %vm2978_vm8, 0, %v555_v24  ;;  %v2467_v30 = vld [vmem:[#allocation2 + $0x68] sm:$0xff] }
  0xc9   : > { %2351 = vmatmul.msk.bf16.gmra.mxu1 %vm1167_vm5, %v2457_v26  ;;  %v853_v60 = vsel %vm829_vm10, %v816_v36, %v771_v38  ;;  %v896_v61 = vunpack.c.l.b16 %v843_v44  ;;  %v897_v9 = vunpack.c.h.b16 %v843_v44  ;;  %v559_v26 = vrot.slane %v557_v56, 7 }
  0xca   : > { %v906_v0 = vunpack.c.l.b16 %v853_v60  ;;  %v907_v33 = vunpack.c.h.b16 %v853_v60 }
  0xcb   : > { %v928_v35 = vpack.c.b16 %v896_v61, %v896_v61  ;;  %v929_v63 = vpack.c.b16 %v897_v9, %v897_v9  ;;  %v562_v44 = vor.u32 %v560_v57, %v559_v26 }
  0xcc   : > { %v938_v49 = vpack.c.b16 %v906_v0, %v906_v0  ;;  %v939_v62 = vpack.c.b16 %v907_v33, %v907_v33 }
  0xcd   : > { %993 = vst.msk [vmem:[#allocation2 + $0x38] sm:$0xf] %vm862_vm3, %v928_v35  ;;  %v2486_v7 = vld [vmem:[#allocation2 + $0x80] sm:$0xff]  ;;  %v627_v61 = vsel %vm2978_vm8, 0, %v562_v44 }
  0xce   : > { %1003 = vst.msk [vmem:[#allocation2 + $0x60] sm:$0xf] %vm862_vm3, %v938_v49  ;;  %v2468_v49 = vld [vmem:[#allocation2 + $0x70] sm:$0xff] }
  0xcf   : > { %1004 = vst.msk [vmem:[#allocation2 + $0x64] sm:$0xf] %vm862_vm3, %v939_v62  ;;  %v715_v46 = vpop.permute.xlu0 %714  ;;  %v763_v48 = vpop.permute.xlu1 %762  ;;  %v2492_v47 = vld [vmem:[#allocation2 + $0x30] sm:$0xff] }
  0xd0   : > { %994 = vst.msk [vmem:[#allocation2 + $0x3c] sm:$0xf] %vm862_vm3, %v929_v63  ;;  %2278 = vmatmul.msk.bf16.gmra.mxu3 %vm1167_vm5, %v2485_v20  ;;  %v804_v23 = vsel %vm780_vm9, %v624_v21, %v715_v46  ;;  %v2476_v41 = vld [vmem:[#allocation2 + $0x30] sm:$0xff] }
  0xd1   : > { %v845_v10 = vsel %vm829_vm10, %v804_v23, %v763_v48  ;;  %v2460_v52 = vld [vmem:[#allocation2 + $0x30] sm:$0xff] }
  0xd2   : > { %v898_v14 = vunpack.c.l.b16 %v845_v10  ;;  %v899_v17 = vunpack.c.h.b16 %v845_v10 }
  0xd4   : > { %v930_v3 = vpack.c.b16 %v898_v14, %v898_v14  ;;  %v931_v53 = vpack.c.b16 %v899_v17, %v899_v17 }
  0xd6   : > { %2437 = vmatmul.msk.bf16.gmra.mxu2 %vm1167_vm5, %v2491_v27  ;;  %995 = vst.msk [vmem:[#allocation2 + $0x40] sm:$0xf] %vm862_vm3, %v930_v3  ;;  %v2466_v18 = vld [vmem:[#allocation2 + $0x60] sm:$0xff] }
  0xd7   : > { %996 = vst.msk [vmem:[#allocation2 + $0x44] sm:$0xf] %vm862_vm3, %v931_v53  ;;  %v765_v25 = vpop.permute.xlu0 %764  ;;  %v2493_v32 = vld [vmem:[#allocation2 + $0x38] sm:$0xff]  ;;  %v2500_v53 = vld [vmem:[#allocation2 + $0x70] sm:$0xff] }
  0xd8   : > { %2267 = vmatmul.msk.bf16.gmra.mxu0 %vm1167_vm5, %v2474_v28  ;;  %v847_v16 = vsel %vm829_vm10, %v807_v8, %v765_v25  ;;  %v2477_v31 = vld [vmem:[#allocation2 + $0x38] sm:$0xff] }
  0xd9   : > { %2352 = vmatmul.msk.bf16.gmra.mxu1 %vm1167_vm5, %v2458_v40  ;;  %v900_v59 = vunpack.c.l.b16 %v847_v16  ;;  %v901_v15 = vunpack.c.h.b16 %v847_v16  ;;  %v2461_v36 = vld [vmem:[#allocation2 + $0x38] sm:$0xff] }
  0xdb   : > { %v932_v58 = vpack.c.b16 %v900_v59, %v900_v59  ;;  %v933_v19 = vpack.c.b16 %v901_v15, %v901_v15  ;;  %v719_v42 = vpop.permute.xlu1 %718 }
  0xdc   : > { %v810_v39 = vsel %vm780_vm9, %v626_v13, %v719_v42 }
  0xdd   : > { %997 = vst.msk [vmem:[#allocation2 + $0x48] sm:$0xf] %vm862_vm3, %v932_v58 }
  0xde   : > { %998 = vst.msk [vmem:[#allocation2 + $0x4c] sm:$0xf] %vm862_vm3, %v933_v19  ;;  %v2494_v29 = vld [vmem:[#allocation2 + $0x40] sm:$0xff]  ;;  %v1454_v43 = vpop.f32.mrf.mxu1 }
  0xdf   : > { %v2478_v1 = vld [vmem:[#allocation2 + $0x40] sm:$0xff] }
  0xe0   : > { %2279 = vmatmul.msk.bf16.gmra.mxu3 %vm1167_vm5, %v2486_v7  ;;  %v2462_v12 = vld [vmem:[#allocation2 + $0x40] sm:$0xff] }
  0xe3   : > { %v721_v60 = vpop.permute.xlu0 %720 }
  0xe4   : > { %v813_v9 = vsel %vm780_vm9, %v627_v61, %v721_v60 }
  0xe5   : > { %v2495_v57 = vld [vmem:[#allocation2 + $0x48] sm:$0xff] }
  0xe6   : > { %2438 = vmatmul.msk.bf16.gmra.mxu2 %vm1167_vm5, %v2492_v47  ;;  %v1456_v20 = vpop.f32.mrf.mxu1  ;;  %v2479_v23 = vld [vmem:[#allocation2 + $0x48] sm:$0xff] }
  0xe7   : > { %v2463_v28 = vld [vmem:[#allocation2 + $0x48] sm:$0xff] }
  0xe8   : > { %2268 = vmatmul.msk.bf16.gmra.mxu0 %vm1167_vm5, %v2475_v55 }
  0xe9   : > { %2353 = vmatmul.msk.bf16.gmra.mxu1 %vm1167_vm5, %v2459_v11 }
  0xea   : > { %v769_v0 = vpop.permute.xlu1 %768 }
  0xeb   : > { %v851_v56 = vsel %vm829_vm10, %v813_v9, %v769_v0  ;;  %v2498_v0 = vld [vmem:[#allocation2 + $0x60] sm:$0xff] }
  0xec   : > { %v904_v33 = vunpack.c.l.b16 %v851_v56  ;;  %v905_v35 = vunpack.c.h.b16 %v851_v56 }
  0xee   : > { %v936_v62 = vpack.c.b16 %v904_v33, %v904_v33  ;;  %v937_v63 = vpack.c.b16 %v905_v35, %v905_v35 }
  0xf0   : > { %2360 = vmatmul.msk.bf16.vlgmr.msrb.gmra.mxu3 %vm1167_vm5, %v2466_v18  ;;  %1001 = vst.msk [vmem:[#allocation2 + $0x58] sm:$0xf] %vm862_vm3, %v936_v62 }
  0xf1   : > { %1002 = vst.msk [vmem:[#allocation2 + $0x5c] sm:$0xf] %vm862_vm3, %v937_v63 }
  0xf5   : > { %v767_v51 = vpop.permute.xlu2 %766 }
  0xf6   : > { %2439 = vmatmul.msk.bf16.gmra.mxu2 %vm1167_vm5, %v2493_v32  ;;  %v849_v54 = vsel %vm829_vm10, %v810_v39, %v767_v51 }
  0xf7   : > { %v902_v45 = vunpack.c.l.b16 %v849_v54  ;;  %v903_v6 = vunpack.c.h.b16 %v849_v54 }
  0xf8   : > { %2269 = vmatmul.msk.bf16.gmra.mxu0 %vm1167_vm5, %v2476_v41  ;;  %v2497_v5 = vld [vmem:[#allocation2 + $0x58] sm:$0xff] }
  0xf9   : > { %2354 = vmatmul.msk.bf16.gmra.mxu1 %vm1167_vm5, %v2460_v52  ;;  %v934_v38 = vpack.c.b16 %v902_v45, %v902_v45  ;;  %v935_v22 = vpack.c.b16 %v903_v6, %v903_v6  ;;  %v2465_v62 = vld [vmem:[#allocation2 + $0x58] sm:$0xff] }
  0xfb   : > { %999 = vst.msk [vmem:[#allocation2 + $0x50] sm:$0xf] %vm862_vm3, %v934_v38 }
  0xfc   : > { %1000 = vst.msk [vmem:[#allocation2 + $0x54] sm:$0xf] %vm862_vm3, %v935_v22 }
 0x100   : > { %2361 = vmatmul.msk.bf16.gmra.mxu3 %vm1167_vm5, %v2467_v30  ;;  %v2501_v30 = vld [vmem:[#allocation2 + $0x78] sm:$0xff] }
 0x103   : > { %v2496_v46 = vld [vmem:[#allocation2 + $0x50] sm:$0xff] }
 0x104   : > { %v2480_v59 = vld [vmem:[#allocation2 + $0x50] sm:$0xff] }
 0x105   : > { %v2464_v15 = vld [vmem:[#allocation2 + $0x50] sm:$0xff] }
 0x106   : > { %2440 = vmatmul.msk.bf16.gmra.mxu2 %vm1167_vm5, %v2494_v29 }
 0x108   : > { %2270 = vmatmul.msk.bf16.gmra.mxu0 %vm1167_vm5, %v2477_v31 }
 0x109   : > { %2355 = vmatmul.msk.bf16.gmra.mxu1 %vm1167_vm5, %v2461_v36 }
 0x110   : > { %2362 = vmatmul.msk.bf16.gmra.mxu3 %vm1167_vm5, %v2468_v49  ;;  %v2481_v49 = vld [vmem:[#allocation2 + $0x58] sm:$0xff] }
 0x116   : > { %2441 = vmatmul.msk.bf16.gmra.mxu2 %vm1167_vm5, %v2495_v57 }
 0x118   : > { %2271 = vmatmul.msk.bf16.gmra.mxu0 %vm1167_vm5, %v2478_v1 }
 0x119   : > { %2356 = vmatmul.msk.bf16.gmra.mxu1 %vm1167_vm5, %v2462_v12 }
 0x120   : > { %2363 = vmatmul.msk.bf16.gmra.mxu3 %vm1167_vm5, %v2469_v37 }
 0x125   : > { %v1229_v21 = vpop.f32.mrf.mxu0 }
 0x126   : > { %v1459_v27 = vpop.f32.mrf.mxu1  ;;  %2442 = vmatmul.msk.bf16.gmra.mxu2 %vm1167_vm5, %v2496_v46  ;;  %v1455_v40 = vadd.f32 %v1454_v43, %v1229_v21 }
 0x128   : > { %2272 = vmatmul.msk.bf16.gmra.mxu0 %vm1167_vm5, %v2479_v23 }
 0x129   : > { %2357 = vmatmul.msk.bf16.gmra.mxu1 %vm1167_vm5, %v2463_v28  ;;  %v1715_v48 = vpop.f32.mrf.mxu2 }
 0x12a   : > { %v1795_v10 = vadd.f32 %v1715_v48, %v1455_v40  ;;  %v2502_v48 = vld [vmem:[#allocation2 + $0x80] sm:$0xff] }
 0x12c   : > { %v1827_v14 = vpack.c.bf16 %v1795_v10, %v1795_v10 }
 0x12d   : > { %v1231_v17 = vpop.f32.mrf.mxu0 }
 0x12e   : > { %v1461_v3 = vpop.f32.mrf.mxu1  ;;  %1860 = vst.msk [vmem:[%s3196_s18] sm:$0xf] %vm1859_vm11, %v1827_v14  ;;  %v1457_v50 = vadd.f32 %v1456_v20, %v1231_v17  ;;  %v1892_v2 = vunpack.c.l.bf16 %v1827_v14 }
 0x130   : > { %2446 = vmatmul.msk.bf16.vlgmr.msra.gmra.mxu3 %vm1167_vm5, %v2500_v53  ;;  %v1993_v25 = vmul.f32 %v1892_v2, %v1892_v2  ;;  %v1924_v58 = vsel %vm780_vm9, %v1892_v2, 0.0 }
 0x131   : > { %v1717_v7 = vpop.f32.mrf.mxu2 }
 0x132   : > { %v1796_v4 = vadd.f32 %v1717_v7, %v1457_v50  ;;  %v2025_v41 = vsel %vm780_vm9, %v1993_v25, 0.0 }
 0x133   : > { %v3201_v47 = vpop.f32.mrf.mxu3 }
 0x134   : > { %v1828_v8 = vpack.c.bf16 %v1796_v4, %v1796_v4 }
 0x135   : > { %v1234_v55 = vpop.f32.mrf.mxu0 }
 0x136   : > { %v1464_v11 = vpop.f32.mrf.mxu1  ;;  %1861 = vst.msk [vmem:[%s3196_s18 + $0x4] sm:$0xf] %vm1859_vm11, %v1828_v8  ;;  %v1893_v16 = vunpack.c.l.bf16 %v1828_v8  ;;  %2443 = vmatmul.msk.bf16.gmra.mxu2 %vm1167_vm5, %v2497_v5  ;;  %v1460_v34 = vadd.f32 %v1459_v27, %v1234_v55  ;;  %v2499_v8 = vld [vmem:[#allocation2 + $0x68] sm:$0xff] }
 0x138   : > { %v1925_v19 = vsel %vm780_vm9, %v1893_v16, 0.0  ;;  %v1994_v18 = vmul.f32 %v1893_v16, %v1893_v16  ;;  %2273 = vmatmul.msk.bf16.gmra.mxu0 %vm1167_vm5, %v2480_v59  ;;  %v2482_v16 = vld [vmem:[#allocation2 + $0x60] sm:$0xff] }
 0x139   : > { %2358 = vmatmul.msk.bf16.gmra.mxu1 %vm1167_vm5, %v2464_v15  ;;  %v1926_v24 = vadd.f32 %v1925_v19, %v1924_v58  ;;  %v1720_v32 = vpop.f32.mrf.mxu2 }
 0x13a   : > { %v2026_v52 = vsel %vm780_vm9, %v1994_v18, 0.0  ;;  %v1797_v13 = vadd.f32 %v1720_v32, %v1460_v34 }
 0x13b   : > { %v2027_v42 = vadd.f32 %v2026_v52, %v2025_v41  ;;  %v3212_v39 = vpop.f32.mrf.mxu3 }
 0x13c   : > { %v1829_v51 = vpack.c.bf16 %v1797_v13, %v1797_v13  ;;  %v2503_v13 = vld [vmem:[#allocation2 + $0x88] sm:$0xff] }
 0x13d   : > { %v1236_v54 = vpop.f32.mrf.mxu0 }
 0x13e   : > { %v1466_v45 = vpop.f32.mrf.mxu1  ;;  %1862 = vst.msk [vmem:[%s3196_s18 + $0x8] sm:$0xf] %vm1859_vm11, %v1829_v51  ;;  %v1894_v6 = vunpack.c.l.bf16 %v1829_v51  ;;  %v1462_v26 = vadd.f32 %v1461_v3, %v1236_v54 }
 0x140   : > { %v1927_v38 = vsel %vm780_vm9, %v1894_v6, 0.0  ;;  %v1995_v22 = vmul.f32 %v1894_v6, %v1894_v6  ;;  %2447 = vmatmul.msk.bf16.gmra.mxu3 %vm1167_vm5, %v2501_v30 }
 0x141   : > { %v1928_v29 = vadd.f32 %v1927_v38, %v1926_v24  ;;  %v1722_v31 = vpop.f32.mrf.mxu2 }
 0x142   : > { %v2028_v36 = vsel %vm780_vm9, %v1995_v22, 0.0  ;;  %v1798_v44 = vadd.f32 %v1722_v31, %v1462_v26 }
 0x143   : > { %v2029_v60 = vadd.f32 %v2028_v36, %v2027_v42  ;;  %v3219_v61 = vpop.f32.mrf.mxu3 }
 0x144   : > { %v1830_v9 = vpack.c.bf16 %v1798_v44, %v1798_v44 }
 0x145   : > { %v1239_v56 = vpop.f32.mrf.mxu0 }
 0x146   : > { %v1469_v33 = vpop.f32.mrf.mxu1  ;;  %1863 = vst.msk [vmem:[%s3196_s18 + $0xc] sm:$0xf] %vm1859_vm11, %v1830_v9  ;;  %v1895_v35 = vunpack.c.l.bf16 %v1830_v9  ;;  %2444 = vmatmul.msk.bf16.gmra.mxu2 %vm1167_vm5, %v2498_v0  ;;  %v1465_v57 = vadd.f32 %v1464_v11, %v1239_v56 }
 0x148   : > { %v1929_v63 = vsel %vm780_vm9, %v1895_v35, 0.0  ;;  %v1996_v43 = vmul.f32 %v1895_v35, %v1895_v35  ;;  %2274 = vmatmul.msk.bf16.gmra.mxu0 %vm1167_vm5, %v2481_v49 }
 0x149   : > { %2359 = vmatmul.msk.bf16.gmra.mxu1 %vm1167_vm5, %v2465_v62  ;;  %v1930_v1 = vadd.f32 %v1929_v63, %v1928_v29  ;;  %v1725_v12 = vpop.f32.mrf.mxu2 }
 0x14a   : > { %v2030_v20 = vsel %vm780_vm9, %v1996_v43, 0.0  ;;  %v1799_v37 = vadd.f32 %v1725_v12, %v1465_v57 }
 0x14b   : > { %v2031_v46 = vadd.f32 %v2030_v20, %v2029_v60  ;;  %v3228_v21 = vpop.f32.mrf.mxu3 }
 0x14c   : > { %v1831_v27 = vpack.c.bf16 %v1799_v37, %v1799_v37 }
 0x14d   : > { %v1241_v23 = vpop.f32.mrf.mxu0 }
 0x14e   : > { %v1471_v28 = vpop.f32.mrf.mxu1  ;;  %1864 = vst.msk [vmem:[%s3196_s18 + $0x10] sm:$0xf] %vm1859_vm11, %v1831_v27  ;;  %v1896_v40 = vunpack.c.l.bf16 %v1831_v27  ;;  %v1467_v17 = vadd.f32 %v1466_v45, %v1241_v23 }
 0x150   : > { %v1931_v10 = vsel %vm780_vm9, %v1896_v40, 0.0  ;;  %v1997_v14 = vmul.f32 %v1896_v40, %v1896_v40  ;;  %2448 = vmatmul.msk.bf16.gmra.mxu3 %vm1167_vm5, %v2502_v48 }
 0x151   : > { %v1932_v3 = vadd.f32 %v1931_v10, %v1930_v1  ;;  %v1727_v53 = vpop.f32.mrf.mxu2 }
 0x152   : > { %v2032_v50 = vsel %vm780_vm9, %v1997_v14, 0.0  ;;  %v1800_v7 = vadd.f32 %v1727_v53, %v1467_v17 }
 0x153   : > { %v2033_v2 = vadd.f32 %v2032_v50, %v2031_v46  ;;  %v3235_v4 = vpop.f32.mrf.mxu3 }
 0x154   : > { %v1832_v5 = vpack.c.bf16 %v1800_v7, %v1800_v7 }
 0x155   : > { %v1244_v55 = vpop.f32.mrf.mxu0 }
 0x156   : > { %v1474_v11 = vpop.f32.mrf.mxu1  ;;  %1865 = vst.msk [vmem:[%s3196_s18 + $0x14] sm:$0xf] %vm1859_vm11, %v1832_v5  ;;  %v1897_v25 = vunpack.c.l.bf16 %v1832_v5  ;;  %2445 = vmatmul.msk.bf16.gmra.mxu2 %vm1167_vm5, %v2499_v8  ;;  %v1470_v58 = vadd.f32 %v1469_v33, %v1244_v55 }
 0x158   : > { %v1933_v59 = vsel %vm780_vm9, %v1897_v25, 0.0  ;;  %v1998_v15 = vmul.f32 %v1897_v25, %v1897_v25  ;;  %2275 = vmatmul.msk.bf16.gmra.mxu0 %vm1167_vm5, %v2482_v16 }
 0x159   : > { %v1934_v19 = vadd.f32 %v1933_v59, %v1932_v3  ;;  %v1730_v18 = vpop.f32.mrf.mxu2 }
 0x15a   : > { %v2034_v34 = vsel %vm780_vm9, %v1998_v15, 0.0  ;;  %v1801_v24 = vadd.f32 %v1730_v18, %v1470_v58 }
 0x15b   : > { %v2035_v32 = vadd.f32 %v2034_v34, %v2033_v2  ;;  %v3243_v41 = vpop.f32.mrf.mxu3 }
 0x15c   : > { %v1833_v52 = vpack.c.bf16 %v1801_v24, %v1801_v24 }
 0x15d   : > { %v1246_v42 = vpop.f32.mrf.mxu0 }
 0x15e   : > { %v1476_v51 = vpop.f32.mrf.mxu1  ;;  %1866 = vst.msk [vmem:[%s3196_s18 + $0x18] sm:$0xf] %vm1859_vm11, %v1833_v52  ;;  %v1898_v54 = vunpack.c.l.bf16 %v1833_v52  ;;  %v1472_v30 = vadd.f32 %v1471_v28, %v1246_v42 }
 0x160   : > { %v1935_v45 = vsel %vm780_vm9, %v1898_v54, 0.0  ;;  %v1999_v6 = vmul.f32 %v1898_v54, %v1898_v54  ;;  %2449 = vmatmul.msk.bf16.gmra.mxu3 %vm1167_vm5, %v2503_v13 }
 0x161   : > { %v1936_v38 = vadd.f32 %v1935_v45, %v1934_v19  ;;  %v1732_v22 = vpop.f32.mrf.mxu2 }
 0x162   : > { %v2036_v26 = vsel %vm780_vm9, %v1999_v6, 0.0  ;;  %v1802_v29 = vadd.f32 %v1732_v22, %v1472_v30 }
 0x163   : > { %v2037_v31 = vadd.f32 %v2036_v26, %v2035_v32  ;;  %v3250_v36 = vpop.f32.mrf.mxu3 }
 0x164   : > { %v1834_v44 = vpack.c.bf16 %v1802_v29, %v1802_v29 }
 0x165   : > { %v1249_v60 = vpop.f32.mrf.mxu0 }
 0x166   : > { %v1479_v9 = vpop.f32.mrf.mxu1  ;;  %1867 = vst.msk [vmem:[%s3196_s18 + $0x1c] sm:$0xf] %vm1859_vm11, %v1834_v44  ;;  %v1899_v0 = vunpack.c.l.bf16 %v1834_v44  ;;  %v1475_v35 = vadd.f32 %v1474_v11, %v1249_v60 }
 0x168   : > { %v1937_v56 = vsel %vm780_vm9, %v1899_v0, 0.0  ;;  %v2000_v33 = vmul.f32 %v1899_v0, %v1899_v0 }
 0x169   : > { %v1938_v49 = vadd.f32 %v1937_v56, %v1936_v38  ;;  %v1735_v62 = vpop.f32.mrf.mxu2 }
 0x16a   : > { %v2038_v63 = vsel %vm780_vm9, %v2000_v33, 0.0  ;;  %v1803_v43 = vadd.f32 %v1735_v62, %v1475_v35 }
 0x16b   : > { %v2039_v57 = vadd.f32 %v2038_v63, %v2037_v31  ;;  %v3256_v1 = vpop.f32.mrf.mxu3 }
 0x16c   : > { %v1835_v12 = vpack.c.bf16 %v1803_v43, %v1803_v43 }
 0x16d   : > { %v1251_v20 = vpop.f32.mrf.mxu0 }
 0x16e   : > { %v1481_v37 = vpop.f32.mrf.mxu1  ;;  %1868 = vst.msk [vmem:[%s3196_s18 + $0x20] sm:$0xf] %vm1859_vm11, %v1835_v12  ;;  %v1900_v46 = vunpack.c.l.bf16 %v1835_v12  ;;  %v1477_v28 = vadd.f32 %v1476_v51, %v1251_v20 }
 0x170   : > { %v1939_v27 = vsel %vm780_vm9, %v1900_v46, 0.0  ;;  %v2001_v23 = vmul.f32 %v1900_v46, %v1900_v46 }
 0x171   : > { %v1940_v40 = vadd.f32 %v1939_v27, %v1938_v49  ;;  %v1737_v48 = vpop.f32.mrf.mxu2 }
 0x172   : > { %v2040_v10 = vsel %vm780_vm9, %v2001_v23, 0.0  ;;  %v1804_v14 = vadd.f32 %v1737_v48, %v1477_v28 }
 0x173   : > { %v2041_v17 = vadd.f32 %v2040_v10, %v2039_v57  ;;  %v3262_v3 = vpop.f32.mrf.mxu3 }
 0x174   : > { %v1836_v53 = vpack.c.bf16 %v1804_v14, %v1804_v14 }
 0x175   : > { %v1254_v50 = vpop.f32.mrf.mxu0 }
 0x176   : > { %v1484_v7 = vpop.f32.mrf.mxu1  ;;  %1869 = vst.msk [vmem:[%s3196_s18 + $0x24] sm:$0xf] %vm1859_vm11, %v1836_v53  ;;  %v1901_v2 = vunpack.c.l.bf16 %v1836_v53  ;;  %v1480_v55 = vadd.f32 %v1479_v9, %v1254_v50 }
 0x178   : > { %v1941_v5 = vsel %vm780_vm9, %v1901_v2, 0.0  ;;  %v2002_v8 = vmul.f32 %v1901_v2, %v1901_v2 }
 0x179   : > { %v1942_v11 = vadd.f32 %v1941_v5, %v1940_v40  ;;  %v1740_v25 = vpop.f32.mrf.mxu2 }
 0x17a   : > { %v2042_v16 = vsel %vm780_vm9, %v2002_v8, 0.0  ;;  %v1805_v59 = vadd.f32 %v1740_v25, %v1480_v55 }
 0x17b   : > { %v2043_v15 = vadd.f32 %v2042_v16, %v2041_v17  ;;  %v3268_v58 = vpop.f32.mrf.mxu3 }
 0x17c   : > { %v1837_v19 = vpack.c.bf16 %v1805_v59, %v1805_v59 }
 0x17d   : > { %v1256_v18 = vpop.f32.mrf.mxu0 }
 0x17e   : > { %v1486_v34 = vpop.f32.mrf.mxu1  ;;  %1870 = vst.msk [vmem:[%s3196_s18 + $0x28] sm:$0xf] %vm1859_vm11, %v1837_v19  ;;  %v1902_v24 = vunpack.c.l.bf16 %v1837_v19  ;;  %v1482_v13 = vadd.f32 %v1481_v37, %v1256_v18 }
 0x180   : > { %v1943_v32 = vsel %vm780_vm9, %v1902_v24, 0.0  ;;  %v2003_v52 = vmul.f32 %v1902_v24, %v1902_v24 }
 0x181   : > { %v1944_v42 = vadd.f32 %v1943_v32, %v1942_v11  ;;  %v1742_v51 = vpop.f32.mrf.mxu2 }
 0x182   : > { %v2044_v54 = vsel %vm780_vm9, %v2003_v52, 0.0  ;;  %v1806_v45 = vadd.f32 %v1742_v51, %v1482_v13 }
 0x183   : > { %v2045_v6 = vadd.f32 %v2044_v54, %v2043_v15  ;;  %v3274_v30 = vpop.f32.mrf.mxu3 }
 0x184   : > { %v1838_v38 = vpack.c.bf16 %v1806_v45, %v1806_v45  ;;  %v1515_v45 = vadd.f32 %v3262_v3, %v3201_v47  ;;  %v1517_v47 = vadd.f32 %v3268_v58, %v3212_v39  ;;  %v1520_v39 = vadd.f32 %v3274_v30, %v3219_v61 }
 0x185   : > { %v1259_v22 = vpop.f32.mrf.mxu0 }
 0x186   : > { %v1489_v26 = vpop.f32.mrf.mxu1  ;;  %1871 = vst.msk [vmem:[%s3196_s18 + $0x2c] sm:$0xf] %vm1859_vm11, %v1838_v38  ;;  %v1903_v29 = vunpack.c.l.bf16 %v1838_v38  ;;  %v1485_v60 = vadd.f32 %v1484_v7, %v1259_v22 }
 0x188   : > { %v1945_v31 = vsel %vm780_vm9, %v1903_v29, 0.0  ;;  %v2004_v44 = vmul.f32 %v1903_v29, %v1903_v29 }
 0x189   : > { %v1946_v9 = vadd.f32 %v1945_v31, %v1944_v42  ;;  %v1745_v0 = vpop.f32.mrf.mxu2 }
 0x18a   : > { %v2046_v56 = vsel %vm780_vm9, %v2004_v44, 0.0  ;;  %v1807_v33 = vadd.f32 %v1745_v0, %v1485_v60 }
 0x18b   : > { %v2047_v35 = vadd.f32 %v2046_v56, %v2045_v6  ;;  %v3280_v49 = vpop.f32.mrf.mxu3 }
 0x18c   : > { %v1839_v62 = vpack.c.bf16 %v1807_v33, %v1807_v33 }
 0x18d   : > { %v1261_v63 = vpop.f32.mrf.mxu0 }
 0x18e   : > { %1872 = vst.msk [vmem:[%s3196_s18 + $0x30] sm:$0xf] %vm1859_vm11, %v1839_v62  ;;  %v1904_v43 = vunpack.c.l.bf16 %v1839_v62  ;;  %v1491_v57 = vpop.f32.mrf.mxu1  ;;  %v1487_v37 = vadd.f32 %v1486_v34, %v1261_v63 }
 0x190   : > { %v1947_v12 = vsel %vm780_vm9, %v1904_v43, 0.0  ;;  %v2005_v20 = vmul.f32 %v1904_v43, %v1904_v43 }
 0x191   : > { %v3285_v46 = vadd.f32 %v1947_v12, %v1946_v9  ;;  %v1747_v27 = vpop.f32.mrf.mxu2 }
 0x192   : > { %v2048_v23 = vsel %vm780_vm9, %v2005_v20, 0.0  ;;  %v1808_v28 = vadd.f32 %v1747_v27, %v1487_v37 }
 0x193   : > { %v3288_v40 = vadd.f32 %v2048_v23, %v2047_v35  ;;  %v3290_v48 = vpop.f32.mrf.mxu3 }
 0x194   : > { %v3292_v10 = vpack.c.bf16 %v1808_v28, %v1808_v28 }
 0x195   : > { %v1264_v14 = vpop.f32.mrf.mxu0 }
 0x196   : > { %1873 = vst.msk [vmem:[%s3196_s18 + $0x34] sm:$0xf] %vm1859_vm11, %v3292_v10  ;;  %v1490_v17 = vadd.f32 %v1489_v26, %v1264_v14  ;;  %v1494_v53 = vpop.f32.mrf.mxu1  ;;  %v1905_v30 = vunpack.c.l.bf16 %v3292_v10 }
 0x199   : > { %v1750_v50 = vpop.f32.mrf.mxu2 }
 0x19a   : > { %v1809_v7 = vadd.f32 %v1750_v50, %v1490_v17  ;;  %v1522_v17 = vadd.f32 %v3280_v49, %v3228_v21  ;;  %v1525_v49 = vadd.f32 %v3290_v48, %v3235_v4 }
 0x19b   : > { %v3297_v2 = vpop.f32.mrf.mxu3 }
 0x19c   : > { %v3299_v5 = vpack.c.bf16 %v1809_v7, %v1809_v7 }
 0x19d   : > { %v1266_v8 = vpop.f32.mrf.mxu0 }
 0x19e   : > { %1874 = vst.msk [vmem:[%s3196_s18 + $0x38] sm:$0xf] %vm1859_vm11, %v3299_v5  ;;  %v1492_v55 = vadd.f32 %v1491_v57, %v1266_v8  ;;  %v1496_v16 = vpop.f32.mrf.mxu1 }
 0x1a1   : > { %v1752_v11 = vpop.f32.mrf.mxu2 }
 0x1a2   : > { %v1810_v25 = vadd.f32 %v1752_v11, %v1492_v55  ;;  %v1906_v11 = vunpack.c.l.bf16 %v3299_v5 }
 0x1a3   : > { %v3304_v59 = vpop.f32.mrf.mxu3 }
 0x1a4   : > { %v1842_v15 = vpack.c.bf16 %v1810_v25, %v1810_v25 }
 0x1a5   : > { %v1269_v19 = vpop.f32.mrf.mxu0 }
 0x1a6   : > { %1875 = vst.msk [vmem:[%s3196_s18 + $0x3c] sm:$0xf] %vm1859_vm11, %v1842_v15  ;;  %v1495_v18 = vadd.f32 %v1494_v53, %v1269_v19  ;;  %v1499_v13 = vpop.f32.mrf.mxu1  ;;  %v1907_v19 = vunpack.c.l.bf16 %v1842_v15  ;;  %v1951_v15 = vsel %vm780_vm9, %v1906_v11, 0.0 }
 0x1a9   : > { %v1755_v34 = vpop.f32.mrf.mxu2 }
 0x1aa   : > { %v1811_v24 = vadd.f32 %v1755_v34, %v1495_v18  ;;  %v1949_v18 = vsel %vm780_vm9, %v1905_v30, 0.0  ;;  %v2007_v34 = vmul.f32 %v1906_v11, %v1906_v11 }
 0x1ab   : > { %v3308_v32 = vpop.f32.mrf.mxu3 }
 0x1ac   : > { %v1843_v52 = vpack.c.bf16 %v1811_v24, %v1811_v24 }
 0x1ad   : > { %v1271_v42 = vpop.f32.mrf.mxu0 }
 0x1ae   : > { %1876 = vst.msk [vmem:[%s3196_s18 + $0x40] sm:$0xf] %vm1859_vm11, %v1843_v52  ;;  %v1497_v51 = vadd.f32 %v1496_v16, %v1271_v42  ;;  %v1501_v44 = vpop.f32.mrf.mxu1  ;;  %v2006_v16 = vmul.f32 %v1905_v30, %v1905_v30  ;;  %v1908_v24 = vunpack.c.l.bf16 %v1843_v52  ;;  %v1953_v52 = vsel %vm780_vm9, %v1907_v19, 0.0 }
 0x1b1   : > { %v1757_v54 = vpop.f32.mrf.mxu2 }
 0x1b2   : > { %v1812_v6 = vadd.f32 %v1757_v54, %v1497_v51  ;;  %v2008_v54 = vmul.f32 %v1907_v19, %v1907_v19 }
 0x1b3   : > { %v1775_v38 = vpop.f32.mrf.mxu3 }
 0x1b4   : > { %v1844_v22 = vpack.c.bf16 %v1812_v6, %v1812_v6  ;;  %v1819_v26 = vadd.f32 %v1775_v38, %v1515_v45  ;;  %v1950_v38 = vadd.f32 %v1949_v18, %v3285_v46  ;;  %v1955_v46 = vsel %vm780_vm9, %v1908_v24, 0.0 }
 0x1b5   : > { %v1274_v29 = vpop.f32.mrf.mxu0 }
 0x1b6   : > { %1877 = vst.msk [vmem:[%s3196_s18 + $0x44] sm:$0xf] %vm1859_vm11, %v1844_v22  ;;  %v3316_v31 = vpack.c.bf16 %v1819_v26, %v1819_v26  ;;  %v1500_v60 = vadd.f32 %v1499_v13, %v1274_v29  ;;  %v1504_v43 = vpop.f32.mrf.mxu1  ;;  %v2050_v13 = vsel %vm780_vm9, %v2006_v16, 0.0  ;;  %v1909_v42 = vunpack.c.l.bf16 %v1844_v22 }
 0x1b7   : > { %v2052_v29 = vsel %vm780_vm9, %v2007_v34, 0.0 }
 0x1b8   : > { %1884 = vst.msk [vmem:[%s3196_s18 + $0x60] sm:$0xf] %vm1859_vm11, %v3316_v31 }
 0x1b9   : > { %v1760_v9 = vpop.f32.mrf.mxu2 }
 0x1ba   : > { %v1813_v3 = vadd.f32 %v1760_v9, %v1500_v60  ;;  %v2051_v60 = vadd.f32 %v2050_v13, %v3288_v40  ;;  %v1952_v9 = vadd.f32 %v1951_v15, %v1950_v38  ;;  %v1916_v38 = vunpack.c.l.bf16 %v3316_v31 }
 0x1bb   : > { %v1777_v0 = vpop.f32.mrf.mxu3 }
 0x1bc   : > { %v1845_v56 = vpack.c.bf16 %v1813_v3, %v1813_v3  ;;  %v1820_v33 = vadd.f32 %v1777_v0, %v1517_v47  ;;  %v2010_v47 = vmul.f32 %v1909_v42, %v1909_v42  ;;  %v2054_v3 = vsel %vm780_vm9, %v2008_v54, 0.0 }
 0x1bd   : > { %v1276_v35 = vpop.f32.mrf.mxu0 }
 0x1be   : > { %1878 = vst.msk [vmem:[%s3196_s18 + $0x48] sm:$0xf] %vm1859_vm11, %v1845_v56  ;;  %v3325_v62 = vpack.c.bf16 %v1820_v33, %v1820_v33  ;;  %v1502_v63 = vadd.f32 %v1501_v44, %v1276_v35  ;;  %v1506_v53 = vpop.f32.mrf.mxu1  ;;  %v1910_v4 = vunpack.c.l.bf16 %v1845_v56  ;;  %v2009_v44 = vmul.f32 %v1908_v24, %v1908_v24 }
 0x1bf   : > { %v1527_v33 = vadd.f32 %v3297_v2, %v3243_v41  ;;  %v2053_v35 = vadd.f32 %v2052_v29, %v2051_v60 }
 0x1c0   : > { %1885 = vst.msk [vmem:[%s3196_s18 + $0x64] sm:$0xf] %vm1859_vm11, %v3325_v62  ;;  %v2056_v40 = vsel %vm780_vm9, %v2009_v44, 0.0  ;;  %v1917_v44 = vunpack.c.l.bf16 %v3325_v62 }
 0x1c1   : > { %v1762_v57 = vpop.f32.mrf.mxu2 }
 0x1c2   : > { %v1814_v58 = vadd.f32 %v1762_v57, %v1502_v63  ;;  %v1954_v63 = vadd.f32 %v1953_v52, %v1952_v9 }
 0x1c3   : > { %v1780_v12 = vpop.f32.mrf.mxu3 }
 0x1c4   : > { %v1846_v20 = vpack.c.bf16 %v1814_v58, %v1814_v58  ;;  %v1821_v37 = vadd.f32 %v1780_v12, %v1520_v39  ;;  %v1957_v39 = vsel %vm780_vm9, %v1909_v42, 0.0 }
 0x1c5   : > { %v1279_v27 = vpop.f32.mrf.mxu0 }
 0x1c6   : > { %1879 = vst.msk [vmem:[%s3196_s18 + $0x4c] sm:$0xf] %vm1859_vm11, %v1846_v20  ;;  %v3334_v23 = vpack.c.bf16 %v1821_v37, %v1821_v37  ;;  %v1505_v28 = vadd.f32 %v1504_v43, %v1279_v27  ;;  %v1509_v48 = vpop.f32.mrf.mxu1  ;;  %v1911_v0 = vunpack.c.l.bf16 %v1846_v20  ;;  %v2011_v43 = vmul.f32 %v1910_v4, %v1910_v4 }
 0x1c7   : > { %v2055_v37 = vadd.f32 %v2054_v3, %v2053_v35  ;;  %v1956_v20 = vadd.f32 %v1955_v46, %v1954_v63  ;;  %v2058_v27 = vsel %vm780_vm9, %v2010_v47, 0.0  ;;  %v2017_v46 = vmul.f32 %v1916_v38, %v1916_v38 }
 0x1c8   : > { %1886 = vst.msk [vmem:[%s3196_s18 + $0x68] sm:$0xf] %vm1859_vm11, %v3334_v23 }
 0x1c9   : > { %v1765_v14 = vpop.f32.mrf.mxu2  ;;  %v2057_v30 = vadd.f32 %v2056_v40, %v2055_v37  ;;  %v1532_v40 = vadd.f32 %v3308_v32, %v3256_v1  ;;  %v2072_v37 = vsel %vm780_vm9, %v2017_v46, 0.0 }
 0x1ca   : > { %v1815_v61 = vadd.f32 %v1765_v14, %v1505_v28  ;;  %v1959_v28 = vsel %vm780_vm9, %v1910_v4, 0.0 }
 0x1cb   : > { %v1782_v50 = vpop.f32.mrf.mxu3  ;;  %v2059_v19 = vadd.f32 %v2058_v27, %v2057_v30 }
 0x1cc   : > { %v1847_v7 = vpack.c.bf16 %v1815_v61, %v1815_v61  ;;  %v1822_v8 = vadd.f32 %v1782_v50, %v1522_v17  ;;  %v2012_v17 = vmul.f32 %v1911_v0, %v1911_v0  ;;  %v2060_v50 = vsel %vm780_vm9, %v2011_v43, 0.0 }
 0x1cd   : > { %v1281_v55 = vpop.f32.mrf.mxu0  ;;  %v2061_v13 = vadd.f32 %v2060_v50, %v2059_v19  ;;  %v2018_v43 = vmul.f32 %v1917_v44, %v1917_v44 }
 0x1ce   : > { %1880 = vst.msk [vmem:[%s3196_s18 + $0x50] sm:$0xf] %vm1859_vm11, %v1847_v7  ;;  %v3345_v25 = vpack.c.bf16 %v1822_v8, %v1822_v8  ;;  %v1507_v21 = vadd.f32 %v1506_v53, %v1281_v55  ;;  %v1912_v58 = vunpack.c.l.bf16 %v1847_v7  ;;  %v1958_v53 = vadd.f32 %v1957_v39, %v1956_v20 }
 0x1cf   : > { %v1961_v7 = vsel %vm780_vm9, %v1911_v0, 0.0  ;;  %v1971_v39 = vsel %vm780_vm9, %v1916_v38, 0.0  ;;  %v2074_v1 = vsel %vm780_vm9, %v2018_v43, 0.0 }
 0x1d0   : > { %1887 = vst.msk [vmem:[%s3196_s18 + $0x6c] sm:$0xf] %vm1859_vm11, %v3345_v25  ;;  %v2013_v55 = vmul.f32 %v1912_v58, %v1912_v58  ;;  %v1963_v18 = vsel %vm780_vm9, %v1912_v58, 0.0  ;;  %v1919_v58 = vunpack.c.l.bf16 %v3345_v25 }
 0x1d1   : > { %v1767_v10 = vpop.f32.mrf.mxu2 }
 0x1d2   : > { %v1816_v5 = vadd.f32 %v1767_v10, %v1507_v21  ;;  %v1960_v21 = vadd.f32 %v1959_v28, %v1958_v53  ;;  %v2062_v10 = vsel %vm780_vm9, %v2012_v17, 0.0  ;;  %v2064_v15 = vsel %vm780_vm9, %v2013_v55, 0.0 }
 0x1d3   : > { %v1785_v51 = vpop.f32.mrf.mxu3  ;;  %v2063_v4 = vadd.f32 %v2062_v10, %v2061_v13  ;;  %v1973_v28 = vsel %vm780_vm9, %v1917_v44, 0.0  ;;  %v1977_v55 = vsel %vm780_vm9, %v1919_v58, 0.0 }
 0x1d4   : > { %v1848_v45 = vpack.c.bf16 %v1816_v5, %v1816_v5  ;;  %v1823_v6 = vadd.f32 %v1785_v51, %v1525_v49  ;;  %v1511_v49 = vpop.f32.mrf.mxu1  ;;  %v1530_v5 = vadd.f32 %v3304_v59, %v3250_v36  ;;  %v1962_v42 = vadd.f32 %v1961_v7, %v1960_v21 }
 0x1d5   : > { %v1284_v26 = vpop.f32.mrf.mxu0  ;;  %v2065_v60 = vadd.f32 %v2064_v15, %v2063_v4 }
 0x1d6   : > { %1881 = vst.msk [vmem:[%s3196_s18 + $0x54] sm:$0xf] %vm1859_vm11, %v1848_v45  ;;  %v3360_v22 = vpack.c.bf16 %v1823_v6, %v1823_v6  ;;  %v1510_v56 = vadd.f32 %v1509_v48, %v1284_v26  ;;  %v1913_v41 = vunpack.c.l.bf16 %v1848_v45  ;;  %v1964_v48 = vadd.f32 %v1963_v18, %v1962_v42 }
 0x1d8   : > { %1888 = vst.msk [vmem:[%s3196_s18 + $0x70] sm:$0xf] %vm1859_vm11, %v3360_v22  ;;  %v2014_v34 = vmul.f32 %v1913_v41, %v1913_v41  ;;  %v1965_v54 = vsel %vm780_vm9, %v1913_v41, 0.0  ;;  %v1920_v17 = vunpack.c.l.bf16 %v3360_v22 }
 0x1d9   : > { %v1770_v57 = vpop.f32.mrf.mxu2  ;;  %v1966_v9 = vadd.f32 %v1965_v54, %v1964_v48 }
 0x1da   : > { %v1817_v12 = vadd.f32 %v1770_v57, %v1510_v56  ;;  %v2066_v29 = vsel %vm780_vm9, %v2014_v34, 0.0  ;;  %v1979_v10 = vsel %vm780_vm9, %v1920_v17, 0.0 }
 0x1db   : > { %v1787_v14 = vpop.f32.mrf.mxu3  ;;  %v2067_v0 = vadd.f32 %v2066_v29, %v2065_v60 }
 0x1dc   : > { %v1849_v2 = vpack.c.bf16 %v1817_v12, %v1817_v12  ;;  %v1824_v61 = vadd.f32 %v1787_v14, %v1527_v33  ;;  %v1918_v33 = vunpack.c.l.bf16 %v3334_v23 }
 0x1dd   : > { %v1286_v8 = vpop.f32.mrf.mxu0 }
 0x1de   : > { %1882 = vst.msk [vmem:[%s3196_s18 + $0x58] sm:$0xf] %vm1859_vm11, %v1849_v2  ;;  %v1914_v11 = vunpack.c.l.bf16 %v1849_v2  ;;  %v1856_v16 = vpack.c.bf16 %v1824_v61, %v1824_v61  ;;  %v1512_v24 = vadd.f32 %v1511_v49, %v1286_v8  ;;  %v2019_v14 = vmul.f32 %v1918_v33, %v1918_v33 }
 0x1df   : > { %v1975_v25 = vsel %vm780_vm9, %v1918_v33, 0.0  ;;  %v2020_v61 = vmul.f32 %v1919_v58, %v1919_v58 }
 0x1e0   : > { %1889 = vst.msk [vmem:[%s3196_s18 + $0x74] sm:$0xf] %vm1859_vm11, %v1856_v16  ;;  %v2015_v45 = vmul.f32 %v1914_v11, %v1914_v11  ;;  %v1967_v52 = vsel %vm780_vm9, %v1914_v11, 0.0  ;;  %v1921_v30 = vunpack.c.l.bf16 %v1856_v16  ;;  %v2076_v7 = vsel %vm780_vm9, %v2019_v14, 0.0 }
 0x1e1   : > { %v1772_v51 = vpop.f32.mrf.mxu2  ;;  %v1968_v56 = vadd.f32 %v1967_v52, %v1966_v9  ;;  %v2021_v11 = vmul.f32 %v1920_v17, %v1920_v17  ;;  %v2078_v49 = vsel %vm780_vm9, %v2020_v61, 0.0 }
 0x1e2   : > { %v1818_v6 = vadd.f32 %v1772_v51, %v1512_v24  ;;  %v2068_v47 = vsel %vm780_vm9, %v2015_v45, 0.0  ;;  %v2022_v18 = vmul.f32 %v1921_v30, %v1921_v30  ;;  %v1981_v13 = vsel %vm780_vm9, %v1921_v30, 0.0 }
 0x1e3   : > { %v1790_v26 = vpop.f32.mrf.mxu3  ;;  %v2069_v62 = vadd.f32 %v2068_v47, %v2067_v0 }
 0x1e4   : > { %v1850_v36 = vpack.c.bf16 %v1818_v6, %v1818_v6  ;;  %v1825_v59 = vadd.f32 %v1790_v26, %v1530_v5  ;;  %v2080_v5 = vsel %vm780_vm9, %v2021_v11, 0.0  ;;  %v2082_v54 = vsel %vm780_vm9, %v2022_v18, 0.0 }
 0x1e6   : > { %1883 = vst.msk [vmem:[%s3196_s18 + $0x5c] sm:$0xf] %vm1859_vm11, %v1850_v36  ;;  %v1915_v3 = vunpack.c.l.bf16 %v1850_v36  ;;  %v1857_v31 = vpack.c.bf16 %v1825_v59, %v1825_v59 }
 0x1e8   : > { %v1969_v35 = vsel %vm780_vm9, %v1915_v3, 0.0  ;;  %v2016_v63 = vmul.f32 %v1915_v3, %v1915_v3  ;;  %1890 = vst.msk [vmem:[%s3196_s18 + $0x78] sm:$0xf] %vm1859_vm11, %v1857_v31  ;;  %v1922_v19 = vunpack.c.l.bf16 %v1857_v31 }
 0x1e9   : > { %v1970_v57 = vadd.f32 %v1969_v35, %v1968_v56 }
 0x1ea   : > { %v2070_v12 = vsel %vm780_vm9, %v2016_v63, 0.0  ;;  %v2023_v42 = vmul.f32 %v1922_v19, %v1922_v19  ;;  %v1983_v45 = vsel %vm780_vm9, %v1922_v19, 0.0 }
 0x1eb   : > { %v1972_v23 = vadd.f32 %v1971_v39, %v1970_v57  ;;  %v2071_v20 = vadd.f32 %v2070_v12, %v2069_v62  ;;  %v1792_v27 = vpop.f32.mrf.mxu3 }
 0x1ec   : > { %v1826_v41 = vadd.f32 %v1792_v27, %v1532_v40  ;;  %v2084_v48 = vsel %vm780_vm9, %v2023_v42, 0.0 }
 0x1ed   : > { %v1974_v32 = vadd.f32 %v1973_v28, %v1972_v23  ;;  %v2073_v2 = vadd.f32 %v2072_v37, %v2071_v20 }
 0x1ee   : > { %v1858_v53 = vpack.c.bf16 %v1826_v41, %v1826_v41 }
 0x1ef   : > { %v1976_v50 = vadd.f32 %v1975_v25, %v1974_v32  ;;  %v2075_v8 = vadd.f32 %v2074_v1, %v2073_v2 }
 0x1f0   : > { %1891 = vst.msk [vmem:[%s3196_s18 + $0x7c] sm:$0xf] %vm1859_vm11, %v1858_v53  ;;  %v1923_v34 = vunpack.c.l.bf16 %v1858_v53 }
 0x1f1   : > { %v2077_v22 = vadd.f32 %v2076_v7, %v2075_v8  ;;  %v1978_v21 = vadd.f32 %v1977_v55, %v1976_v50 }
 0x1f2   : > { %v2024_v6 = vmul.f32 %v1923_v34, %v1923_v34  ;;  %v1985_v26 = vsel %vm780_vm9, %v1923_v34, 0.0 }
 0x1f3   : > { %v1980_v16 = vadd.f32 %v1979_v10, %v1978_v21  ;;  %v2079_v24 = vadd.f32 %v2078_v49, %v2077_v22 }
 0x1f4   : > { %v2086_v36 = vsel %vm780_vm9, %v2024_v6, 0.0 }
 0x1f5   : > { %v1982_v51 = vadd.f32 %v1981_v13, %v1980_v16  ;;  %v2081_v15 = vadd.f32 %v2080_v5, %v2079_v24 }
 0x1f7   : > { %v1984_v38 = vadd.f32 %v1983_v45, %v1982_v51  ;;  %v2083_v4 = vadd.f32 %v2082_v54, %v2081_v15 }
 0x1f9   : > { %v2085_v29 = vadd.f32 %v2084_v48, %v2083_v4  ;;  %v1986_v52 = vadd.f32 %v1985_v26, %v1984_v38 }
 0x1fb   : > { %v1987_v59 = vrot.slane %v1986_v52, 4  ;;  %v2087_v44 = vadd.f32 %v2086_v36, %v2085_v29 }
 0x1fd   : > { %v1988_v60 = vadd.f32 %v1987_v59, %v1986_v52  ;;  %v2088_v9 = vrot.slane %v2087_v44, 4 }
 0x1ff   : > { %v1989_v47 = vrot.slane %v1988_v60, 2  ;;  %v2089_v3 = vadd.f32 %v2088_v9, %v2087_v44 }
 0x201   : > { %v1990_v31 = vadd.f32 %v1989_v47, %v1988_v60  ;;  %v2090_v46 = vrot.slane %v2089_v3, 2 }
 0x203   : > { %v1991_v0 = vrot.slane %v1990_v31, 1  ;;  %v2091_v56 = vadd.f32 %v2090_v46, %v2089_v3 }
 0x205   : > { %v2092_v33 = vrot.slane %v2091_v56, 1  ;;  %v1992_v35 = vadd.f32 %v1991_v0, %v1990_v31 }
 0x207   : > { %v2093_v63 = vadd.f32 %v2092_v33, %v2091_v56 }
 0x209   : > { %v2095_v43 = vsel %vm614_vm6, %v1992_v35, %v2093_v63 }
 0x20a   : > { %2097 = vst.msk [vmem:[%s208_s21] sm:$0x3] %vm2096_vm12, %v2095_v43 }
 0x20b PF: > { %s15_s15 = sadd.s32 1, %s2606_s15  }
 0x20c   : > { %p12_p4 = scmp.ge.s32.totalorder %s15_s15, 4  }
 0x20e   :  { %14 = sbr.rel (!%p12_p4) target bundleno = 1 (0x1), region = 79 }

// kernel: bottleneck_forward.7
= control target key start
LH: loop header
LB: loop body
LE: loop exit
PB: predicated region body
PF: predicated region fallthrough
CT: control target
= control target key end

     0   :  { %vm475_vm0 = vcmask 1041408   ;;  %vm378_vm1 = vcmask 31744   ;;  %vm972_vm2 = vcmask 130048   ;;  %s2124_s2 = inlined_call_operand.vmem [shape: bf16[4,16], index: 2, kind: input, shape index: {}]   ;;  %s2125_s0 = inlined_call_operand.vmem [shape: bf16[512,4], index: 0, kind: input, shape index: {}]   ;;  %s2126_s3 = inlined_call_operand.vmem [shape: f32[2,4], index: 3, kind: input, shape index: {}]   ;;  %s2127_s4 = inlined_call_operand.vmem [shape: f32[2,16], index: 4, kind: input, shape index: {}]   ;;  %s2128_s1 = inlined_call_operand.vmem [shape: f32[512,16], index: 1, kind: input, shape index: {}]   ;;  %s2129_s5 = inlined_call_operand.vmem [shape: f32[512,16], index: 5, kind: output, shape index: {}]  }
   0x1   :  { %v377_v0 = vld [vmem:[%s2124_s2] sm:$0x3]  ;;  %v1201_v28 = vld [vmem:[%s2125_s0 + $0x8] sm:$0xff]  }
   0x2   :  { %v1074_v1 = vld [vmem:[%s2125_s0] sm:$0xff]   ;;  %v477_v2 = vsel %vm475_vm0, %v377_v0, 0  ;;  %v1209_v37 = vld [vmem:[%s2125_s0 + $0x48] sm:$0xff]   ;;  %v1079_v41 = vunpack.c.l.bf16 %v1201_v28  ;;  %v1080_v46 = vunpack.c.h.bf16 %v1201_v28 }
   0x3   :  { %v1075_v3 = vunpack.c.l.bf16 %v1074_v1  ;;  %v1076_v4 = vunpack.c.h.bf16 %v1074_v1  ;;  %v1278_v5 = vld [vmem:[%s2126_s3] ss:$0 sm:$0xff]  ;;  %486 = vmatpush.bf16.msra.mxu0 %v477_v2  ;;  %1232 = vmatpush.bf16.msra.mxu1 %v477_v2  ;;  %v1286_v7 = vld [vmem:[%s2126_s3 + $0x1] ss:$0 sm:$0xff]  ;;  %v1217_v42 = vld [vmem:[%s2125_s0 + $0x88] sm:$0xff]   ;;  %v1111_v50 = vunpack.c.l.bf16 %v1209_v37  ;;  %v1112_v51 = vunpack.c.h.bf16 %v1209_v37 }
   0x4   :  { %v1208_v6 = vld [vmem:[%s2125_s0 + $0x40] sm:$0xff]   ;;  %1233 = vmatpush.bf16.msra.mxu2 %v477_v2  ;;  %1234 = vmatpush.bf16.msra.mxu3 %v477_v2  ;;  %v1225_v47 = vld [vmem:[%s2125_s0 + $0xc8] sm:$0xff]   ;;  %v153_v49 = vmul.f32 %v1278_v5, %v1079_v41  ;;  %v154_v53 = vmul.f32 %v1278_v5, %v1080_v46  ;;  %v1143_v54 = vunpack.c.l.bf16 %v1217_v42  ;;  %v1144_v55 = vunpack.c.h.bf16 %v1217_v42 }
   0x5   :  { %v1107_v8 = vunpack.c.l.bf16 %v1208_v6  ;;  %v1108_v9 = vunpack.c.h.bf16 %v1208_v6  ;;  %v1216_v10 = vld [vmem:[%s2125_s0 + $0x80] sm:$0xff]   ;;  %v151_v12 = vmul.f32 %v1278_v5, %v1075_v3  ;;  %v152_v13 = vmul.f32 %v1278_v5, %v1076_v4 }
   0x6   :  { %v1224_v11 = vld [vmem:[%s2125_s0 + $0xc0] sm:$0xff]   ;;  %v1139_v14 = vunpack.c.l.bf16 %v1216_v10  ;;  %v1140_v15 = vunpack.c.h.bf16 %v1216_v10  ;;  %v169_v56 = vmul.f32 %v1278_v5, %v1111_v50  ;;  %v170_v57 = vmul.f32 %v1278_v5, %v1112_v51 }
   0x7   :  { %v167_v16 = vmul.f32 %v1278_v5, %v1107_v8  ;;  %v168_v17 = vmul.f32 %v1278_v5, %v1108_v9  ;;  %v1171_v18 = vunpack.c.l.bf16 %v1224_v11  ;;  %v1172_v19 = vunpack.c.h.bf16 %v1224_v11 }
   0x8   :  { %v217_v20 = vadd.f32 %v1286_v7, %v151_v12  ;;  %v218_v21 = vadd.f32 %v1286_v7, %v152_v13  ;;  %v183_v22 = vmul.f32 %v1278_v5, %v1139_v14  ;;  %v184_v23 = vmul.f32 %v1278_v5, %v1140_v15  ;;  %v1202_v14 = vld [vmem:[%s2125_s0 + $0x10] sm:$0xff]  }
   0x9   :  { %v233_v24 = vadd.f32 %v1286_v7, %v167_v16  ;;  %v234_v25 = vadd.f32 %v1286_v7, %v168_v17  ;;  %v199_v26 = vmul.f32 %v1278_v5, %v1171_v18  ;;  %v200_v27 = vmul.f32 %v1278_v5, %v1172_v19  ;;  %v1210_v17 = vld [vmem:[%s2125_s0 + $0x50] sm:$0xff]  }
   0xa   :  { %v281_v29 = vmax.f32 %v217_v20, 0.0  ;;  %v282_v30 = vmax.f32 %v218_v21, 0.0  ;;  %v249_v31 = vadd.f32 %v1286_v7, %v183_v22  ;;  %v250_v32 = vadd.f32 %v1286_v7, %v184_v23  ;;  %v1218_v20 = vld [vmem:[%s2125_s0 + $0x90] sm:$0xff]  }
   0xb   :  { %v297_v33 = vmax.f32 %v233_v24, 0.0  ;;  %v298_v34 = vmax.f32 %v234_v25, 0.0  ;;  %v265_v35 = vadd.f32 %v1286_v7, %v199_v26  ;;  %v266_v36 = vadd.f32 %v1286_v7, %v200_v27  ;;  %v1226_v24 = vld [vmem:[%s2125_s0 + $0xd0] sm:$0xff]  }
   0xc   :  { %v345_v38 = vpack.c.bf16 %v282_v30, %v281_v29  ;;  %v313_v39 = vmax.f32 %v249_v31, 0.0  ;;  %v314_v40 = vmax.f32 %v250_v32, 0.0  ;;  %v1175_v58 = vunpack.c.l.bf16 %v1225_v47 }
   0xd   :  { %v353_v43 = vpack.c.bf16 %v298_v34, %v297_v33  ;;  %v329_v44 = vmax.f32 %v265_v35, 0.0  ;;  %v330_v45 = vmax.f32 %v266_v36, 0.0  ;;  %v185_v59 = vmul.f32 %v1278_v5, %v1143_v54  ;;  %v1203_v54 = vld [vmem:[%s2125_s0 + $0x18] sm:$0xff]  }
   0xe   :  { %1041 = vmatmul.msk.bf16.vlgmr.msra.gmra.mxu0 %vm378_vm1, %v345_v38  ;;  %v361_v48 = vpack.c.bf16 %v314_v40, %v313_v39  ;;  %v186_v60 = vmul.f32 %v1278_v5, %v1144_v55  ;;  %v1176_v61 = vunpack.c.h.bf16 %v1225_v47  ;;  %v219_v62 = vadd.f32 %v1286_v7, %v153_v49 }
   0xf   :  { %1049 = vmatmul.msk.bf16.vlgmr.msra.gmra.mxu1 %vm378_vm1, %v353_v43  ;;  %v369_v52 = vpack.c.bf16 %v330_v45, %v329_v44  ;;  %v220_v63 = vadd.f32 %v1286_v7, %v154_v53  ;;  %v201_v0 = vmul.f32 %v1278_v5, %v1175_v58  ;;  %v235_v1 = vadd.f32 %v1286_v7, %v169_v56 }
  0x10   :  { %1057 = vmatmul.msk.bf16.vlgmr.msra.gmra.mxu2 %vm378_vm1, %v361_v48  ;;  %v236_v2 = vadd.f32 %v1286_v7, %v170_v57  ;;  %v202_v3 = vmul.f32 %v1278_v5, %v1176_v61  ;;  %v251_v4 = vadd.f32 %v1286_v7, %v185_v59  ;;  %v252_v6 = vadd.f32 %v1286_v7, %v186_v60  ;;  %v1211_v57 = vld [vmem:[%s2125_s0 + $0x58] sm:$0xff]  }
  0x11   :  { %1065 = vmatmul.msk.bf16.vlgmr.msra.gmra.mxu3 %vm378_vm1, %v369_v52  ;;  %v267_v8 = vadd.f32 %v1286_v7, %v201_v0  ;;  %v283_v10 = vmax.f32 %v219_v62, 0.0  ;;  %v284_v11 = vmax.f32 %v220_v63, 0.0  ;;  %v299_v12 = vmax.f32 %v235_v1, 0.0  ;;  %v1219_v60 = vld [vmem:[%s2125_s0 + $0x98] sm:$0xff]  }
  0x12   :  { %v268_v9 = vadd.f32 %v1286_v7, %v202_v3  ;;  %v300_v13 = vmax.f32 %v236_v2, 0.0  ;;  %v315_v15 = vmax.f32 %v251_v4, 0.0  ;;  %v316_v16 = vmax.f32 %v252_v6, 0.0  ;;  %v1227_v0 = vld [vmem:[%s2125_s0 + $0xd8] sm:$0xff]  }
  0x13   :  { %v331_v18 = vmax.f32 %v267_v8, 0.0  ;;  %v346_v21 = vpack.c.bf16 %v284_v11, %v283_v10  ;;  %v1083_v22 = vunpack.c.l.bf16 %v1202_v14  ;;  %v1084_v23 = vunpack.c.h.bf16 %v1202_v14 }
  0x14   :  { %v332_v19 = vmax.f32 %v268_v9, 0.0  ;;  %v354_v25 = vpack.c.bf16 %v300_v13, %v299_v12  ;;  %v1115_v26 = vunpack.c.l.bf16 %v1210_v17  ;;  %v1116_v27 = vunpack.c.h.bf16 %v1210_v17 }
  0x15   :  { %v362_v28 = vpack.c.bf16 %v316_v16, %v315_v15  ;;  %v1147_v29 = vunpack.c.l.bf16 %v1218_v20  ;;  %v1148_v30 = vunpack.c.h.bf16 %v1218_v20  ;;  %v1179_v32 = vunpack.c.l.bf16 %v1226_v24 }
  0x16   :  { %v370_v31 = vpack.c.bf16 %v332_v19, %v331_v18  ;;  %v1180_v33 = vunpack.c.h.bf16 %v1226_v24  ;;  %v155_v34 = vmul.f32 %v1278_v5, %v1083_v22  ;;  %v156_v35 = vmul.f32 %v1278_v5, %v1084_v23 }
  0x17   :  { %v171_v36 = vmul.f32 %v1278_v5, %v1115_v26  ;;  %v172_v37 = vmul.f32 %v1278_v5, %v1116_v27  ;;  %v187_v38 = vmul.f32 %v1278_v5, %v1147_v29  ;;  %v188_v39 = vmul.f32 %v1278_v5, %v1148_v30 }
  0x18   :  { %v203_v40 = vmul.f32 %v1278_v5, %v1179_v32  ;;  %v204_v41 = vmul.f32 %v1278_v5, %v1180_v33  ;;  %v221_v42 = vadd.f32 %v1286_v7, %v155_v34  ;;  %v222_v43 = vadd.f32 %v1286_v7, %v156_v35  ;;  %v1204_v32 = vld [vmem:[%s2125_s0 + $0x20] sm:$0xff]  }
  0x19   :  { %v237_v44 = vadd.f32 %v1286_v7, %v171_v36  ;;  %v238_v45 = vadd.f32 %v1286_v7, %v172_v37  ;;  %v253_v46 = vadd.f32 %v1286_v7, %v187_v38  ;;  %v254_v47 = vadd.f32 %v1286_v7, %v188_v39  ;;  %v1212_v35 = vld [vmem:[%s2125_s0 + $0x60] sm:$0xff]  }
  0x1a   :  { %v269_v48 = vadd.f32 %v1286_v7, %v203_v40  ;;  %v270_v49 = vadd.f32 %v1286_v7, %v204_v41  ;;  %v285_v50 = vmax.f32 %v221_v42, 0.0  ;;  %v286_v51 = vmax.f32 %v222_v43, 0.0  ;;  %v1220_v38 = vld [vmem:[%s2125_s0 + $0xa0] sm:$0xff]  }
  0x1b   :  { %v301_v52 = vmax.f32 %v237_v44, 0.0  ;;  %v302_v53 = vmax.f32 %v238_v45, 0.0  ;;  %v317_v55 = vmax.f32 %v253_v46, 0.0  ;;  %v318_v56 = vmax.f32 %v254_v47, 0.0  ;;  %v1228_v42 = vld [vmem:[%s2125_s0 + $0xe0] sm:$0xff]  }
  0x1c   :  { %v333_v58 = vmax.f32 %v269_v48, 0.0  ;;  %v334_v59 = vmax.f32 %v270_v49, 0.0  ;;  %v347_v61 = vpack.c.bf16 %v286_v51, %v285_v50  ;;  %v1087_v62 = vunpack.c.l.bf16 %v1203_v54 }
  0x1d   :  { %v1088_v63 = vunpack.c.h.bf16 %v1203_v54  ;;  %v355_v1 = vpack.c.bf16 %v302_v53, %v301_v52  ;;  %v1119_v2 = vunpack.c.l.bf16 %v1211_v57  ;;  %v1120_v3 = vunpack.c.h.bf16 %v1211_v57 }
  0x1e   :  { %1042 = vmatmul.msk.bf16.gmra.mxu0 %vm378_vm1, %v346_v21  ;;  %v363_v4 = vpack.c.bf16 %v318_v56, %v317_v55  ;;  %v1151_v6 = vunpack.c.l.bf16 %v1219_v60  ;;  %v1152_v8 = vunpack.c.h.bf16 %v1219_v60  ;;  %v371_v9 = vpack.c.bf16 %v334_v59, %v333_v58 }
  0x1f   :  { %1050 = vmatmul.msk.bf16.gmra.mxu1 %vm378_vm1, %v354_v25  ;;  %v1183_v10 = vunpack.c.l.bf16 %v1227_v0  ;;  %v1184_v11 = vunpack.c.h.bf16 %v1227_v0  ;;  %v157_v12 = vmul.f32 %v1278_v5, %v1087_v62  ;;  %v158_v13 = vmul.f32 %v1278_v5, %v1088_v63 }
  0x20   :  { %1058 = vmatmul.msk.bf16.gmra.mxu2 %vm378_vm1, %v362_v28  ;;  %v173_v14 = vmul.f32 %v1278_v5, %v1119_v2  ;;  %v174_v15 = vmul.f32 %v1278_v5, %v1120_v3  ;;  %v189_v16 = vmul.f32 %v1278_v5, %v1151_v6  ;;  %v190_v17 = vmul.f32 %v1278_v5, %v1152_v8 }
  0x21   :  { %1066 = vmatmul.msk.bf16.gmra.mxu3 %vm378_vm1, %v370_v31  ;;  %v205_v18 = vmul.f32 %v1278_v5, %v1183_v10  ;;  %v206_v19 = vmul.f32 %v1278_v5, %v1184_v11  ;;  %v223_v20 = vadd.f32 %v1286_v7, %v157_v12  ;;  %v224_v21 = vadd.f32 %v1286_v7, %v158_v13  ;;  %v1205_v10 = vld [vmem:[%s2125_s0 + $0x28] sm:$0xff]  }
  0x22   :  { %v239_v22 = vadd.f32 %v1286_v7, %v173_v14  ;;  %v240_v23 = vadd.f32 %v1286_v7, %v174_v15  ;;  %v255_v24 = vadd.f32 %v1286_v7, %v189_v16  ;;  %v256_v25 = vadd.f32 %v1286_v7, %v190_v17  ;;  %v1213_v13 = vld [vmem:[%s2125_s0 + $0x68] sm:$0xff]  }
  0x23   :  { %v271_v26 = vadd.f32 %v1286_v7, %v205_v18  ;;  %v272_v27 = vadd.f32 %v1286_v7, %v206_v19  ;;  %v287_v28 = vmax.f32 %v223_v20, 0.0  ;;  %v288_v29 = vmax.f32 %v224_v21, 0.0  ;;  %v1221_v16 = vld [vmem:[%s2125_s0 + $0xa8] sm:$0xff]  }
  0x24   :  { %v303_v30 = vmax.f32 %v239_v22, 0.0  ;;  %v304_v31 = vmax.f32 %v240_v23, 0.0  ;;  %v319_v33 = vmax.f32 %v255_v24, 0.0  ;;  %v320_v34 = vmax.f32 %v256_v25, 0.0  ;;  %v1229_v20 = vld [vmem:[%s2125_s0 + $0xe8] sm:$0xff]  }
  0x25   :  { %v335_v36 = vmax.f32 %v271_v26, 0.0  ;;  %v336_v37 = vmax.f32 %v272_v27, 0.0  ;;  %v348_v39 = vpack.c.bf16 %v288_v29, %v287_v28  ;;  %v1091_v40 = vunpack.c.l.bf16 %v1204_v32 }
  0x26   :  { %v1092_v41 = vunpack.c.h.bf16 %v1204_v32  ;;  %v356_v43 = vpack.c.bf16 %v304_v31, %v303_v30  ;;  %v1123_v44 = vunpack.c.l.bf16 %v1212_v35  ;;  %v1124_v45 = vunpack.c.h.bf16 %v1212_v35 }
  0x27   :  { %v364_v46 = vpack.c.bf16 %v320_v34, %v319_v33  ;;  %v1155_v47 = vunpack.c.l.bf16 %v1220_v38  ;;  %v1156_v48 = vunpack.c.h.bf16 %v1220_v38  ;;  %v372_v49 = vpack.c.bf16 %v336_v37, %v335_v36 }
  0x28   :  { %v1187_v50 = vunpack.c.l.bf16 %v1228_v42  ;;  %v1188_v51 = vunpack.c.h.bf16 %v1228_v42  ;;  %v159_v52 = vmul.f32 %v1278_v5, %v1091_v40  ;;  %v160_v53 = vmul.f32 %v1278_v5, %v1092_v41 }
  0x29   :  { %v175_v54 = vmul.f32 %v1278_v5, %v1123_v44  ;;  %v176_v55 = vmul.f32 %v1278_v5, %v1124_v45  ;;  %v191_v56 = vmul.f32 %v1278_v5, %v1155_v47  ;;  %v192_v57 = vmul.f32 %v1278_v5, %v1156_v48 }
  0x2a   :  { %v207_v58 = vmul.f32 %v1278_v5, %v1187_v50  ;;  %v208_v59 = vmul.f32 %v1278_v5, %v1188_v51  ;;  %v225_v60 = vadd.f32 %v1286_v7, %v159_v52  ;;  %v1095_v18 = vunpack.c.l.bf16 %v1205_v10  ;;  %v1206_v50 = vld [vmem:[%s2125_s0 + $0x30] sm:$0xff]  }
  0x2b   :  { %v241_v62 = vadd.f32 %v1286_v7, %v175_v54  ;;  %v242_v63 = vadd.f32 %v1286_v7, %v176_v55  ;;  %v257_v0 = vadd.f32 %v1286_v7, %v191_v56  ;;  %v1096_v19 = vunpack.c.h.bf16 %v1205_v10  ;;  %v1222_v56 = vld [vmem:[%s2125_s0 + $0xb0] sm:$0xff]  }
  0x2c   :  { %v273_v2 = vadd.f32 %v1286_v7, %v207_v58  ;;  %v274_v3 = vadd.f32 %v1286_v7, %v208_v59  ;;  %v1127_v22 = vunpack.c.l.bf16 %v1213_v13  ;;  %v1128_v23 = vunpack.c.h.bf16 %v1213_v13 }
  0x2d   :  { %v305_v8 = vmax.f32 %v241_v62, 0.0  ;;  %v321_v11 = vmax.f32 %v257_v0, 0.0  ;;  %v1159_v25 = vunpack.c.l.bf16 %v1221_v16  ;;  %v1160_v26 = vunpack.c.h.bf16 %v1221_v16 }
  0x2e   :  { %1043 = vmatmul.msk.bf16.gmra.mxu0 %vm378_vm1, %v347_v61  ;;  %v226_v61 = vadd.f32 %v1286_v7, %v160_v53  ;;  %v337_v14 = vmax.f32 %v273_v2, 0.0  ;;  %v338_v15 = vmax.f32 %v274_v3, 0.0  ;;  %v1191_v28 = vunpack.c.l.bf16 %v1229_v20  ;;  %v1214_v53 = vld [vmem:[%s2125_s0 + $0x70] sm:$0xff]  }
  0x2f   :  { %1051 = vmatmul.msk.bf16.gmra.mxu1 %vm378_vm1, %v355_v1  ;;  %v258_v1 = vadd.f32 %v1286_v7, %v192_v57  ;;  %v1192_v29 = vunpack.c.h.bf16 %v1229_v20  ;;  %v161_v30 = vmul.f32 %v1278_v5, %v1095_v18  ;;  %v162_v31 = vmul.f32 %v1278_v5, %v1096_v19 }
  0x30   :  { %1059 = vmatmul.msk.bf16.gmra.mxu2 %vm378_vm1, %v363_v4  ;;  %v289_v4 = vmax.f32 %v225_v60, 0.0  ;;  %v290_v6 = vmax.f32 %v226_v61, 0.0  ;;  %v373_v27 = vpack.c.bf16 %v338_v15, %v337_v14  ;;  %v177_v32 = vmul.f32 %v1278_v5, %v1127_v22  ;;  %v1230_v60 = vld [vmem:[%s2125_s0 + $0xf0] sm:$0xff]  }
  0x31   :  { %1067 = vmatmul.msk.bf16.gmra.mxu3 %vm378_vm1, %v371_v9  ;;  %v306_v9 = vmax.f32 %v242_v63, 0.0  ;;  %v322_v12 = vmax.f32 %v258_v1, 0.0  ;;  %v178_v33 = vmul.f32 %v1278_v5, %v1128_v23  ;;  %v193_v34 = vmul.f32 %v1278_v5, %v1159_v25 }
  0x32   :  { %v349_v17 = vpack.c.bf16 %v290_v6, %v289_v4  ;;  %v194_v35 = vmul.f32 %v1278_v5, %v1160_v26  ;;  %v209_v36 = vmul.f32 %v1278_v5, %v1191_v28  ;;  %v210_v37 = vmul.f32 %v1278_v5, %v1192_v29  ;;  %v1207_v28 = vld [vmem:[%s2125_s0 + $0x38] sm:$0xff]  }
  0x33   :  { %v357_v21 = vpack.c.bf16 %v306_v9, %v305_v8  ;;  %v365_v24 = vpack.c.bf16 %v322_v12, %v321_v11  ;;  %v227_v38 = vadd.f32 %v1286_v7, %v161_v30  ;;  %v243_v40 = vadd.f32 %v1286_v7, %v177_v32 }
  0x34   :  { %v244_v41 = vadd.f32 %v1286_v7, %v178_v33  ;;  %v259_v42 = vadd.f32 %v1286_v7, %v193_v34  ;;  %v275_v44 = vadd.f32 %v1286_v7, %v209_v36  ;;  %v276_v45 = vadd.f32 %v1286_v7, %v210_v37  ;;  %v1223_v34 = vld [vmem:[%s2125_s0 + $0xb8] sm:$0xff]  }
  0x35   :  { %v307_v48 = vmax.f32 %v243_v40, 0.0  ;;  %v1099_v58 = vunpack.c.l.bf16 %v1206_v50  ;;  %v1100_v59 = vunpack.c.h.bf16 %v1206_v50  ;;  %v1131_v62 = vunpack.c.l.bf16 %v1214_v53 }
  0x36   :  { %v323_v51 = vmax.f32 %v259_v42, 0.0  ;;  %v339_v54 = vmax.f32 %v275_v44, 0.0  ;;  %v340_v55 = vmax.f32 %v276_v45, 0.0  ;;  %v1132_v63 = vunpack.c.h.bf16 %v1214_v53 }
  0x37   :  { %v1163_v1 = vunpack.c.l.bf16 %v1222_v56  ;;  %v1164_v2 = vunpack.c.h.bf16 %v1222_v56  ;;  %v1195_v4 = vunpack.c.l.bf16 %v1230_v60  ;;  %v1196_v6 = vunpack.c.h.bf16 %v1230_v60 }
  0x38   :  { %v374_v3 = vpack.c.bf16 %v340_v55, %v339_v54  ;;  %v163_v8 = vmul.f32 %v1278_v5, %v1099_v58  ;;  %v164_v9 = vmul.f32 %v1278_v5, %v1100_v59  ;;  %v179_v10 = vmul.f32 %v1278_v5, %v1131_v62 }
  0x39   :  { %v180_v11 = vmul.f32 %v1278_v5, %v1132_v63  ;;  %v195_v12 = vmul.f32 %v1278_v5, %v1163_v1  ;;  %v196_v13 = vmul.f32 %v1278_v5, %v1164_v2  ;;  %v211_v14 = vmul.f32 %v1278_v5, %v1195_v4 }
  0x3a   :  { %v212_v15 = vmul.f32 %v1278_v5, %v1196_v6  ;;  %v229_v16 = vadd.f32 %v1286_v7, %v163_v8  ;;  %v245_v18 = vadd.f32 %v1286_v7, %v179_v10  ;;  %v1103_v36 = vunpack.c.l.bf16 %v1207_v28 }
  0x3b   :  { %v246_v19 = vadd.f32 %v1286_v7, %v180_v11  ;;  %v261_v20 = vadd.f32 %v1286_v7, %v195_v12  ;;  %v277_v22 = vadd.f32 %v1286_v7, %v211_v14  ;;  %v1104_v37 = vunpack.c.h.bf16 %v1207_v28 }
  0x3c   :  { %v278_v23 = vadd.f32 %v1286_v7, %v212_v15  ;;  %v309_v26 = vmax.f32 %v245_v18, 0.0  ;;  %v1168_v44 = vunpack.c.h.bf16 %v1223_v34 }
  0x3d   :  { %v325_v29 = vmax.f32 %v261_v20, 0.0  ;;  %v341_v32 = vmax.f32 %v277_v22, 0.0  ;;  %v796_v20 = vld [vmem:[%s2128_s1 + $0x80] sm:$0xff] }
  0x3e   :  { %1044 = vmatmul.msk.bf16.gmra.mxu0 %vm378_vm1, %v348_v39  ;;  %v228_v39 = vadd.f32 %v1286_v7, %v162_v31  ;;  %v1215_v31 = vld [vmem:[%s2125_s0 + $0x78] sm:$0xff]   ;;  %v342_v33 = vmax.f32 %v278_v23, 0.0  ;;  %v198_v53 = vmul.f32 %v1278_v5, %v1168_v44 }
  0x3f   :  { %1052 = vmatmul.msk.bf16.gmra.mxu1 %vm378_vm1, %v356_v43  ;;  %v260_v43 = vadd.f32 %v1286_v7, %v194_v35  ;;  %v1135_v40 = vunpack.c.l.bf16 %v1215_v31 }
  0x40   :  { %1060 = vmatmul.msk.bf16.gmra.mxu2 %vm378_vm1, %v364_v46  ;;  %v291_v46 = vmax.f32 %v227_v38, 0.0  ;;  %v292_v47 = vmax.f32 %v228_v39, 0.0  ;;  %v1231_v38 = vld [vmem:[%s2125_s0 + $0xf8] sm:$0xff]   ;;  %v375_v45 = vpack.c.bf16 %v342_v33, %v341_v32  ;;  %v812_v32 = vld [vmem:[%s2128_s1 + $0x100] sm:$0xff] }
  0x41   :  { %1068 = vmatmul.msk.bf16.gmra.mxu3 %vm378_vm1, %v372_v49  ;;  %v308_v49 = vmax.f32 %v244_v41, 0.0  ;;  %v324_v52 = vmax.f32 %v260_v43, 0.0  ;;  %v1136_v41 = vunpack.c.h.bf16 %v1215_v31  ;;  %v1167_v43 = vunpack.c.l.bf16 %v1223_v34  ;;  %v781_v34 = vld [vmem:[%s2128_s1 + $0x8] sm:$0xff] }
  0x42   :  { %v350_v57 = vpack.c.bf16 %v292_v47, %v291_v46  ;;  %v1199_v46 = vunpack.c.l.bf16 %v1231_v38  ;;  %v1200_v47 = vunpack.c.h.bf16 %v1231_v38  ;;  %v181_v50 = vmul.f32 %v1278_v5, %v1135_v40 }
  0x43   :  { %v358_v61 = vpack.c.bf16 %v308_v49, %v307_v48  ;;  %v366_v0 = vpack.c.bf16 %v324_v52, %v323_v51  ;;  %v165_v48 = vmul.f32 %v1278_v5, %v1103_v36  ;;  %v166_v49 = vmul.f32 %v1278_v5, %v1104_v37  ;;  %v828_v37 = vld [vmem:[%s2128_s1 + $0x180] sm:$0xff] }
  0x44   :  { %v182_v51 = vmul.f32 %v1278_v5, %v1136_v41  ;;  %v197_v52 = vmul.f32 %v1278_v5, %v1167_v43  ;;  %v213_v54 = vmul.f32 %v1278_v5, %v1199_v46  ;;  %v214_v55 = vmul.f32 %v1278_v5, %v1200_v47 }
  0x45   :  { %v231_v56 = vadd.f32 %v1286_v7, %v165_v48  ;;  %v247_v58 = vadd.f32 %v1286_v7, %v181_v50 }
  0x46   :  { %v248_v59 = vadd.f32 %v1286_v7, %v182_v51  ;;  %v263_v60 = vadd.f32 %v1286_v7, %v197_v52  ;;  %v279_v62 = vadd.f32 %v1286_v7, %v213_v54  ;;  %v280_v63 = vadd.f32 %v1286_v7, %v214_v55 }
  0x47   :  { %v311_v2 = vmax.f32 %v247_v58, 0.0  ;;  %v782_v58 = vld [vmem:[%s2128_s1 + $0x10] sm:$0xff] }
  0x48   :  { %v312_v5 = vmax.f32 %v248_v59, 0.0  ;;  %v343_v6 = vmax.f32 %v279_v62, 0.0  ;;  %v344_v8 = vmax.f32 %v280_v63, 0.0  ;;  %v798_v63 = vld [vmem:[%s2128_s1 + $0x90] sm:$0xff] }
  0x4a   :  { %v360_v10 = vpack.c.bf16 %v312_v5, %v311_v2  ;;  %v376_v12 = vpack.c.bf16 %v344_v8, %v343_v6 }
  0x4e   :  { %1045 = vmatmul.msk.bf16.gmra.mxu0 %vm378_vm1, %v349_v17  ;;  %v230_v17 = vadd.f32 %v1286_v7, %v164_v9 }
  0x4f   :  { %1053 = vmatmul.msk.bf16.gmra.mxu1 %vm378_vm1, %v357_v21  ;;  %v262_v21 = vadd.f32 %v1286_v7, %v196_v13  ;;  %v1546_v13 = vld [vmem:[%s2127_s4 + $0x1] ss:$0 sm:$0xff] }
  0x50   :  { %1061 = vmatmul.msk.bf16.gmra.mxu2 %vm378_vm1, %v365_v24  ;;  %v293_v24 = vmax.f32 %v229_v16, 0.0  ;;  %v294_v25 = vmax.f32 %v230_v17, 0.0  ;;  %v780_v17 = vld [vmem:[%s2128_s1] sm:$0xff] }
  0x51   :  { %1069 = vmatmul.msk.bf16.gmra.mxu3 %vm378_vm1, %v373_v27  ;;  %v310_v27 = vmax.f32 %v246_v19, 0.0  ;;  %v326_v30 = vmax.f32 %v262_v21, 0.0 }
  0x52   :  { %v351_v35 = vpack.c.bf16 %v294_v25, %v293_v24 }
  0x53   :  { %v359_v39 = vpack.c.bf16 %v310_v27, %v309_v26  ;;  %v367_v42 = vpack.c.bf16 %v326_v30, %v325_v29 }
  0x5e   :  { %1046 = vmatmul.msk.bf16.gmra.mxu0 %vm378_vm1, %v350_v57  ;;  %v232_v57 = vadd.f32 %v1286_v7, %v166_v49 }
  0x5f   :  { %1054 = vmatmul.msk.bf16.gmra.mxu1 %vm378_vm1, %v358_v61  ;;  %v264_v61 = vadd.f32 %v1286_v7, %v198_v53  ;;  %v1541_v7 = vld [vmem:[%s2127_s4] ss:$0 sm:$0xff] }
  0x60   :  { %1062 = vmatmul.msk.bf16.gmra.mxu2 %vm378_vm1, %v366_v0  ;;  %v295_v0 = vmax.f32 %v231_v56, 0.0  ;;  %v296_v1 = vmax.f32 %v232_v57, 0.0  ;;  %v813_v56 = vld [vmem:[%s2128_s1 + $0x108] sm:$0xff] }
  0x61   :  { %1070 = vmatmul.msk.bf16.gmra.mxu3 %vm378_vm1, %v374_v3  ;;  %v327_v3 = vmax.f32 %v263_v60, 0.0  ;;  %v328_v4 = vmax.f32 %v264_v61, 0.0  ;;  %v829_v61 = vld [vmem:[%s2128_s1 + $0x188] sm:$0xff] }
  0x62   :  { %v352_v9 = vpack.c.bf16 %v296_v1, %v295_v0 }
  0x63   :  { %v368_v11 = vpack.c.bf16 %v328_v4, %v327_v3 }
  0x6e   :  { %1047 = vmatmul.msk.bf16.gmra.mxu0 %vm378_vm1, %v351_v35 }
  0x6f   :  { %1055 = vmatmul.msk.bf16.gmra.mxu1 %vm378_vm1, %v359_v39  ;;  %v797_v39 = vld [vmem:[%s2128_s1 + $0x88] sm:$0xff] }
  0x70   :  { %1063 = vmatmul.msk.bf16.gmra.mxu2 %vm378_vm1, %v367_v42 }
  0x71   :  { %1071 = vmatmul.msk.bf16.gmra.mxu3 %vm378_vm1, %v375_v45 }
  0x7e   :  { %1048 = vmatmul.msk.bf16.gmra.mxu0 %vm378_vm1, %v352_v9 }
  0x7f   :  { %1056 = vmatmul.msk.bf16.gmra.mxu1 %vm378_vm1, %v360_v10 }
  0x80   :  { %1064 = vmatmul.msk.bf16.gmra.mxu2 %vm378_vm1, %v368_v11 }
  0x81   :  { %1072 = vmatmul.msk.bf16.gmra.mxu3 %vm378_vm1, %v376_v12 }
  0x8b   :  { %v488_v14 = vpop.f32.mrf.mxu0 }
  0x8c   :  { %v650_v15 = vmul.f32 %v1541_v7, %v488_v14  ;;  %v528_v16 = vpop.f32.mrf.mxu1 }
  0x8d   :  { %v666_v18 = vmul.f32 %v1541_v7, %v528_v16 }
  0x8e   :  { %v716_v19 = vadd.f32 %v1546_v13, %v650_v15 }
  0x8f   :  { %v732_v21 = vadd.f32 %v1546_v13, %v666_v18  ;;  %v814_v18 = vld [vmem:[%s2128_s1 + $0x110] sm:$0xff] }
  0x90   :  { %v844_v22 = vadd.f32 %v780_v17, %v716_v19 }
  0x91   :  { %v860_v23 = vadd.f32 %v796_v20, %v732_v21  ;;  %v783_v20 = vld [vmem:[%s2128_s1 + $0x18] sm:$0xff] }
  0x92   :  { %v908_v24 = vmax.f32 %v844_v22, 0.0 }
  0x93   :  { %v924_v25 = vmax.f32 %v860_v23, 0.0  ;;  %v568_v26 = vpop.f32.mrf.mxu2  ;;  %v490_v27 = vpop.f32.mrf.mxu0  ;;  %v830_v23 = vld [vmem:[%s2128_s1 + $0x190] sm:$0xff] }
  0x94   :  { %973 = vst.msk [vmem:[%s2129_s5] sm:$0xff] %vm972_vm2, %v908_v24  ;;  %v682_v28 = vmul.f32 %v1541_v7, %v568_v26  ;;  %v608_v29 = vpop.f32.mrf.mxu3  ;;  %v651_v30 = vmul.f32 %v1541_v7, %v490_v27  ;;  %v530_v31 = vpop.f32.mrf.mxu1 }
  0x95   :  { %989 = vst.msk [vmem:[%s2129_s5 + $0x80] sm:$0xff] %vm972_vm2, %v924_v25  ;;  %v698_v33 = vmul.f32 %v1541_v7, %v608_v29  ;;  %v667_v35 = vmul.f32 %v1541_v7, %v530_v31  ;;  %v799_v25 = vld [vmem:[%s2128_s1 + $0x98] sm:$0xff] }
  0x96   :  { %v748_v36 = vadd.f32 %v1546_v13, %v682_v28  ;;  %v717_v38 = vadd.f32 %v1546_v13, %v651_v30 }
  0x97   :  { %v764_v40 = vadd.f32 %v1546_v13, %v698_v33  ;;  %v733_v41 = vadd.f32 %v1546_v13, %v667_v35 }
  0x98   :  { %v876_v42 = vadd.f32 %v812_v32, %v748_v36  ;;  %v845_v43 = vadd.f32 %v781_v34, %v717_v38 }
  0x99   :  { %v892_v44 = vadd.f32 %v828_v37, %v764_v40  ;;  %v861_v45 = vadd.f32 %v797_v39, %v733_v41 }
  0x9a   :  { %v940_v46 = vmax.f32 %v876_v42, 0.0  ;;  %v909_v47 = vmax.f32 %v845_v43, 0.0  ;;  %v815_v42 = vld [vmem:[%s2128_s1 + $0x118] sm:$0xff] }
  0x9b   :  { %v956_v48 = vmax.f32 %v892_v44, 0.0  ;;  %v925_v49 = vmax.f32 %v861_v45, 0.0  ;;  %v570_v50 = vpop.f32.mrf.mxu2  ;;  %v493_v51 = vpop.f32.mrf.mxu0  ;;  %v784_v44 = vld [vmem:[%s2128_s1 + $0x20] sm:$0xff] }
  0x9c   :  { %1005 = vst.msk [vmem:[%s2129_s5 + $0x100] sm:$0xff] %vm972_vm2, %v940_v46  ;;  %v683_v52 = vmul.f32 %v1541_v7, %v570_v50  ;;  %v610_v53 = vpop.f32.mrf.mxu3  ;;  %v652_v54 = vmul.f32 %v1541_v7, %v493_v51  ;;  %v533_v55 = vpop.f32.mrf.mxu1 }
  0x9d   :  { %1021 = vst.msk [vmem:[%s2129_s5 + $0x180] sm:$0xff] %vm972_vm2, %v956_v48  ;;  %v699_v57 = vmul.f32 %v1541_v7, %v610_v53  ;;  %v668_v59 = vmul.f32 %v1541_v7, %v533_v55 }
  0x9e   :  { %974 = vst.msk [vmem:[%s2129_s5 + $0x8] sm:$0xff] %vm972_vm2, %v909_v47  ;;  %v749_v60 = vadd.f32 %v1546_v13, %v683_v52  ;;  %v718_v62 = vadd.f32 %v1546_v13, %v652_v54  ;;  %v831_v47 = vld [vmem:[%s2128_s1 + $0x198] sm:$0xff] }
  0x9f   :  { %990 = vst.msk [vmem:[%s2129_s5 + $0x88] sm:$0xff] %vm972_vm2, %v925_v49  ;;  %v765_v0 = vadd.f32 %v1546_v13, %v699_v57  ;;  %v734_v1 = vadd.f32 %v1546_v13, %v668_v59  ;;  %v800_v49 = vld [vmem:[%s2128_s1 + $0xa0] sm:$0xff] }
  0xa0   :  { %v877_v2 = vadd.f32 %v813_v56, %v749_v60  ;;  %v846_v5 = vadd.f32 %v782_v58, %v718_v62 }
  0xa1   :  { %v893_v3 = vadd.f32 %v829_v61, %v765_v0  ;;  %v862_v4 = vadd.f32 %v798_v63, %v734_v1 }
  0xa2   :  { %v941_v6 = vmax.f32 %v877_v2, 0.0  ;;  %v910_v8 = vmax.f32 %v846_v5, 0.0  ;;  %v816_v2 = vld [vmem:[%s2128_s1 + $0x120] sm:$0xff] }
  0xa3   :  { %v957_v9 = vmax.f32 %v893_v3, 0.0  ;;  %v926_v10 = vmax.f32 %v862_v4, 0.0  ;;  %v573_v11 = vpop.f32.mrf.mxu2  ;;  %v495_v12 = vpop.f32.mrf.mxu0  ;;  %v785_v3 = vld [vmem:[%s2128_s1 + $0x28] sm:$0xff] }
  0xa4   :  { %1006 = vst.msk [vmem:[%s2129_s5 + $0x108] sm:$0xff] %vm972_vm2, %v941_v6  ;;  %v684_v14 = vmul.f32 %v1541_v7, %v573_v11  ;;  %v613_v15 = vpop.f32.mrf.mxu3  ;;  %v653_v16 = vmul.f32 %v1541_v7, %v495_v12  ;;  %v535_v17 = vpop.f32.mrf.mxu1 }
  0xa5   :  { %1022 = vst.msk [vmem:[%s2129_s5 + $0x188] sm:$0xff] %vm972_vm2, %v957_v9  ;;  %v700_v19 = vmul.f32 %v1541_v7, %v613_v15  ;;  %v669_v21 = vmul.f32 %v1541_v7, %v535_v17 }
  0xa6   :  { %975 = vst.msk [vmem:[%s2129_s5 + $0x10] sm:$0xff] %vm972_vm2, %v910_v8  ;;  %v750_v22 = vadd.f32 %v1546_v13, %v684_v14  ;;  %v719_v24 = vadd.f32 %v1546_v13, %v653_v16  ;;  %v832_v8 = vld [vmem:[%s2128_s1 + $0x1a0] sm:$0xff] }
  0xa7   :  { %991 = vst.msk [vmem:[%s2129_s5 + $0x90] sm:$0xff] %vm972_vm2, %v926_v10  ;;  %v766_v26 = vadd.f32 %v1546_v13, %v700_v19  ;;  %v735_v27 = vadd.f32 %v1546_v13, %v669_v21  ;;  %v801_v10 = vld [vmem:[%s2128_s1 + $0xa8] sm:$0xff] }
  0xa8   :  { %v878_v28 = vadd.f32 %v814_v18, %v750_v22  ;;  %v847_v29 = vadd.f32 %v783_v20, %v719_v24 }
  0xa9   :  { %v894_v30 = vadd.f32 %v830_v23, %v766_v26  ;;  %v863_v31 = vadd.f32 %v799_v25, %v735_v27 }
  0xaa   :  { %v942_v32 = vmax.f32 %v878_v28, 0.0  ;;  %v911_v33 = vmax.f32 %v847_v29, 0.0  ;;  %v817_v28 = vld [vmem:[%s2128_s1 + $0x128] sm:$0xff] }
  0xab   :  { %v958_v34 = vmax.f32 %v894_v30, 0.0  ;;  %v927_v35 = vmax.f32 %v863_v31, 0.0  ;;  %v575_v36 = vpop.f32.mrf.mxu2  ;;  %v498_v37 = vpop.f32.mrf.mxu0  ;;  %v786_v30 = vld [vmem:[%s2128_s1 + $0x30] sm:$0xff] }
  0xac   :  { %1007 = vst.msk [vmem:[%s2129_s5 + $0x110] sm:$0xff] %vm972_vm2, %v942_v32  ;;  %v685_v38 = vmul.f32 %v1541_v7, %v575_v36  ;;  %v615_v39 = vpop.f32.mrf.mxu3  ;;  %v654_v40 = vmul.f32 %v1541_v7, %v498_v37  ;;  %v538_v41 = vpop.f32.mrf.mxu1 }
  0xad   :  { %1023 = vst.msk [vmem:[%s2129_s5 + $0x190] sm:$0xff] %vm972_vm2, %v958_v34  ;;  %v701_v43 = vmul.f32 %v1541_v7, %v615_v39  ;;  %v670_v45 = vmul.f32 %v1541_v7, %v538_v41 }
  0xae   :  { %976 = vst.msk [vmem:[%s2129_s5 + $0x18] sm:$0xff] %vm972_vm2, %v911_v33  ;;  %v751_v46 = vadd.f32 %v1546_v13, %v685_v38  ;;  %v720_v48 = vadd.f32 %v1546_v13, %v654_v40  ;;  %v833_v33 = vld [vmem:[%s2128_s1 + $0x1a8] sm:$0xff] }
  0xaf   :  { %992 = vst.msk [vmem:[%s2129_s5 + $0x98] sm:$0xff] %vm972_vm2, %v927_v35  ;;  %v767_v50 = vadd.f32 %v1546_v13, %v701_v43  ;;  %v736_v51 = vadd.f32 %v1546_v13, %v670_v45  ;;  %v802_v35 = vld [vmem:[%s2128_s1 + $0xb0] sm:$0xff] }
  0xb0   :  { %v879_v52 = vadd.f32 %v815_v42, %v751_v46  ;;  %v848_v53 = vadd.f32 %v784_v44, %v720_v48 }
  0xb1   :  { %v895_v54 = vadd.f32 %v831_v47, %v767_v50  ;;  %v864_v55 = vadd.f32 %v800_v49, %v736_v51 }
  0xb2   :  { %v943_v56 = vmax.f32 %v879_v52, 0.0  ;;  %v912_v57 = vmax.f32 %v848_v53, 0.0  ;;  %v818_v52 = vld [vmem:[%s2128_s1 + $0x130] sm:$0xff] }
  0xb3   :  { %v959_v58 = vmax.f32 %v895_v54, 0.0  ;;  %v928_v59 = vmax.f32 %v864_v55, 0.0  ;;  %v578_v60 = vpop.f32.mrf.mxu2  ;;  %v500_v61 = vpop.f32.mrf.mxu0  ;;  %v787_v54 = vld [vmem:[%s2128_s1 + $0x38] sm:$0xff] }
  0xb4   :  { %1008 = vst.msk [vmem:[%s2129_s5 + $0x118] sm:$0xff] %vm972_vm2, %v943_v56  ;;  %v686_v62 = vmul.f32 %v1541_v7, %v578_v60  ;;  %v618_v63 = vpop.f32.mrf.mxu3  ;;  %v655_v0 = vmul.f32 %v1541_v7, %v500_v61  ;;  %v540_v1 = vpop.f32.mrf.mxu1 }
  0xb5   :  { %1024 = vst.msk [vmem:[%s2129_s5 + $0x198] sm:$0xff] %vm972_vm2, %v959_v58  ;;  %v702_v5 = vmul.f32 %v1541_v7, %v618_v63  ;;  %v671_v4 = vmul.f32 %v1541_v7, %v540_v1 }
  0xb6   :  { %977 = vst.msk [vmem:[%s2129_s5 + $0x20] sm:$0xff] %vm972_vm2, %v912_v57  ;;  %v752_v6 = vadd.f32 %v1546_v13, %v686_v62  ;;  %v721_v9 = vadd.f32 %v1546_v13, %v655_v0  ;;  %v834_v57 = vld [vmem:[%s2128_s1 + $0x1b0] sm:$0xff] }
  0xb7   :  { %993 = vst.msk [vmem:[%s2129_s5 + $0xa0] sm:$0xff] %vm972_vm2, %v928_v59  ;;  %v768_v11 = vadd.f32 %v1546_v13, %v702_v5  ;;  %v737_v12 = vadd.f32 %v1546_v13, %v671_v4  ;;  %v803_v59 = vld [vmem:[%s2128_s1 + $0xb8] sm:$0xff] }
  0xb8   :  { %v880_v14 = vadd.f32 %v816_v2, %v752_v6  ;;  %v849_v15 = vadd.f32 %v785_v3, %v721_v9 }
  0xb9   :  { %v896_v16 = vadd.f32 %v832_v8, %v768_v11  ;;  %v865_v17 = vadd.f32 %v801_v10, %v737_v12 }
  0xba   :  { %v944_v18 = vmax.f32 %v880_v14, 0.0  ;;  %v913_v19 = vmax.f32 %v849_v15, 0.0  ;;  %v819_v14 = vld [vmem:[%s2128_s1 + $0x138] sm:$0xff] }
  0xbb   :  { %v960_v20 = vmax.f32 %v896_v16, 0.0  ;;  %v929_v21 = vmax.f32 %v865_v17, 0.0  ;;  %v580_v22 = vpop.f32.mrf.mxu2  ;;  %v503_v23 = vpop.f32.mrf.mxu0  ;;  %v788_v16 = vld [vmem:[%s2128_s1 + $0x40] sm:$0xff] }
  0xbc   :  { %1009 = vst.msk [vmem:[%s2129_s5 + $0x120] sm:$0xff] %vm972_vm2, %v944_v18  ;;  %v687_v24 = vmul.f32 %v1541_v7, %v580_v22  ;;  %v620_v25 = vpop.f32.mrf.mxu3  ;;  %v656_v26 = vmul.f32 %v1541_v7, %v503_v23  ;;  %v543_v27 = vpop.f32.mrf.mxu1 }
  0xbd   :  { %1025 = vst.msk [vmem:[%s2129_s5 + $0x1a0] sm:$0xff] %vm972_vm2, %v960_v20  ;;  %v703_v29 = vmul.f32 %v1541_v7, %v620_v25  ;;  %v672_v31 = vmul.f32 %v1541_v7, %v543_v27 }
  0xbe   :  { %978 = vst.msk [vmem:[%s2129_s5 + $0x28] sm:$0xff] %vm972_vm2, %v913_v19  ;;  %v753_v32 = vadd.f32 %v1546_v13, %v687_v24  ;;  %v722_v34 = vadd.f32 %v1546_v13, %v656_v26  ;;  %v835_v19 = vld [vmem:[%s2128_s1 + $0x1b8] sm:$0xff] }
  0xbf   :  { %994 = vst.msk [vmem:[%s2129_s5 + $0xa8] sm:$0xff] %vm972_vm2, %v929_v21  ;;  %v769_v36 = vadd.f32 %v1546_v13, %v703_v29  ;;  %v738_v37 = vadd.f32 %v1546_v13, %v672_v31  ;;  %v804_v21 = vld [vmem:[%s2128_s1 + $0xc0] sm:$0xff] }
  0xc0   :  { %v881_v38 = vadd.f32 %v817_v28, %v753_v32  ;;  %v850_v39 = vadd.f32 %v786_v30, %v722_v34 }
  0xc1   :  { %v897_v40 = vadd.f32 %v833_v33, %v769_v36  ;;  %v866_v41 = vadd.f32 %v802_v35, %v738_v37 }
  0xc2   :  { %v945_v42 = vmax.f32 %v881_v38, 0.0  ;;  %v914_v43 = vmax.f32 %v850_v39, 0.0  ;;  %v820_v38 = vld [vmem:[%s2128_s1 + $0x140] sm:$0xff] }
  0xc3   :  { %v961_v44 = vmax.f32 %v897_v40, 0.0  ;;  %v930_v45 = vmax.f32 %v866_v41, 0.0  ;;  %v583_v46 = vpop.f32.mrf.mxu2  ;;  %v505_v47 = vpop.f32.mrf.mxu0  ;;  %v789_v40 = vld [vmem:[%s2128_s1 + $0x48] sm:$0xff] }
  0xc4   :  { %1010 = vst.msk [vmem:[%s2129_s5 + $0x128] sm:$0xff] %vm972_vm2, %v945_v42  ;;  %v688_v48 = vmul.f32 %v1541_v7, %v583_v46  ;;  %v623_v49 = vpop.f32.mrf.mxu3  ;;  %v657_v50 = vmul.f32 %v1541_v7, %v505_v47  ;;  %v545_v51 = vpop.f32.mrf.mxu1 }
  0xc5   :  { %1026 = vst.msk [vmem:[%s2129_s5 + $0x1a8] sm:$0xff] %vm972_vm2, %v961_v44  ;;  %v704_v53 = vmul.f32 %v1541_v7, %v623_v49  ;;  %v673_v55 = vmul.f32 %v1541_v7, %v545_v51 }
  0xc6   :  { %979 = vst.msk [vmem:[%s2129_s5 + $0x30] sm:$0xff] %vm972_vm2, %v914_v43  ;;  %v754_v56 = vadd.f32 %v1546_v13, %v688_v48  ;;  %v723_v58 = vadd.f32 %v1546_v13, %v657_v50  ;;  %v836_v43 = vld [vmem:[%s2128_s1 + $0x1c0] sm:$0xff] }
  0xc7   :  { %995 = vst.msk [vmem:[%s2129_s5 + $0xb0] sm:$0xff] %vm972_vm2, %v930_v45  ;;  %v770_v60 = vadd.f32 %v1546_v13, %v704_v53  ;;  %v739_v61 = vadd.f32 %v1546_v13, %v673_v55  ;;  %v805_v45 = vld [vmem:[%s2128_s1 + $0xc8] sm:$0xff] }
  0xc8   :  { %v882_v62 = vadd.f32 %v818_v52, %v754_v56  ;;  %v851_v63 = vadd.f32 %v787_v54, %v723_v58 }
  0xc9   :  { %v898_v0 = vadd.f32 %v834_v57, %v770_v60  ;;  %v867_v1 = vadd.f32 %v803_v59, %v739_v61 }
  0xca   :  { %v946_v2 = vmax.f32 %v882_v62, 0.0  ;;  %v915_v5 = vmax.f32 %v851_v63, 0.0  ;;  %v821_v62 = vld [vmem:[%s2128_s1 + $0x148] sm:$0xff] }
  0xcb   :  { %v962_v3 = vmax.f32 %v898_v0, 0.0  ;;  %v931_v4 = vmax.f32 %v867_v1, 0.0  ;;  %v585_v6 = vpop.f32.mrf.mxu2  ;;  %v508_v8 = vpop.f32.mrf.mxu0  ;;  %v790_v0 = vld [vmem:[%s2128_s1 + $0x50] sm:$0xff] }
  0xcc   :  { %1011 = vst.msk [vmem:[%s2129_s5 + $0x130] sm:$0xff] %vm972_vm2, %v946_v2  ;;  %v689_v9 = vmul.f32 %v1541_v7, %v585_v6  ;;  %v625_v10 = vpop.f32.mrf.mxu3  ;;  %v658_v11 = vmul.f32 %v1541_v7, %v508_v8  ;;  %v548_v12 = vpop.f32.mrf.mxu1 }
  0xcd   :  { %1027 = vst.msk [vmem:[%s2129_s5 + $0x1b0] sm:$0xff] %vm972_vm2, %v962_v3  ;;  %v705_v15 = vmul.f32 %v1541_v7, %v625_v10  ;;  %v674_v17 = vmul.f32 %v1541_v7, %v548_v12 }
  0xce   :  { %980 = vst.msk [vmem:[%s2129_s5 + $0x38] sm:$0xff] %vm972_vm2, %v915_v5  ;;  %v755_v18 = vadd.f32 %v1546_v13, %v689_v9  ;;  %v724_v20 = vadd.f32 %v1546_v13, %v658_v11  ;;  %v837_v5 = vld [vmem:[%s2128_s1 + $0x1c8] sm:$0xff] }
  0xcf   :  { %996 = vst.msk [vmem:[%s2129_s5 + $0xb8] sm:$0xff] %vm972_vm2, %v931_v4  ;;  %v771_v22 = vadd.f32 %v1546_v13, %v705_v15  ;;  %v740_v23 = vadd.f32 %v1546_v13, %v674_v17  ;;  %v806_v4 = vld [vmem:[%s2128_s1 + $0xd0] sm:$0xff] }
  0xd0   :  { %v883_v24 = vadd.f32 %v819_v14, %v755_v18  ;;  %v852_v25 = vadd.f32 %v788_v16, %v724_v20 }
  0xd1   :  { %v899_v26 = vadd.f32 %v835_v19, %v771_v22  ;;  %v868_v27 = vadd.f32 %v804_v21, %v740_v23 }
  0xd2   :  { %v947_v28 = vmax.f32 %v883_v24, 0.0  ;;  %v916_v29 = vmax.f32 %v852_v25, 0.0  ;;  %v822_v24 = vld [vmem:[%s2128_s1 + $0x150] sm:$0xff] }
  0xd3   :  { %v963_v30 = vmax.f32 %v899_v26, 0.0  ;;  %v932_v31 = vmax.f32 %v868_v27, 0.0  ;;  %v588_v32 = vpop.f32.mrf.mxu2  ;;  %v510_v33 = vpop.f32.mrf.mxu0  ;;  %v791_v26 = vld [vmem:[%s2128_s1 + $0x58] sm:$0xff] }
  0xd4   :  { %1012 = vst.msk [vmem:[%s2129_s5 + $0x138] sm:$0xff] %vm972_vm2, %v947_v28  ;;  %v690_v34 = vmul.f32 %v1541_v7, %v588_v32  ;;  %v628_v35 = vpop.f32.mrf.mxu3  ;;  %v659_v36 = vmul.f32 %v1541_v7, %v510_v33  ;;  %v550_v37 = vpop.f32.mrf.mxu1 }
  0xd5   :  { %1028 = vst.msk [vmem:[%s2129_s5 + $0x1b8] sm:$0xff] %vm972_vm2, %v963_v30  ;;  %v706_v39 = vmul.f32 %v1541_v7, %v628_v35  ;;  %v675_v41 = vmul.f32 %v1541_v7, %v550_v37 }
  0xd6   :  { %981 = vst.msk [vmem:[%s2129_s5 + $0x40] sm:$0xff] %vm972_vm2, %v916_v29  ;;  %v756_v42 = vadd.f32 %v1546_v13, %v690_v34  ;;  %v725_v44 = vadd.f32 %v1546_v13, %v659_v36  ;;  %v838_v29 = vld [vmem:[%s2128_s1 + $0x1d0] sm:$0xff] }
  0xd7   :  { %997 = vst.msk [vmem:[%s2129_s5 + $0xc0] sm:$0xff] %vm972_vm2, %v932_v31  ;;  %v772_v46 = vadd.f32 %v1546_v13, %v706_v39  ;;  %v741_v47 = vadd.f32 %v1546_v13, %v675_v41  ;;  %v807_v31 = vld [vmem:[%s2128_s1 + $0xd8] sm:$0xff] }
  0xd8   :  { %v884_v48 = vadd.f32 %v820_v38, %v756_v42  ;;  %v853_v49 = vadd.f32 %v789_v40, %v725_v44 }
  0xd9   :  { %v900_v50 = vadd.f32 %v836_v43, %v772_v46  ;;  %v869_v51 = vadd.f32 %v805_v45, %v741_v47 }
  0xda   :  { %v948_v52 = vmax.f32 %v884_v48, 0.0  ;;  %v917_v53 = vmax.f32 %v853_v49, 0.0  ;;  %v823_v48 = vld [vmem:[%s2128_s1 + $0x158] sm:$0xff] }
  0xdb   :  { %v964_v54 = vmax.f32 %v900_v50, 0.0  ;;  %v933_v55 = vmax.f32 %v869_v51, 0.0  ;;  %v590_v56 = vpop.f32.mrf.mxu2  ;;  %v513_v57 = vpop.f32.mrf.mxu0  ;;  %v792_v50 = vld [vmem:[%s2128_s1 + $0x60] sm:$0xff] }
  0xdc   :  { %1013 = vst.msk [vmem:[%s2129_s5 + $0x140] sm:$0xff] %vm972_vm2, %v948_v52  ;;  %v691_v58 = vmul.f32 %v1541_v7, %v590_v56  ;;  %v630_v59 = vpop.f32.mrf.mxu3  ;;  %v660_v60 = vmul.f32 %v1541_v7, %v513_v57  ;;  %v553_v61 = vpop.f32.mrf.mxu1 }
  0xdd   :  { %1029 = vst.msk [vmem:[%s2129_s5 + $0x1c0] sm:$0xff] %vm972_vm2, %v964_v54  ;;  %v707_v63 = vmul.f32 %v1541_v7, %v630_v59  ;;  %v676_v1 = vmul.f32 %v1541_v7, %v553_v61 }
  0xde   :  { %982 = vst.msk [vmem:[%s2129_s5 + $0x48] sm:$0xff] %vm972_vm2, %v917_v53  ;;  %v757_v2 = vadd.f32 %v1546_v13, %v691_v58  ;;  %v726_v3 = vadd.f32 %v1546_v13, %v660_v60  ;;  %v839_v53 = vld [vmem:[%s2128_s1 + $0x1d8] sm:$0xff] }
  0xdf   :  { %998 = vst.msk [vmem:[%s2129_s5 + $0xc8] sm:$0xff] %vm972_vm2, %v933_v55  ;;  %v773_v6 = vadd.f32 %v1546_v13, %v707_v63  ;;  %v742_v8 = vadd.f32 %v1546_v13, %v676_v1  ;;  %v808_v55 = vld [vmem:[%s2128_s1 + $0xe0] sm:$0xff] }
  0xe0   :  { %v885_v9 = vadd.f32 %v821_v62, %v757_v2  ;;  %v854_v10 = vadd.f32 %v790_v0, %v726_v3 }
  0xe1   :  { %v901_v11 = vadd.f32 %v837_v5, %v773_v6  ;;  %v870_v12 = vadd.f32 %v806_v4, %v742_v8 }
  0xe2   :  { %v949_v14 = vmax.f32 %v885_v9, 0.0  ;;  %v918_v15 = vmax.f32 %v854_v10, 0.0  ;;  %v824_v9 = vld [vmem:[%s2128_s1 + $0x160] sm:$0xff] }
  0xe3   :  { %v965_v16 = vmax.f32 %v901_v11, 0.0  ;;  %v934_v17 = vmax.f32 %v870_v12, 0.0  ;;  %v593_v18 = vpop.f32.mrf.mxu2  ;;  %v515_v19 = vpop.f32.mrf.mxu0  ;;  %v793_v11 = vld [vmem:[%s2128_s1 + $0x68] sm:$0xff] }
  0xe4   :  { %1014 = vst.msk [vmem:[%s2129_s5 + $0x148] sm:$0xff] %vm972_vm2, %v949_v14  ;;  %v692_v20 = vmul.f32 %v1541_v7, %v593_v18  ;;  %v633_v21 = vpop.f32.mrf.mxu3  ;;  %v661_v22 = vmul.f32 %v1541_v7, %v515_v19  ;;  %v555_v23 = vpop.f32.mrf.mxu1 }
  0xe5   :  { %1030 = vst.msk [vmem:[%s2129_s5 + $0x1c8] sm:$0xff] %vm972_vm2, %v965_v16  ;;  %v708_v25 = vmul.f32 %v1541_v7, %v633_v21  ;;  %v677_v27 = vmul.f32 %v1541_v7, %v555_v23 }
  0xe6   :  { %983 = vst.msk [vmem:[%s2129_s5 + $0x50] sm:$0xff] %vm972_vm2, %v918_v15  ;;  %v758_v28 = vadd.f32 %v1546_v13, %v692_v20  ;;  %v727_v30 = vadd.f32 %v1546_v13, %v661_v22  ;;  %v840_v15 = vld [vmem:[%s2128_s1 + $0x1e0] sm:$0xff] }
  0xe7   :  { %999 = vst.msk [vmem:[%s2129_s5 + $0xd0] sm:$0xff] %vm972_vm2, %v934_v17  ;;  %v774_v32 = vadd.f32 %v1546_v13, %v708_v25  ;;  %v743_v33 = vadd.f32 %v1546_v13, %v677_v27  ;;  %v809_v17 = vld [vmem:[%s2128_s1 + $0xe8] sm:$0xff] }
  0xe8   :  { %v886_v34 = vadd.f32 %v822_v24, %v758_v28  ;;  %v855_v35 = vadd.f32 %v791_v26, %v727_v30 }
  0xe9   :  { %v902_v36 = vadd.f32 %v838_v29, %v774_v32  ;;  %v871_v37 = vadd.f32 %v807_v31, %v743_v33 }
  0xea   :  { %v950_v38 = vmax.f32 %v886_v34, 0.0  ;;  %v919_v39 = vmax.f32 %v855_v35, 0.0  ;;  %v825_v34 = vld [vmem:[%s2128_s1 + $0x168] sm:$0xff] }
  0xeb   :  { %v966_v40 = vmax.f32 %v902_v36, 0.0  ;;  %v935_v41 = vmax.f32 %v871_v37, 0.0  ;;  %v595_v42 = vpop.f32.mrf.mxu2  ;;  %v518_v43 = vpop.f32.mrf.mxu0  ;;  %v794_v36 = vld [vmem:[%s2128_s1 + $0x70] sm:$0xff] }
  0xec   :  { %1015 = vst.msk [vmem:[%s2129_s5 + $0x150] sm:$0xff] %vm972_vm2, %v950_v38  ;;  %v693_v44 = vmul.f32 %v1541_v7, %v595_v42  ;;  %v635_v45 = vpop.f32.mrf.mxu3  ;;  %v662_v46 = vmul.f32 %v1541_v7, %v518_v43  ;;  %v558_v47 = vpop.f32.mrf.mxu1 }
  0xed   :  { %1031 = vst.msk [vmem:[%s2129_s5 + $0x1d0] sm:$0xff] %vm972_vm2, %v966_v40  ;;  %v709_v49 = vmul.f32 %v1541_v7, %v635_v45  ;;  %v678_v51 = vmul.f32 %v1541_v7, %v558_v47 }
  0xee   :  { %984 = vst.msk [vmem:[%s2129_s5 + $0x58] sm:$0xff] %vm972_vm2, %v919_v39  ;;  %v759_v52 = vadd.f32 %v1546_v13, %v693_v44  ;;  %v728_v54 = vadd.f32 %v1546_v13, %v662_v46  ;;  %v841_v39 = vld [vmem:[%s2128_s1 + $0x1e8] sm:$0xff] }
  0xef   :  { %1000 = vst.msk [vmem:[%s2129_s5 + $0xd8] sm:$0xff] %vm972_vm2, %v935_v41  ;;  %v775_v56 = vadd.f32 %v1546_v13, %v709_v49  ;;  %v744_v57 = vadd.f32 %v1546_v13, %v678_v51  ;;  %v810_v41 = vld [vmem:[%s2128_s1 + $0xf0] sm:$0xff] }
  0xf0   :  { %v887_v58 = vadd.f32 %v823_v48, %v759_v52  ;;  %v856_v59 = vadd.f32 %v792_v50, %v728_v54 }
  0xf1   :  { %v903_v60 = vadd.f32 %v839_v53, %v775_v56  ;;  %v872_v61 = vadd.f32 %v808_v55, %v744_v57 }
  0xf2   :  { %v951_v62 = vmax.f32 %v887_v58, 0.0  ;;  %v920_v63 = vmax.f32 %v856_v59, 0.0  ;;  %v826_v58 = vld [vmem:[%s2128_s1 + $0x170] sm:$0xff] }
  0xf3   :  { %v967_v0 = vmax.f32 %v903_v60, 0.0  ;;  %v936_v1 = vmax.f32 %v872_v61, 0.0  ;;  %v598_v2 = vpop.f32.mrf.mxu2  ;;  %v520_v5 = vpop.f32.mrf.mxu0  ;;  %v795_v60 = vld [vmem:[%s2128_s1 + $0x78] sm:$0xff] }
  0xf4   :  { %1016 = vst.msk [vmem:[%s2129_s5 + $0x158] sm:$0xff] %vm972_vm2, %v951_v62  ;;  %v694_v3 = vmul.f32 %v1541_v7, %v598_v2  ;;  %v638_v4 = vpop.f32.mrf.mxu3  ;;  %v663_v6 = vmul.f32 %v1541_v7, %v520_v5  ;;  %v560_v8 = vpop.f32.mrf.mxu1 }
  0xf5   :  { %1032 = vst.msk [vmem:[%s2129_s5 + $0x1d8] sm:$0xff] %vm972_vm2, %v967_v0  ;;  %v710_v10 = vmul.f32 %v1541_v7, %v638_v4  ;;  %v679_v12 = vmul.f32 %v1541_v7, %v560_v8 }
  0xf6   :  { %985 = vst.msk [vmem:[%s2129_s5 + $0x60] sm:$0xff] %vm972_vm2, %v920_v63  ;;  %v760_v14 = vadd.f32 %v1546_v13, %v694_v3  ;;  %v729_v16 = vadd.f32 %v1546_v13, %v663_v6  ;;  %v842_v63 = vld [vmem:[%s2128_s1 + $0x1f0] sm:$0xff] }
  0xf7   :  { %1001 = vst.msk [vmem:[%s2129_s5 + $0xe0] sm:$0xff] %vm972_vm2, %v936_v1  ;;  %v776_v18 = vadd.f32 %v1546_v13, %v710_v10  ;;  %v745_v19 = vadd.f32 %v1546_v13, %v679_v12  ;;  %v811_v1 = vld [vmem:[%s2128_s1 + $0xf8] sm:$0xff] }
  0xf8   :  { %v888_v20 = vadd.f32 %v824_v9, %v760_v14  ;;  %v857_v21 = vadd.f32 %v793_v11, %v729_v16 }
  0xf9   :  { %v904_v22 = vadd.f32 %v840_v15, %v776_v18  ;;  %v873_v23 = vadd.f32 %v809_v17, %v745_v19  ;;  %v827_v17 = vld [vmem:[%s2128_s1 + $0x178] sm:$0xff] }
  0xfa   :  { %v952_v24 = vmax.f32 %v888_v20, 0.0  ;;  %v921_v25 = vmax.f32 %v857_v21, 0.0  ;;  %v843_v20 = vld [vmem:[%s2128_s1 + $0x1f8] sm:$0xff] }
  0xfb   :  { %v968_v26 = vmax.f32 %v904_v22, 0.0  ;;  %v937_v27 = vmax.f32 %v873_v23, 0.0  ;;  %v600_v28 = vpop.f32.mrf.mxu2  ;;  %v523_v29 = vpop.f32.mrf.mxu0 }
  0xfc   :  { %1017 = vst.msk [vmem:[%s2129_s5 + $0x160] sm:$0xff] %vm972_vm2, %v952_v24  ;;  %v695_v30 = vmul.f32 %v1541_v7, %v600_v28  ;;  %v640_v31 = vpop.f32.mrf.mxu3  ;;  %v664_v32 = vmul.f32 %v1541_v7, %v523_v29  ;;  %v563_v33 = vpop.f32.mrf.mxu1 }
  0xfd   :  { %1033 = vst.msk [vmem:[%s2129_s5 + $0x1e0] sm:$0xff] %vm972_vm2, %v968_v26  ;;  %v711_v35 = vmul.f32 %v1541_v7, %v640_v31  ;;  %v680_v37 = vmul.f32 %v1541_v7, %v563_v33 }
  0xfe   :  { %986 = vst.msk [vmem:[%s2129_s5 + $0x68] sm:$0xff] %vm972_vm2, %v921_v25  ;;  %v761_v38 = vadd.f32 %v1546_v13, %v695_v30  ;;  %v730_v40 = vadd.f32 %v1546_v13, %v664_v32 }
  0xff   :  { %1002 = vst.msk [vmem:[%s2129_s5 + $0xe8] sm:$0xff] %vm972_vm2, %v937_v27  ;;  %v777_v42 = vadd.f32 %v1546_v13, %v711_v35  ;;  %v746_v43 = vadd.f32 %v1546_v13, %v680_v37 }
 0x100   :  { %v889_v44 = vadd.f32 %v825_v34, %v761_v38  ;;  %v858_v45 = vadd.f32 %v794_v36, %v730_v40 }
 0x101   :  { %v905_v46 = vadd.f32 %v841_v39, %v777_v42  ;;  %v874_v47 = vadd.f32 %v810_v41, %v746_v43 }
 0x102   :  { %v953_v48 = vmax.f32 %v889_v44, 0.0  ;;  %v922_v49 = vmax.f32 %v858_v45, 0.0 }
 0x103   :  { %v969_v50 = vmax.f32 %v905_v46, 0.0  ;;  %v938_v51 = vmax.f32 %v874_v47, 0.0  ;;  %v603_v52 = vpop.f32.mrf.mxu2  ;;  %v525_v53 = vpop.f32.mrf.mxu0 }
 0x104   :  { %1018 = vst.msk [vmem:[%s2129_s5 + $0x168] sm:$0xff] %vm972_vm2, %v953_v48  ;;  %v696_v54 = vmul.f32 %v1541_v7, %v603_v52  ;;  %v643_v55 = vpop.f32.mrf.mxu3  ;;  %v665_v56 = vmul.f32 %v1541_v7, %v525_v53  ;;  %v565_v57 = vpop.f32.mrf.mxu1 }
 0x105   :  { %1034 = vst.msk [vmem:[%s2129_s5 + $0x1e8] sm:$0xff] %vm972_vm2, %v969_v50  ;;  %v712_v59 = vmul.f32 %v1541_v7, %v643_v55  ;;  %v681_v61 = vmul.f32 %v1541_v7, %v565_v57 }
 0x106   :  { %987 = vst.msk [vmem:[%s2129_s5 + $0x70] sm:$0xff] %vm972_vm2, %v922_v49  ;;  %v762_v62 = vadd.f32 %v1546_v13, %v696_v54  ;;  %v731_v0 = vadd.f32 %v1546_v13, %v665_v56 }
 0x107   :  { %1003 = vst.msk [vmem:[%s2129_s5 + $0xf0] sm:$0xff] %vm972_vm2, %v938_v51  ;;  %v778_v2 = vadd.f32 %v1546_v13, %v712_v59  ;;  %v747_v5 = vadd.f32 %v1546_v13, %v681_v61 }
 0x108   :  { %v890_v3 = vadd.f32 %v826_v58, %v762_v62  ;;  %v859_v4 = vadd.f32 %v795_v60, %v731_v0 }
 0x109   :  { %v906_v6 = vadd.f32 %v842_v63, %v778_v2  ;;  %v875_v8 = vadd.f32 %v811_v1, %v747_v5 }
 0x10a   :  { %v954_v9 = vmax.f32 %v890_v3, 0.0  ;;  %v923_v10 = vmax.f32 %v859_v4, 0.0 }
 0x10b   :  { %v970_v11 = vmax.f32 %v906_v6, 0.0  ;;  %v939_v12 = vmax.f32 %v875_v8, 0.0  ;;  %v605_v14 = vpop.f32.mrf.mxu2 }
 0x10c   :  { %1019 = vst.msk [vmem:[%s2129_s5 + $0x170] sm:$0xff] %vm972_vm2, %v954_v9  ;;  %v697_v15 = vmul.f32 %v1541_v7, %v605_v14  ;;  %v645_v16 = vpop.f32.mrf.mxu3 }
 0x10d   :  { %1035 = vst.msk [vmem:[%s2129_s5 + $0x1f0] sm:$0xff] %vm972_vm2, %v970_v11  ;;  %v713_v18 = vmul.f32 %v1541_v7, %v645_v16 }
 0x10e   :  { %988 = vst.msk [vmem:[%s2129_s5 + $0x78] sm:$0xff] %vm972_vm2, %v923_v10  ;;  %v763_v19 = vadd.f32 %v1546_v13, %v697_v15 }
 0x10f   :  { %1004 = vst.msk [vmem:[%s2129_s5 + $0xf8] sm:$0xff] %vm972_vm2, %v939_v12  ;;  %v779_v21 = vadd.f32 %v1546_v13, %v713_v18 }
 0x110   :  { %v891_v22 = vadd.f32 %v827_v17, %v763_v19 }
 0x111   :  { %v907_v7 = vadd.f32 %v843_v20, %v779_v21 }
 0x112   :  { %v955_v23 = vmax.f32 %v891_v22, 0.0 }
 0x113   :  { %v971_v24 = vmax.f32 %v907_v7, 0.0 }
 0x114   :  { %1020 = vst.msk [vmem:[%s2129_s5 + $0x178] sm:$0xff] %vm972_vm2, %v955_v23 }
 0x115   :  { %1036 = vst.msk [vmem:[%s2129_s5 + $0x1f8] sm:$0xff] %vm972_vm2, %v971_v24 }

</bundles_post_ra>
